<compile_context>
chip_gen: v6e
topology: v6e:2x2x1
jax: 0.10.0
libtpu: 0.0.40
codegen_flags: <defaults>
</compile_context>

<pallas_src>
import functools
import math

import jax
import jax.numpy as jnp
from jax.experimental import pallas as pl
from jax.experimental.pallas import tpu as pltpu

# ----------------------- small deterministic config -----------------------
NUM_PARAMS = 4
DENSE_UNITS_PARAMS = (32, 32, 16)
TCN_FILTERS = (32, 32)
TCN_KERNEL_SIZE = 2
FOURIER_NUM_BANDS = 4
BN_EPS = 1e-5
SLAB_WIDTH = 128            # lane width of the packed weight slab


def _ceil8(n):
    return -(-n // 8) * 8


# --------------------------- fused forward kernel ---------------------------
def _fused_kernel(xp_ref, v_ref, w_ref, o_ref, *, offs, layer_meta):
    """Forward for one block of Bt batch elements on a (M=Bt*L, C) slab.

    xp_ref : (Bt, NUM_PARAMS)   physics parameters
    v_ref  : (M, 1)             flattened voltage grid
    w_ref  : (R, 128)           packed weights / constant matrices
    o_ref  : (Bt, L)            lane-dense output tile
    """

    def W(name):
        r0, (rr, cc) = offs[name]
        return w_ref[r0:r0 + rr, 0:cc]

    def mm(a, b):
        return jnp.dot(a, b, preferred_element_type=jnp.float32)

    # ---- param MLP (eval BatchNorm folded into weights, Dropout = id) ----
    h = xp_ref[...]                                              # (Bt, NP)
    h = jnp.maximum(mm(h, W("w1")) + W("b1"), 0.0)
    h = jnp.maximum(mm(h, W("w2")) + W("b2"), 0.0)
    pe = jnp.maximum(mm(h, W("w3")) + W("b3"), 0.0)              # (Bt, D2)

    # ---- Fourier features: sin/cos fused into one sin via a phase shift ----
    # TODO(synk): exact FourierFeatures class was not provided; using the
    # standard sin/cos encoding with frequencies 2^k * pi, k = 0..num_bands-1.
    ff = jnp.sin(v_ref[...] * W("freqs2") + W("phase"))          # (M, 2*NB)

    # ---- layer-0 input: tile-over-L + channel concat via placement matmuls ----
    x = mm(mm(W("T"), pe), W("P_pe")) + mm(ff, W("P_ff"))        # (M, cin0)

    # ---- causal dilated TemporalBlocks (shift = block-diag matmul on MXU) ----
    for li, shifts in enumerate(layer_meta):
        conv = W(f"bconv{li}")
        for k, s in enumerate(shifts):
            tap = x if s == 0 else mm(W(f"S{s}"), x)             # causal shift
            conv = conv + mm(tap, W(f"wtap{li}_{k}"))
        res = mm(x, W(f"wres{li}")) + W(f"bres{li}")             # id or 1x1 down
        x = jnp.maximum(jnp.maximum(conv, 0.0) + res, 0.0)

    # ---- final 1x1 projection, delivered lane-dense as a (Bt, L) tile ----
    z = mm(x, W("wp_wide"))                                      # (M, L)
    o_ref[...] = mm(W("Tt"), W("E") * z) + W("bp")               # (Bt, L)


# --------------------------- host-side weight prep ---------------------------
def _pack_constants(P, Bt, L):
    """Fold BN / weight_norm / identity-residual and pack everything into one
    lane-aligned (rows, 128) f32 slab; return (slab, offsets, layer_meta)."""
    D2 = DENSE_UNITS_PARAMS[2]
    NB = FOURIER_NUM_BANDS
    M = Bt * L
    entries = {}

    # MLP with eval-mode BatchNorm folded in.
    for i in (1, 2, 3):
        s = P[f"s{i}"]
        entries[f"w{i}"] = P[f"w{i}"] * s[None, :]
        entries[f"b{i}"] = (P[f"b{i}"] * s + P[f"t{i}"])[None, :]

    # Fourier: sin(v*f) and cos(v*f)=sin(v*f + pi/2) as one sin.
    f = P["freqs"]
    entries["freqs2"] = jnp.concatenate([f, f])[None, :]
    entries["phase"] = jnp.concatenate(
        [jnp.zeros_like(f), jnp.full_like(f, 0.5 * math.pi)])[None, :]

    # Placement matrices for the [param_tiled | fourier] layer-0 input and the
    # per-batch tiling matrix (tile param embedding over L via the MXU).
    cin0 = D2 + 2 * NB
    entries["P_pe"] = jnp.concatenate(
        [jnp.eye(D2, dtype=jnp.float32), jnp.zeros((D2, 2 * NB), jnp.float32)], axis=1)
    entries["P_ff"] = jnp.concatenate(
        [jnp.zeros((2 * NB, D2), jnp.float32), jnp.eye(2 * NB, dtype=jnp.float32)], axis=1)
    r = jnp.arange(M)[:, None]
    c = jnp.arange(M)[None, :]
    entries["T"] = ((r // L) == jnp.arange(Bt)[None, :]).astype(jnp.float32)

    # TCN layers: per-tap weights, bias, uniform residual matmul.
    layer_meta = []
    for li, layer in enumerate(P["tcn"]):
        K, cin, cout = layer["w"].shape
        d = int(layer["dilation"])
        shifts = tuple((K - 1 - k) * d for k in range(K))
        for k in range(K):
            entries[f"wtap{li}_{k}"] = layer["w"][k]
        entries[f"bconv{li}"] = layer["b"][None, :]
        if layer["wd"] is not None:
            entries[f"wres{li}"] = layer["wd"]
            entries[f"bres{li}"] = layer["bd"][None, :]
        else:
            entries[f"wres{li}"] = jnp.eye(cin, dtype=jnp.float32)
            entries[f"bres{li}"] = jnp.zeros((1, cout), jnp.float32)
        layer_meta.append(shifts)

    # Block-diagonal causal shift matrices (zero rows where t < shift).
    all_shifts = sorted({s for shifts in layer_meta for s in shifts if s > 0})
    for s in all_shifts:
        entries[f"S{s}"] = ((c == r - s) & ((r % L) >= s)).astype(jnp.float32)

    # Final 1x1 projection + lane-dense output remap constants.
    c_last = P["tcn"][-1]["w"].shape[-1]
    entries["wp_wide"] = jnp.broadcast_to(
        P["wp"].reshape(c_last, 1).astype(jnp.float32), (c_last, L))
    entries["E"] = ((r % L) == jnp.arange(L)[None, :]).astype(jnp.float32)
    entries["Tt"] = jnp.transpose(entries["T"])
    entries["bp"] = P["bp"].reshape(1, 1)

    # Pack into one (rows, 128) slab with 8-row-aligned static offsets.
    offs = {}
    row = 0
    for name, arr in entries.items():
        arr = jnp.asarray(arr, jnp.float32)
        assert arr.ndim == 2 and arr.shape[1] <= SLAB_WIDTH, name
        offs[name] = (row, (int(arr.shape[0]), int(arr.shape[1])))
        row += _ceil8(arr.shape[0])
    slab = jnp.zeros((max(8, _ceil8(row)), SLAB_WIDTH), jnp.float32)
    for name, arr in entries.items():
        r0, (rr, cc) = offs[name]
        slab = slab.at[r0:r0 + rr, 0:cc].set(jnp.asarray(arr, jnp.float32))
    return slab, offs, tuple(layer_meta)


def pallas_forward(x_params, v_grid, P, block_batch=None):
    x_params = jnp.asarray(x_params, jnp.float32)
    v_grid = jnp.asarray(v_grid, jnp.float32)
    B, NP = x_params.shape
    L = v_grid.shape[1]

    # Bt*L ~ 128 fills the MXU M-dim (v5e sweet spot; v6e/v7x could use 256).
    Bt = block_batch if block_batch is not None else max(1, 128 // max(L, 1))
    B_pad = ((B + Bt - 1) // Bt) * Bt
    if B_pad != B:
        padb = B_pad - B
        x_params = jnp.concatenate(
            [x_params, jnp.zeros((padb, NP), jnp.float32)], axis=0)
        v_grid = jnp.concatenate(
            [v_grid, jnp.zeros((padb, L), jnp.float32)], axis=0)
    M = Bt * L
    v_col = v_grid.reshape(B_pad * L, 1)

    slab, offs, layer_meta = _pack_constants(P, Bt, L)
    kernel = functools.partial(_fused_kernel, offs=offs, layer_meta=layer_meta)

    out = pl.pallas_call(
        kernel,
        out_shape=jax.ShapeDtypeStruct((B_pad, L), jnp.float32),
        grid=(B_pad // Bt,),
        in_specs=[
            pl.BlockSpec((Bt, NP), lambda i: (i, 0)),
            pl.BlockSpec((M, 1), lambda i: (i, 0)),
            pl.BlockSpec(slab.shape, lambda i: (0, 0)),   # resident weight slab
        ],
        out_specs=pl.BlockSpec((Bt, L), lambda i: (i, 0)),
        compiler_params=pltpu.CompilerParams(
            dimension_semantics=("parallel",)),
    )(x_params, v_col, slab)
    return out[:B]


# ------------------------------ reference -----------------------------------
def reference_forward(x_params, v_grid, P):
    h = x_params @ P["w1"] + P["b1"]
    h = jnp.maximum(h * P["s1"] + P["t1"], 0.0)
    h = h @ P["w2"] + P["b2"]
    h = jnp.maximum(h * P["s2"] + P["t2"], 0.0)
    h = h @ P["w3"] + P["b3"]
    pe = jnp.maximum(h * P["s3"] + P["t3"], 0.0)
    proj = v_grid[:, :, None] * P["freqs"].reshape(1, 1, -1)
    ff = jnp.concatenate([jnp.sin(proj), jnp.cos(proj)], axis=-1)
    B, L = v_grid.shape
    x = jnp.concatenate(
        [jnp.broadcast_to(pe[:, None, :], (B, L, pe.shape[-1])), ff], axis=-1)
    for layer in P["tcn"]:
        K = layer["w"].shape[0]
        acc = jnp.zeros(x.shape[:2] + (layer["w"].shape[-1],)) + layer["b"]
        for k in range(K):
            shift = (K - 1 - k) * layer["dilation"]
            xs = jnp.pad(x, ((0, 0), (shift, 0), (0, 0)))[:, :L, :]
            acc = acc + jnp.einsum("blc,cd->bld", xs, layer["w"][k])
        out = jnp.maximum(acc, 0.0)
        res = x if layer["wd"] is None else x @ layer["wd"] + layer["bd"]
        x = jnp.maximum(out + res, 0.0)
    return jnp.sum(x * P["wp"].reshape(1, 1, -1), axis=-1) + P["bp"]


# -------------------------------- params ------------------------------------
def xavier(key, shape, fan_in, fan_out):
    limit = math.sqrt(6.0 / (fan_in + fan_out))
    return jax.random.uniform(key, shape, jnp.float32, -limit, limit)


def make_params(key):
    ks = jax.random.split(key, 16)
    D0, D1, D2 = DENSE_UNITS_PARAMS
    bn_scale = 1.0 / math.sqrt(1.0 + BN_EPS)  # fresh BN stats, eval mode
    P = {
        "w1": xavier(ks[0], (NUM_PARAMS, D0), NUM_PARAMS, D0),
        "b1": jnp.zeros((D0,), jnp.float32),
        "s1": jnp.full((D0,), bn_scale, jnp.float32),
        "t1": jnp.zeros((D0,), jnp.float32),
        "w2": xavier(ks[1], (D0, D1), D0, D1),
        "b2": jnp.zeros((D1,), jnp.float32),
        "s2": jnp.full((D1,), bn_scale, jnp.float32),
        "t2": jnp.zeros((D1,), jnp.float32),
        "w3": xavier(ks[2], (D1, D2), D1, D2),
        "b3": jnp.zeros((D2,), jnp.float32),
        "s3": jnp.full((D2,), bn_scale, jnp.float32),
        "t3": jnp.zeros((D2,), jnp.float32),
        "freqs": (2.0 ** jnp.arange(FOURIER_NUM_BANDS, dtype=jnp.float32)) * jnp.pi,
    }
    tcn_in = DENSE_UNITS_PARAMS[2] + 2 * FOURIER_NUM_BANDS
    layers = []
    cin = tcn_in
    for i, cout in enumerate(TCN_FILTERS):
        d = 2 ** i
        K = TCN_KERNEL_SIZE
        w = xavier(ks[4 + 2 * i], (K, cin, cout), cin * K, cout * K)
        layer = {"w": w, "b": jnp.zeros((cout,), jnp.float32), "dilation": d,
                 "wd": None, "bd": None}
        if cin != cout:
            layer["wd"] = xavier(ks[5 + 2 * i], (cin, cout), cin, cout)
            layer["bd"] = jnp.zeros((cout,), jnp.float32)
        layers.append(layer)
        cin = cout
    P["tcn"] = layers
    P["wp"] = xavier(ks[12], (cin,), cin, 1)
    P["bp"] = jnp.zeros((), jnp.float32)
    return P


# --------------------------------- main --------------------------------------
if __name__ == "__main__":
    # B=16 with Bt=8 -> 2 "parallel" grid steps (both v7x TensorCores busy),
    # each working on a 128-row (Bt*L) slab.
    B, L = 16, 16
    key = jax.random.PRNGKey(0)
    k_in1, k_in2, k_par = jax.random.split(key, 3)
    x_params = jax.random.normal(k_in1, (B, NUM_PARAMS), jnp.float32)
    v_grid = jax.random.uniform(k_in2, (B, L), jnp.float32, -1.0, 1.0)

    P = make_params(k_par)

    out = jax.block_until_ready(pallas_forward(x_params, v_grid, P))

    ref = reference_forward(x_params, v_grid, P)
    assert out.shape == (B, L)
    assert jnp.allclose(out, ref, atol=1e-4, rtol=1e-4), "mismatch vs JAX reference"

    print("KERNEL_OK")
</pallas_src>

<mosaic_0001>
module attributes {stable_mosaic.version = 11 : i64} {
  func.func @_fused_kernel(%arg0: i32, %arg1: memref<8x4xf32, #tpu.memory_space<vmem>>, %arg2: memref<128x1xf32, #tpu.memory_space<vmem>>, %arg3: memref<896x128xf32, #tpu.memory_space<vmem>>, %arg4: memref<8x16xf32, #tpu.memory_space<vmem>>) attributes {dimension_semantics = [#tpu.dimension_semantics<parallel>], iteration_bounds = array<i64: 2>, scalar_prefetch = 0 : i64, scratch_operands = 0 : i64, tpu.core_type = #tpu.core_type<tc>, window_params = [{transform_indices = @transform_0, window_bounds = array<i64: 8, 4>}, {transform_indices = @transform_1, window_bounds = array<i64: 128, 1>}, {pipeline_mode = #tpu.pipeline_mode<synchronous>, transform_indices = @transform_2, window_bounds = array<i64: 896, 128>}, {transform_indices = @transform_3, window_bounds = array<i64: 8, 16>}]} {
    %c0 = arith.constant 0 : index
    %c0_0 = arith.constant 0 : index
    %0 = vector.load %arg1[%c0, %c0_0] : memref<8x4xf32, #tpu.memory_space<vmem>>, vector<8x4xf32>
    %c0_1 = arith.constant 0 : index
    %c0_2 = arith.constant 0 : index
    %1 = vector.load %arg3[%c0_1, %c0_2] : memref<896x128xf32, #tpu.memory_space<vmem>>, vector<4x32xf32>
    %cst = arith.constant dense<0.000000e+00> : vector<8x32xf32>
    %2 = tpu.matmul %0, %1, %cst {dimension_numbers = #tpu.dot_dimension_numbers<[1], [0], [0], [1], [0, 0, 1, 1], [], []>} : vector<8x4xf32>, vector<4x32xf32>, vector<8x32xf32> -> vector<8x32xf32>
    %c8 = arith.constant 8 : index
    %c0_3 = arith.constant 0 : index
    %3 = vector.load %arg3[%c8, %c0_3] : memref<896x128xf32, #tpu.memory_space<vmem>>, vector<1x32xf32>
    %4 = vector.broadcast %3 : vector<1x32xf32> to vector<8x32xf32>
    %5 = arith.addf %2, %4 : vector<8x32xf32>
    %cst_4 = arith.constant 0.000000e+00 : f32
    %6 = vector.broadcast %cst_4 : f32 to vector<8x32xf32>
    %7 = arith.maximumf %5, %6 : vector<8x32xf32>
    %c16 = arith.constant 16 : index
    %c0_5 = arith.constant 0 : index
    %8 = vector.load %arg3[%c16, %c0_5] : memref<896x128xf32, #tpu.memory_space<vmem>>, vector<32x32xf32>
    %cst_6 = arith.constant dense<0.000000e+00> : vector<8x32xf32>
    %9 = tpu.matmul %7, %8, %cst_6 {dimension_numbers = #tpu.dot_dimension_numbers<[1], [0], [0], [1], [0, 0, 1, 1], [], []>} : vector<8x32xf32>, vector<32x32xf32>, vector<8x32xf32> -> vector<8x32xf32>
    %c48 = arith.constant 48 : index
    %c0_7 = arith.constant 0 : index
    %10 = vector.load %arg3[%c48, %c0_7] : memref<896x128xf32, #tpu.memory_space<vmem>>, vector<1x32xf32>
    %11 = vector.broadcast %10 : vector<1x32xf32> to vector<8x32xf32>
    %12 = arith.addf %9, %11 : vector<8x32xf32>
    %cst_8 = arith.constant 0.000000e+00 : f32
    %13 = vector.broadcast %cst_8 : f32 to vector<8x32xf32>
    %14 = arith.maximumf %12, %13 : vector<8x32xf32>
    %c56 = arith.constant 56 : index
    %c0_9 = arith.constant 0 : index
    %15 = vector.load %arg3[%c56, %c0_9] : memref<896x128xf32, #tpu.memory_space<vmem>>, vector<32x16xf32>
    %cst_10 = arith.constant dense<0.000000e+00> : vector<8x16xf32>
    %16 = tpu.matmul %14, %15, %cst_10 {dimension_numbers = #tpu.dot_dimension_numbers<[1], [0], [0], [1], [0, 0, 1, 1], [], []>} : vector<8x32xf32>, vector<32x16xf32>, vector<8x16xf32> -> vector<8x16xf32>
    %c88 = arith.constant 88 : index
    %c0_11 = arith.constant 0 : index
    %17 = vector.load %arg3[%c88, %c0_11] : memref<896x128xf32, #tpu.memory_space<vmem>>, vector<1x16xf32>
    %18 = vector.broadcast %17 : vector<1x16xf32> to vector<8x16xf32>
    %19 = arith.addf %16, %18 : vector<8x16xf32>
    %cst_12 = arith.constant 0.000000e+00 : f32
    %20 = vector.broadcast %cst_12 : f32 to vector<8x16xf32>
    %21 = arith.maximumf %19, %20 : vector<8x16xf32>
    %c0_13 = arith.constant 0 : index
    %c0_14 = arith.constant 0 : index
    %22 = vector.load %arg2[%c0_13, %c0_14] : memref<128x1xf32, #tpu.memory_space<vmem>>, vector<128x1xf32>
    %c96 = arith.constant 96 : index
    %c0_15 = arith.constant 0 : index
    %23 = vector.load %arg3[%c96, %c0_15] : memref<896x128xf32, #tpu.memory_space<vmem>>, vector<1x8xf32>
    %24 = vector.broadcast %22 : vector<128x1xf32> to vector<128x8xf32>
    %25 = vector.broadcast %23 : vector<1x8xf32> to vector<128x8xf32>
    %26 = arith.mulf %24, %25 : vector<128x8xf32>
    %c104 = arith.constant 104 : index
    %c0_16 = arith.constant 0 : index
    %27 = vector.load %arg3[%c104, %c0_16] : memref<896x128xf32, #tpu.memory_space<vmem>>, vector<1x8xf32>
    %28 = vector.broadcast %27 : vector<1x8xf32> to vector<128x8xf32>
    %29 = arith.addf %26, %28 : vector<128x8xf32>
    %30 = math.sin %29 : vector<128x8xf32>
    %c136 = arith.constant 136 : index
    %c0_17 = arith.constant 0 : index
    %31 = vector.load %arg3[%c136, %c0_17] : memref<896x128xf32, #tpu.memory_space<vmem>>, vector<128x8xf32>
    %cst_18 = arith.constant dense<0.000000e+00> : vector<128x16xf32>
    %32 = tpu.matmul %31, %21, %cst_18 {dimension_numbers = #tpu.dot_dimension_numbers<[1], [0], [0], [1], [0, 0, 1, 1], [], []>} : vector<128x8xf32>, vector<8x16xf32>, vector<128x16xf32> -> vector<128x16xf32>
    %c112 = arith.constant 112 : index
    %c0_19 = arith.constant 0 : index
    %33 = vector.load %arg3[%c112, %c0_19] : memref<896x128xf32, #tpu.memory_space<vmem>>, vector<16x24xf32>
    %cst_20 = arith.constant dense<0.000000e+00> : vector<128x24xf32>
    %34 = tpu.matmul %32, %33, %cst_20 {dimension_numbers = #tpu.dot_dimension_numbers<[1], [0], [0], [1], [0, 0, 1, 1], [], []>} : vector<128x16xf32>, vector<16x24xf32>, vector<128x24xf32> -> vector<128x24xf32>
    %c128 = arith.constant 128 : index
    %c0_21 = arith.constant 0 : index
    %35 = vector.load %arg3[%c128, %c0_21] : memref<896x128xf32, #tpu.memory_space<vmem>>, vector<8x24xf32>
    %cst_22 = arith.constant dense<0.000000e+00> : vector<128x24xf32>
    %36 = tpu.matmul %30, %35, %cst_22 {dimension_numbers = #tpu.dot_dimension_numbers<[1], [0], [0], [1], [0, 0, 1, 1], [], []>} : vector<128x8xf32>, vector<8x24xf32>, vector<128x24xf32> -> vector<128x24xf32>
    %37 = arith.addf %34, %36 : vector<128x24xf32>
    %c312 = arith.constant 312 : index
    %c0_23 = arith.constant 0 : index
    %38 = vector.load %arg3[%c312, %c0_23] : memref<896x128xf32, #tpu.memory_space<vmem>>, vector<1x32xf32>
    %c464 = arith.constant 464 : index
    %c0_24 = arith.constant 0 : index
    %39 = vector.load %arg3[%c464, %c0_24] : memref<896x128xf32, #tpu.memory_space<vmem>>, vector<128x128xf32>
    %cst_25 = arith.constant dense<0.000000e+00> : vector<128x24xf32>
    %40 = tpu.matmul %39, %37, %cst_25 {dimension_numbers = #tpu.dot_dimension_numbers<[1], [0], [0], [1], [0, 0, 1, 1], [], []>} : vector<128x128xf32>, vector<128x24xf32>, vector<128x24xf32> -> vector<128x24xf32>
    %c264 = arith.constant 264 : index
    %c0_26 = arith.constant 0 : index
    %41 = vector.load %arg3[%c264, %c0_26] : memref<896x128xf32, #tpu.memory_space<vmem>>, vector<24x32xf32>
    %cst_27 = arith.constant dense<0.000000e+00> : vector<128x32xf32>
    %42 = tpu.matmul %40, %41, %cst_27 {dimension_numbers = #tpu.dot_dimension_numbers<[1], [0], [0], [1], [0, 0, 1, 1], [], []>} : vector<128x24xf32>, vector<24x32xf32>, vector<128x32xf32> -> vector<128x32xf32>
    %43 = vector.broadcast %38 : vector<1x32xf32> to vector<128x32xf32>
    %44 = arith.addf %43, %42 : vector<128x32xf32>
    %c288 = arith.constant 288 : index
    %c0_28 = arith.constant 0 : index
    %45 = vector.load %arg3[%c288, %c0_28] : memref<896x128xf32, #tpu.memory_space<vmem>>, vector<24x32xf32>
    %cst_29 = arith.constant dense<0.000000e+00> : vector<128x32xf32>
    %46 = tpu.matmul %37, %45, %cst_29 {dimension_numbers = #tpu.dot_dimension_numbers<[1], [0], [0], [1], [0, 0, 1, 1], [], []>} : vector<128x24xf32>, vector<24x32xf32>, vector<128x32xf32> -> vector<128x32xf32>
    %47 = arith.addf %44, %46 : vector<128x32xf32>
    %c320 = arith.constant 320 : index
    %c0_30 = arith.constant 0 : index
    %48 = vector.load %arg3[%c320, %c0_30] : memref<896x128xf32, #tpu.memory_space<vmem>>, vector<24x32xf32>
    %cst_31 = arith.constant dense<0.000000e+00> : vector<128x32xf32>
    %49 = tpu.matmul %37, %48, %cst_31 {dimension_numbers = #tpu.dot_dimension_numbers<[1], [0], [0], [1], [0, 0, 1, 1], [], []>} : vector<128x24xf32>, vector<24x32xf32>, vector<128x32xf32> -> vector<128x32xf32>
    %c344 = arith.constant 344 : index
    %c0_32 = arith.constant 0 : index
    %50 = vector.load %arg3[%c344, %c0_32] : memref<896x128xf32, #tpu.memory_space<vmem>>, vector<1x32xf32>
    %51 = vector.broadcast %50 : vector<1x32xf32> to vector<128x32xf32>
    %52 = arith.addf %49, %51 : vector<128x32xf32>
    %cst_33 = arith.constant 0.000000e+00 : f32
    %53 = vector.broadcast %cst_33 : f32 to vector<128x32xf32>
    %54 = arith.maximumf %47, %53 : vector<128x32xf32>
    %55 = arith.addf %54, %52 : vector<128x32xf32>
    %cst_34 = arith.constant 0.000000e+00 : f32
    %56 = vector.broadcast %cst_34 : f32 to vector<128x32xf32>
    %57 = arith.maximumf %55, %56 : vector<128x32xf32>
    %c416 = arith.constant 416 : index
    %c0_35 = arith.constant 0 : index
    %58 = vector.load %arg3[%c416, %c0_35] : memref<896x128xf32, #tpu.memory_space<vmem>>, vector<1x32xf32>
    %c592 = arith.constant 592 : index
    %c0_36 = arith.constant 0 : index
    %59 = vector.load %arg3[%c592, %c0_36] : memref<896x128xf32, #tpu.memory_space<vmem>>, vector<128x128xf32>
    %cst_37 = arith.constant dense<0.000000e+00> : vector<128x32xf32>
    %60 = tpu.matmul %59, %57, %cst_37 {dimension_numbers = #tpu.dot_dimension_numbers<[1], [0], [0], [1], [0, 0, 1, 1], [], []>} : vector<128x128xf32>, vector<128x32xf32>, vector<128x32xf32> -> vector<128x32xf32>
    %c352 = arith.constant 352 : index
    %c0_38 = arith.constant 0 : index
    %61 = vector.load %arg3[%c352, %c0_38] : memref<896x128xf32, #tpu.memory_space<vmem>>, vector<32x32xf32>
    %cst_39 = arith.constant dense<0.000000e+00> : vector<128x32xf32>
    %62 = tpu.matmul %60, %61, %cst_39 {dimension_numbers = #tpu.dot_dimension_numbers<[1], [0], [0], [1], [0, 0, 1, 1], [], []>} : vector<128x32xf32>, vector<32x32xf32>, vector<128x32xf32> -> vector<128x32xf32>
    %63 = vector.broadcast %58 : vector<1x32xf32> to vector<128x32xf32>
    %64 = arith.addf %63, %62 : vector<128x32xf32>
    %c384 = arith.constant 384 : index
    %c0_40 = arith.constant 0 : index
    %65 = vector.load %arg3[%c384, %c0_40] : memref<896x128xf32, #tpu.memory_space<vmem>>, vector<32x32xf32>
    %cst_41 = arith.constant dense<0.000000e+00> : vector<128x32xf32>
    %66 = tpu.matmul %57, %65, %cst_41 {dimension_numbers = #tpu.dot_dimension_numbers<[1], [0], [0], [1], [0, 0, 1, 1], [], []>} : vector<128x32xf32>, vector<32x32xf32>, vector<128x32xf32> -> vector<128x32xf32>
    %67 = arith.addf %64, %66 : vector<128x32xf32>
    %c424 = arith.constant 424 : index
    %c0_42 = arith.constant 0 : index
    %68 = vector.load %arg3[%c424, %c0_42] : memref<896x128xf32, #tpu.memory_space<vmem>>, vector<32x32xf32>
    %cst_43 = arith.constant dense<0.000000e+00> : vector<128x32xf32>
    %69 = tpu.matmul %57, %68, %cst_43 {dimension_numbers = #tpu.dot_dimension_numbers<[1], [0], [0], [1], [0, 0, 1, 1], [], []>} : vector<128x32xf32>, vector<32x32xf32>, vector<128x32xf32> -> vector<128x32xf32>
    %c456 = arith.constant 456 : index
    %c0_44 = arith.constant 0 : index
    %70 = vector.load %arg3[%c456, %c0_44] : memref<896x128xf32, #tpu.memory_space<vmem>>, vector<1x32xf32>
    %71 = vector.broadcast %70 : vector<1x32xf32> to vector<128x32xf32>
    %72 = arith.addf %69, %71 : vector<128x32xf32>
    %cst_45 = arith.constant 0.000000e+00 : f32
    %73 = vector.broadcast %cst_45 : f32 to vector<128x32xf32>
    %74 = arith.maximumf %67, %73 : vector<128x32xf32>
    %75 = arith.addf %74, %72 : vector<128x32xf32>
    %cst_46 = arith.constant 0.000000e+00 : f32
    %76 = vector.broadcast %cst_46 : f32 to vector<128x32xf32>
    %77 = arith.maximumf %75, %76 : vector<128x32xf32>
    %c720 = arith.constant 720 : index
    %c0_47 = arith.constant 0 : index
    %78 = vector.load %arg3[%c720, %c0_47] : memref<896x128xf32, #tpu.memory_space<vmem>>, vector<32x16xf32>
    %cst_48 = arith.constant dense<0.000000e+00> : vector<128x16xf32>
    %79 = tpu.matmul %77, %78, %cst_48 {dimension_numbers = #tpu.dot_dimension_numbers<[1], [0], [0], [1], [0, 0, 1, 1], [], []>} : vector<128x32xf32>, vector<32x16xf32>, vector<128x16xf32> -> vector<128x16xf32>
    %c880 = arith.constant 880 : index
    %c0_49 = arith.constant 0 : index
    %80 = vector.load %arg3[%c880, %c0_49] : memref<896x128xf32, #tpu.memory_space<vmem>>, vector<8x128xf32>
    %c752 = arith.constant 752 : index
    %c0_50 = arith.constant 0 : index
    %81 = vector.load %arg3[%c752, %c0_50] : memref<896x128xf32, #tpu.memory_space<vmem>>, vector<128x16xf32>
    %82 = arith.mulf %81, %79 : vector<128x16xf32>
    %cst_51 = arith.constant dense<0.000000e+00> : vector<8x16xf32>
    %83 = tpu.matmul %80, %82, %cst_51 {dimension_numbers = #tpu.dot_dimension_numbers<[1], [0], [0], [1], [0, 0, 1, 1], [], []>} : vector<8x128xf32>, vector<128x16xf32>, vector<8x16xf32> -> vector<8x16xf32>
    %c888 = arith.constant 888 : index
    %c0_52 = arith.constant 0 : index
    %84 = vector.load %arg3[%c888, %c0_52] : memref<896x128xf32, #tpu.memory_space<vmem>>, vector<1x1xf32>
    %85 = vector.broadcast %84 : vector<1x1xf32> to vector<8x16xf32>
    %86 = arith.addf %83, %85 : vector<8x16xf32>
    %c0_53 = arith.constant 0 : index
    %c0_54 = arith.constant 0 : index
    %87 = vector.load %arg4[%c0_53, %c0_54] : memref<8x16xf32, #tpu.memory_space<vmem>>, vector<8x16xf32>
    tpu.vector_store %arg4[%c0_53, %c0_54], %86 {strides = array<i32>} : memref<8x16xf32, #tpu.memory_space<vmem>>, vector<8x16xf32>,
    return
  }
  func.func @transform_0(%arg0: i32) -> (i32, i32) {
    %c0_i32 = arith.constant 0 : i32
    %c0_i32_0 = arith.constant 0 : i32
    return %arg0, %c0_i32 : i32, i32
  }
  func.func @transform_1(%arg0: i32) -> (i32, i32) {
    %c0_i32 = arith.constant 0 : i32
    %c0_i32_0 = arith.constant 0 : i32
    return %arg0, %c0_i32 : i32, i32
  }
  func.func @transform_2(%arg0: i32) -> (i32, i32) {
    %c0_i32 = arith.constant 0 : i32
    %c0_i32_0 = arith.constant 0 : i32
    %c0_i32_1 = arith.constant 0 : i32
    return %c0_i32, %c0_i32_0 : i32, i32
  }
  func.func @transform_3(%arg0: i32) -> (i32, i32) {
    %c0_i32 = arith.constant 0 : i32
    %c0_i32_0 = arith.constant 0 : i32
    return %arg0, %c0_i32 : i32, i32
  }
}

</mosaic_0001>

<bundles_post_ra>
// kernel: tpu_custom_call.1
= control target key start
LH: loop header
LB: loop body
LE: loop exit
PB: predicated region body
PF: predicated region fallthrough
CT: control target
= control target key end

     0   :  { %8 = vsyncpa [#allocation3], 0  ;;  %s8866_s0 = inlined_call_operand.vmem [shape: f32[16,4], index: 0, kind: input, shape index: {}]   ;;  %s8867_s1 = inlined_call_operand.vmem [shape: f32[256,1], index: 1, kind: input, shape index: {}]   ;;  %s8868_s2 = inlined_call_operand.hbm [shape: f32[896,128], index: 2, kind: input, shape index: {}]   ;;  %s8869_s3 = inlined_call_operand.hbm [shape: f32[16,16], index: 3, kind: output, shape index: {}]  }
   0x1   :  { %9 = vsyncpa [#allocation4], 0 }
   0x2   :  { %11 = vsyncpa [#allocation4 + $0x1], 0  ;;  %s6170_s12 = smov 0   ;;  %s6172_s13 = smov 0  }
   0x3   :  { %s6174_s14 = smov 0   ;;  %s6176_s15 = smov 0  }
   0x4 LB: > { %s6191_s16 = sadd.s32 4294967295, %s6135_s15   ;;  %s4847_s17 = sadd.s32 4294967294, %s6135_s15   ;;  %s6135_s15 = sphi %s6176_s15, %s9205_s15   ;;  %s6131_s14 = sphi %s6174_s14, %s9204_s14   ;;  %s6127_s13 = sphi %s6172_s13, %s9203_s13   ;;  %s6123_s12 = sphi %s6170_s12, %s9202_s12  }
   0x5   : > { %s6195_s18 = sadd.s32 1, %s6135_s15   ;;  %s97_s19 = sadd.s32 1, %s6131_s14 }
   0x6   : > { %s94_s20 = ssub.s32 %s6135_s15, %s6195_s18  ;;  %p107_p0 = scmp.ne.s32.totalorder %s6131_s14, %s6127_s13 }
   0x7   : > { %p95_p1 = scmp.eq.s32.totalorder %s94_s20, 0  ;;  %p108_p2 = scmp.eq.s32.totalorder %s6191_s16, 1 }
   0x8   : > { %p113_p3 = scmp.ne.s32.totalorder %s6127_s13, %s6123_s12  ;;  %p114_p4 = scmp.eq.s32.totalorder %s4847_s17, 1 }
   0x9   : > { %s6206_s21 = scalar_select %p95_p1, %s6131_s14, %s97_s19  }
   0xa   : > { %p6208_p5 = por %p108_p2, %p107_p0  ;;  %p6212_p6 = por %p114_p4, %p113_p3 }
   0xb   : > { %p4848_p7 = scmp.ge.s32.totalorder %s6135_s15, 1  ;;  %p121_p8 = scmp.lt.s32.totalorder %s6135_s15, 3 }
   0xc   : > { %s8972_s23 = scalar_select %p6212_p6, 1, 0 }
   0xd   : > { %p5932_p9 = scmp.eq.s32.totalorder %s6191_s16, 0  ;;  %p6219_p10 = pnand %p4848_p7, %p121_p8 }
   0xe   : > { %s6137_s25 = smov [#allocation2]  }
   0xf   : > { %s133_s26 = sshll.u32 %s6137_s25, 4  ;;  %p5924_p11 = pneg %p6219_p10  ;;  %s134_s26 = int_to_ptr.vmem [resolvable:$true] %s133_s26 }
  0x10   : > { %s6056_s27 = scalar_lea.vmem %s134_s26, 14336  ;;  %p6064_p3 = scmp.lt.s32.totalorder %s134_s26, %s134_s26 }
  0x11   : > { %p5925_p12 = pnand %p5932_p9, %p5924_p11  ;;  %p6057_p0 = scmp.ne.s32.totalorder %s134_s26, %s6056_s27 }
  0x12   : > { %p6065_p4 = scmp.lt.s32.totalorder %s6056_s27, %s6056_s27 }
  0x13   : > { %p6047_p13 = pneg %p5925_p12 }
  0x14   : > { %p6066_p6 = por %p6065_p4, %p6064_p3 }
  0x15   : > { %p6059_p1 = pnand %p6057_p0, %p6047_p13 }
  0x17   : > { %p6060_p2 = pneg %p6059_p1 }
  0x19   : > { %p6067_p7 = pnand %p6066_p6, %p6060_p2 }
  0x1b   : > { %6070 = shalt.err (!%p6067_p7)
}
  0x1c   : > { %s6138_s28 = smov 128   ;;  %s6139_s29 = smov 8  }
  0x1d   : > { %5927 = dma.hbm_to_vmem [thread:$0]  (!%p5925_p12), %s8868_s2, 14336, %s134_s26, [#allocation3], %s6138_s28, %s6138_s28, %s6139_s29  }
  0x1e   : > { %165 = sbr.rel (%p6219_p10) target bundleno = 2561 (0xa01), region = 32 }
  0x23   : > { %6114 = dma.done.wait (%p5932_p9), [#allocation3], 14336  }
  0x24   : > { %6116 = vsyncadd (%p5932_p9), [#allocation3], 4294952960  ;;  %p193_p8 = scmp.lt.s32.totalorder %s6191_s16, 1  ;;  %v8870_v0 = vmov 0.0   ;;  %vm8940_vm0 = vmmov 0   ;;  %vm214_vm1 = vcmask 1043456  }
  0x25   : > { %5380 = vmatprep.subr.mxu0 %v8870_v0  ;;  %5382 = vmatprep.mubr.msk.f32.mxu0 %vm8940_vm0, %v8870_v0  ;;  %vm210_vm2 = vcmask 31744   ;;  %v204_v1 = vld [vmem:[#allocation2] sm:$0xf]  ;;  %v292_v3 = vld [vmem:[#allocation2 + $0x28] sm:$0xff]  ;;  %v290_v5 = vld [vmem:[#allocation2 + $0x18] sm:$0xff]  ;;  %vm8949_vm3 = vcmask 261120  }
  0x26   : > { %s194_s5 = scalar_select %p193_p8, %s6191_s16, 1  ;;  %5385 = vmatprep.subr.mxu1 %v8870_v0  ;;  %5393 = vmatprep.mubr.msk.f32.mxu1 %vm8940_vm0, %v8870_v0  ;;  %v291_v4 = vld [vmem:[#allocation2 + $0x20] sm:$0xff]  ;;  %v289_v6 = vld [vmem:[#allocation2 + $0x10] sm:$0xff]  ;;  %v4857_v8 = vld [vmem:[#allocation2 + $0x8] ss:$0 sm:$0xff]  ;;  %v6142_v16 = vmov 0  }
  0x27   : > { %5381 = vmatpush3.msk.msra.mxu0 %vm214_vm1, %v204_v1  ;;  %5386 = vmatpush3.msra.mxu1 %v292_v3  ;;  %v376_v7 = vld [vmem:[#allocation2 + $0x50] sm:$0xff]  ;;  %v375_v13 = vld [vmem:[#allocation2 + $0x48] sm:$0xff]  ;;  %v374_v14 = vld [vmem:[#allocation2 + $0x40] sm:$0xff]  ;;  %s4855_s10 = sshll.u32 %s6191_s16, 4  ;;  %vm2274_vm4 = vcmask 64512   ;;  %s190_s24 = sand.u32 1, %s6127_s13  }
  0x28   : > { %s4854_s6 = sshll.u32 %s194_s5, 3  ;;  %5387 = vmatprep.subr.mxu1 %v8870_v0  ;;  %5396 = vmatprep.subr.mxu0 %v8870_v0  ;;  %v373_v15 = vld [vmem:[#allocation2 + $0x38] sm:$0xff]  ;;  %p198_p6 = scmp.lt.s32.totalorder %s4855_s10, 31  ;;  %v4860_v33 = vld [vmem:[#allocation2 + $0x30] ss:$0 sm:$0xff]  ;;  %v2258_v44 = vld [vmem:[#allocation2 + $0x88] sm:$0xff] }
  0x29   : > { %s196_s9 = scalar_lea.vmem %s8866_s0, %s4854_s6  ;;  %5388 = vmatpush3.msra.mxu1 %v291_v4  ;;  %5979 = vset.pattern.permute.xlu0 %v6142_v16  ;;  %v6262_v39 = vld [vmem:[#allocation2 + $0x60] ss:$0 sm:$0xff]  ;;  %v6264_v41 = vld [vmem:[#allocation2 + $0x68] ss:$0 sm:$0xff]  ;;  %s4853_s25 = sshll.u32 %s190_s24, 3 }
  0x2a   : > { %v203_v2 = vld [vmem:[%s196_s9] sm:$0xff]  ;;  %5389 = vmatprep.subr.mxu1 %v8870_v0  ;;  %5980 = vset.pattern.permute.xlu1 %v6142_v16  ;;  %s9207_s10 = smov (!%p198_p6, %s4855_s10), 31  ;;  %s5095_s27 = sshll.u32 %s6191_s16, 7 }
  0x2b   : > { %5383 = vmatmul.mubr.msk.f32.vlgmr.msra.gmra.mxu0 %vm210_vm2, %v203_v2  ;;  %5390 = vmatpush3.msra.mxu1 %v290_v5  ;;  %s4856_s11 = sshll.u32 %s9207_s10, 3  ;;  %s192_s28 = scalar_lea.vmem [#allocation5], %s4853_s25 }
  0x2c   : > { %5404 = vmatprep.mubr.msk.f32.mxu0 %vm8940_vm0, %v8870_v0  ;;  %5391 = vmatprep.subr.mxu1 %v8870_v0  ;;  %s201_s20 = scalar_lea.vmem %s8867_s1, %s4856_s11  ;;  %s4764_s29 = sshll.u32 %s192_s28, 4  ;;  %s4765_s29 = int_to_ptr.vmem [resolvable:$true] %s4764_s29 }
  0x2d   : > { %5392 = vmatpush3.msra.mxu1 %v289_v6  ;;  %5397 = vmatpush3.msra.mxu0 %v376_v7  ;;  %v456_v17 = vld [vmem:[%s201_s20] sm:$0xff]  ;;  %v458_v18 = vld [vmem:[%s201_s20 + $0x10] sm:$0xff]  ;;  %v457_v19 = vld [vmem:[%s201_s20 + $0x8] sm:$0xff]  ;;  %v8876_v6 = vmov 683565275   ;;  %s8830_s5 = scalar_lea.hbm %s8869_s3, %s5095_s27  ;;  %s4751_s6 = scalar_lea.sflag [#allocation4], %s190_s24 }
  0x2e   : > { %5398 = vmatprep.subr.mxu0 %v8870_v0  ;;  %475 = vperm.xlu0 %5979, %v456_v17   ;;  %v459_v20 = vld [vmem:[%s201_s20 + $0x18] sm:$0xff]  ;;  %v460_v21 = vld [vmem:[%s201_s20 + $0x20] sm:$0xff]  ;;  %v461_v22 = vld [vmem:[%s201_s20 + $0x28] sm:$0xff]  ;;  %s6071_s7 = scalar_lea.vmem %s4765_s29, 128  ;;  %s6149_s16 = smov [#allocation5]  }
  0x2f   : > { %5399 = vmatpush3.msra.mxu0 %v375_v13  ;;  %485 = vperm.xlu1 %5980, %v458_v18   ;;  %v462_v23 = vld [vmem:[%s201_s20 + $0x30] sm:$0xff]  ;;  %v463_v24 = vld [vmem:[%s201_s20 + $0x38] sm:$0xff]  ;;  %v464_v25 = vld [vmem:[%s201_s20 + $0x40] sm:$0xff]  ;;  %p6072_p9 = scmp.ne.s32.totalorder %s4765_s29, %s6071_s7  ;;  %s6075_s8 = sshll.u32 %s6149_s16, 4  ;;  %s6076_s8 = int_to_ptr.vmem [resolvable:$false] %s6075_s8 }
  0x30   : > { %5400 = vmatprep.subr.mxu0 %v8870_v0  ;;  %v465_v26 = vld [vmem:[%s201_s20 + $0x48] sm:$0xff]  ;;  %v466_v27 = vld [vmem:[%s201_s20 + $0x50] sm:$0xff]  ;;  %v467_v28 = vld [vmem:[%s201_s20 + $0x58] sm:$0xff]  ;;  %s6077_s9 = scalar_lea.vmem %s6076_s8, 256  ;;  %p6078_p12 = scmp.lt.s32.totalorder %s4765_s29, %s6076_s8 }
  0x31   : > { %5401 = vmatpush3.msra.mxu0 %v374_v14  ;;  %v468_v29 = vld [vmem:[%s201_s20 + $0x60] sm:$0xff]  ;;  %v469_v30 = vld [vmem:[%s201_s20 + $0x68] sm:$0xff]  ;;  %v470_v31 = vld [vmem:[%s201_s20 + $0x70] sm:$0xff]  ;;  %p6073_p10 = pnand %p6072_p9, %p6208_p5  ;;  %p6079_p13 = scmp.lt.s32.totalorder %s6077_s9, %s6071_s7 }
  0x32   : > { %5402 = vmatprep.subr.mxu0 %v8870_v0  ;;  %480 = vperm.xlu0 %5979, %v457_v19   ;;  %v471_v32 = vld [vmem:[%s201_s20 + $0x78] sm:$0xff] }
  0x33   : > { %5403 = vmatpush3.msra.mxu0 %v373_v15  ;;  %490 = vperm.xlu1 %5980, %v459_v20   ;;  %v8893_v20 = vmov 2102212464   ;;  %p6074_p11 = pneg %p6073_p10  ;;  %p6080_p0 = por %p6079_p13, %p6078_p12 }
  0x35   : > { %p6081_p1 = pnand %p6080_p0, %p6074_p11 }
  0x36   : > { %495 = vperm.xlu0 %5979, %v460_v21  }
  0x37   : > { %500 = vperm.xlu1 %5980, %v461_v22  }
  0x3a   : > { %505 = vperm.xlu0 %5979, %v462_v23  }
  0x3b   : > { %510 = vperm.xlu1 %5980, %v463_v24  }
  0x3e   : > { %515 = vperm.xlu0 %5979, %v464_v25   ;;  %v8881_v25 = vmov 920167782  }
  0x3f   : > { %520 = vperm.xlu1 %5980, %v465_v26  }
  0x42   : > { %525 = vperm.xlu0 %5979, %v466_v27  }
  0x43   : > { %530 = vperm.xlu1 %5980, %v467_v28  }
  0x46   : > { %535 = vperm.xlu0 %5979, %v468_v29  }
  0x47   : > { %540 = vperm.xlu1 %5980, %v469_v30   ;;  %v8879_v30 = vmov 1326507024  }
  0x4a   : > { %545 = vperm.xlu0 %5979, %v470_v31  }
  0x4b   : > { %550 = vperm.xlu1 %5980, %v471_v32  }
  0xa9   : > { %v476_v38 = vpop.permute.xlu0 %475 }
  0xaa   : > { %v486_v42 = vpop.permute.xlu1 %485  ;;  %v557_v46 = vmul.f32 %v6262_v39, %v476_v38 }
  0xab   : > { %v559_v47 = vmul.f32 %v6262_v39, %v486_v42 }
  0xac   : > { %v6275_v51 = vadd.f32 %v6264_v41, %v557_v46 }
  0xad   : > { %v481_v40 = vpop.permute.xlu0 %480  ;;  %v6278_v52 = vadd.f32 %v6264_v41, %v559_v47 }
  0xae   : > { %v558_v43 = vmul.f32 %v6262_v39, %v481_v40  ;;  %v491_v50 = vpop.permute.xlu1 %490  ;;  %v597_v56 = vand.u32 2139095040, %v6275_v51 }
  0xaf   : > { %v560_v54 = vmul.f32 %v6262_v39, %v491_v50  ;;  %v805_v57 = vand.u32 2139095040, %v6278_v52 }
  0xb0   : > { %v6269_v45 = vadd.f32 %v6264_v41, %v558_v43  ;;  %v598_v62 = vshrl.u32 %v597_v56, 23 }
  0xb1   : > { %v6285_v60 = vadd.f32 %v6264_v41, %v560_v54  ;;  %v496_v61 = vpop.permute.xlu0 %495  ;;  %v806_v63 = vshrl.u32 %v805_v57, 23 }
  0xb2   : > { %v701_v48 = vand.u32 2139095040, %v6269_v45  ;;  %v8878_v58 = vand.u32 2147483647, %v6269_v45  ;;  %v561_v3 = vmul.f32 %v6262_v39, %v496_v61  ;;  %v501_v54 = vpop.permute.xlu1 %500 }
  0xb3   : > { %v909_v4 = vand.u32 2139095040, %v6285_v60  ;;  %v4874_v14 = vadd.s32 4294967169, %v806_v63 }
  0xb4   : > { %v702_v49 = vshrl.u32 %v701_v48, 23  ;;  %v705_v1 = vand.u32 8388607, %v8878_v58  ;;  %v6296_v17 = vadd.f32 %v6264_v41, %v561_v3 }
  0xb5   : > { %v910_v22 = vshrl.u32 %v909_v4, 23  ;;  %v506_v61 = vpop.permute.xlu0 %505 }
  0xb6   : > { %v4870_v53 = vadd.s32 4294967169, %v702_v49  ;;  %v706_v15 = vor.u32 8388608, %v705_v1  ;;  %v563_v4 = vmul.f32 %v6262_v39, %v506_v61 }
  0xb7   : > { %v4878_v50 = vadd.s32 4294967169, %v910_v22 }
  0xb8   : > { %v708_v55 = vadd.s32 1, %v4870_v53  ;;  %v1013_v53 = vand.u32 2139095040, %v6296_v17 }
  0xba   : > { %vm709_vm5 = vcmp.gt.s32.totalorder %v708_v55, 0 }
  0xbb   : > { %v710_v59 = vsel %vm709_vm5, %v708_v55, 0 }
  0xbc   : > { %v712_v2 = vand.u32 31, %v710_v59 }
  0xbe   : > { %v713_v5 = vsub.s32 32, %v712_v2  ;;  %v715_v7 = vshll.u32 %v8876_v6, %v712_v2  ;;  %v724_v24 = vshll.u32 %v8893_v20, %v712_v2  ;;  %v727_v27 = vshll.u32 %v8881_v25, %v712_v2 }
  0xc0   : > { %v714_v18 = vshrl.u32 %v8876_v6, %v713_v5  ;;  %v722_v21 = vshrl.u32 %v8893_v20, %v713_v5  ;;  %v725_v26 = vshrl.u32 %v8881_v25, %v713_v5  ;;  %v728_v31 = vshrl.u32 %v8879_v30, %v713_v5 }
  0xc2   : > { %v726_v32 = vor.u32 %v725_v26, %v724_v24  ;;  %v511_v24 = vpop.permute.xlu1 %510 }
  0xeb   : > { %v284_v9 = vpop.f32.mrf.mxu0 }
  0xec   : > { %v285_v10 = vadd.f32 %v4857_v8, %v284_v9  ;;  %v4866_v8 = vadd.s32 4294967169, %v598_v62  ;;  %v711_v9 = vshrl.u32 %v710_v59, 5  ;;  %v2470_v62 = vld [vmem:[#allocation2 + $0x80] sm:$0xff] }
  0xed   : > { %v5384_v11 = vpop.f32.mrf.mxu0  ;;  %5433 = vmatprep.subr.mxu0 %v2470_v62 }
  0xee   : > { %v288_v12 = vmax.f32 %v285_v10, 0.0  ;;  %v8874_v10 = vmov 2475754826   ;;  %vm730_vm6 = vcmp.lt.s32.totalorder %v711_v9, 1  ;;  %vm732_vm7 = vcmp.lt.s32.totalorder %v711_v9, 3 }
  0xef   : > { %v718_v11 = vshll.u32 %v8874_v10, %v712_v2  ;;  %v716_v16 = vshrl.u32 %v8874_v10, %v713_v5  ;;  %vm733_vm8 = vcmp.lt.s32.totalorder %v711_v9, 4  ;;  %vm731_vm9 = vcmp.lt.s32.totalorder %v711_v9, 2 }
  0xf0   : > { %5394 = vmatmul.mubr.msk.f32.vlgmr.msra.gmra.mxu1 %vm8949_vm3, %v288_v12  ;;  %v8872_v12 = vmov 2131351028   ;;  %v739_v40 = vsel %vm733_vm8, %v726_v32, 920167782  ;;  %v604_v43 = vadd.s32 1, %v4866_v8  ;;  %v1014_v8 = vshrl.u32 %v1013_v53, 23 }
  0xf1   : > { %5409 = vmatprep.mubr.msk.f32.mxu1 %vm2274_vm4, %v2258_v44  ;;  %v721_v13 = vshll.u32 %v8872_v12, %v712_v2  ;;  %v719_v19 = vshrl.u32 %v8872_v12, %v713_v5  ;;  %v717_v23 = vor.u32 %v716_v16, %v715_v7  ;;  %v812_v44 = vadd.s32 1, %v4874_v14 }
  0xf2   : > { %vm605_vm10 = vcmp.gt.s32.totalorder %v604_v43, 0  ;;  %v562_v2 = vmul.f32 %v6262_v39, %v501_v54  ;;  %v916_v7 = vadd.s32 1, %v4878_v50  ;;  %v6329_v16 = vadd.f32 %v6264_v41, %v563_v4  ;;  %v521_v50 = vpop.permute.xlu1 %520 }
  0xf3   : > { %v720_v28 = vor.u32 %v719_v19, %v718_v11  ;;  %v723_v29 = vor.u32 %v722_v21, %v721_v13  ;;  %vm813_vm11 = vcmp.gt.s32.totalorder %v812_v44, 0  ;;  %v606_v9 = vsel %vm605_vm10, %v604_v43, 0 }
  0xf4   : > { %v814_v11 = vsel %vm813_vm11, %v812_v44, 0  ;;  %v6326_v14 = vadd.f32 %v6264_v41, %v562_v2  ;;  %8975 = vst [vmem:[#allocation9_spill] sm:$0xff] %v6329_v16  ;;  %vm917_vm13 = vcmp.gt.s32.totalorder %v916_v7, 0  ;;  %v4882_v19 = vadd.s32 4294967169, %v1014_v8 }
  0xf5   : > { %v742_v42 = vsel %vm730_vm6, %v720_v28, %v723_v29  ;;  %v740_v46 = vsel %vm732_vm7, %v723_v29, %v739_v40  ;;  %v6333_v21 = vand.u32 31, %v814_v11  ;;  %v6336_v26 = vshrl.u32 %v606_v9, 5 }
  0xf6   : > { %8974 = vst [vmem:[#allocation8_spill] sm:$0xff] %v6326_v14 }
  0xf7   : > { %vm629_vm14 = vcmp.lt.s32.totalorder %v6336_v26, 4  ;;  %v828_v53 = vshll.u32 %v8893_v20, %v6333_v21 }
 0x1b0   : > { %v368_v34 = vpop.f32.mrf.mxu1 }
 0x1b1   : > { %v369_v35 = vadd.f32 %v4860_v33, %v368_v34  ;;  %v746_v33 = vshll.u32 %v706_v15, 8  ;;  %v729_v34 = vor.u32 %v728_v31, %v727_v27 }
 0x1b2   : > { %v5395_v36 = vpop.f32.mrf.mxu1 }
 0x1b3   : > { %v372_v37 = vmax.f32 %v369_v35, 0.0  ;;  %v735_v35 = vsel %vm733_vm8, %v723_v29, 2102212464  ;;  %v738_v36 = vsel %vm730_vm6, %v717_v23, %v720_v28  ;;  %v743_v47 = vsel %vm733_vm8, %v729_v34, 1326507024 }
 0x1b4   : > { %v736_v38 = vsel %vm732_vm7, %v720_v28, %v735_v35  ;;  %v741_v48 = vsel %vm731_vm9, %v738_v36, %v740_v46  ;;  %v744_v49 = vsel %vm732_vm7, %v726_v32, %v743_v47  ;;  %v918_v28 = vsel %vm917_vm13, %v916_v7, 0  ;;  %v516_v36 = vpop.permute.xlu0 %515 }
 0x1b5   : > { %5405 = vmatmul.mubr.msk.f32.vlgmr.msra.gmra.mxu0 %vm8949_vm3, %v372_v37  ;;  %v734_v37 = vsel %vm730_vm6, %v714_v18, %v717_v23  ;;  %v745_v56 = vsel %vm731_vm9, %v742_v42, %v744_v49  ;;  %v6312_v57 = vmul.u32.u64.low %v746_v33, %v741_v48  ;;  %v6313_v59 = vmul.u32.u64.high %v746_v33, %v741_v48, %v6312_v57 }
 0x1b6   : > { %v737_v55 = vsel %vm731_vm9, %v734_v37, %v736_v38  ;;  %v6316_v63 = vmul.u32.u64.low %v746_v33, %v745_v56  ;;  %v6317_v1 = vmul.u32.u64.high %v746_v33, %v745_v56, %v6316_v63  ;;  %5434 = vmatpush3.msra.mxu0 %v2470_v62  ;;  %v6331_v18 = vand.u32 31, %v606_v9 }
 0x1b7   : > { %v753_v3 = vmul.u32 %v746_v33, %v737_v55  ;;  %v756_v5 = vadd.s32 1, %v6313_v59  ;;  %v1117_v23 = vand.u32 2139095040, %v6326_v14  ;;  %v1221_v29 = vand.u32 2139095040, %v6329_v16 }
 0x1b8   : > { %vm755_vm12 = vc.u32 %v6317_v1, %v6312_v57  ;;  %v6342_v31 = vsub.s32 32, %v6331_v18  ;;  %v1020_v32 = vadd.s32 1, %v4882_v19  ;;  %v6345_v33 = vsub.s32 32, %v6333_v21 }
 0x1b9   : > { %v757_v13 = vsel %vm755_vm12, %v756_v5, %v6313_v59  ;;  %v564_v35 = vmul.f32 %v6262_v39, %v511_v24  ;;  %v620_v37 = vshll.u32 %v8893_v20, %v6331_v18  ;;  %v6351_v38 = vshrl.u32 %v814_v11, 5 }
 0x1ba   : > { %v758_v15 = vadd.s32 %v757_v13, %v753_v3  ;;  %v6353_v40 = vand.u32 31, %v918_v28  ;;  %v1118_v42 = vshrl.u32 %v1117_v23, 23  ;;  %v623_v43 = vshll.u32 %v8881_v25, %v6331_v18 }
 0x1bb   : > { %v1222_v46 = vshrl.u32 %v1221_v29, 23  ;;  %v621_v47 = vshrl.u32 %v8881_v25, %v6342_v31  ;;  %v624_v48 = vshrl.u32 %v8879_v30, %v6342_v31  ;;  %vm1021_vm15 = vcmp.gt.s32.totalorder %v1020_v32, 0 }
 0x1bc   : > { %v759_v22 = vadd.s32 536870912, %v758_v15  ;;  %v565_v49 = vmul.f32 %v6262_v39, %v516_v36  ;;  %v829_v54 = vshrl.u32 %v8881_v25, %v6345_v33  ;;  %v6371_v56 = vadd.f32 %v6264_v41, %v564_v35 }
 0x1bd   : > { %v831_v59 = vshll.u32 %v8881_v25, %v6333_v21  ;;  %v832_v61 = vshrl.u32 %v8879_v30, %v6345_v33  ;;  %v6378_v62 = vsub.s32 32, %v6353_v40  ;;  %v4886_v63 = vadd.s32 4294967169, %v1118_v42 }
 0x1be   : > { %v6338_v27 = vshrl.u32 %v759_v22, 30  ;;  %8976 = vst [vmem:[#allocation10_spill] sm:$0xff] %v6371_v56  ;;  %v1022_v3 = vsel %vm1021_vm15, %v1020_v32, 0  ;;  %v4890_v4 = vadd.s32 4294967169, %v1222_v46  ;;  %v566_v5 = vmul.f32 %v6262_v39, %v521_v50 }
 0x1bf   : > { %v6382_v7 = vor.u32 %v621_v47, %v620_v37  ;;  %v625_v8 = vor.u32 %v624_v48, %v623_v43  ;;  %v6384_v9 = vshrl.u32 %v918_v28, 5  ;;  %v6387_v11 = vadd.f32 %v6264_v41, %v565_v49  ;;  %v526_v43 = vpop.permute.xlu0 %525 }
 0x1c0   : > { %v761_v34 = vshll.u32 %v6338_v27, 30  ;;  %v6389_v13 = vor.u32 %v829_v54, %v828_v53  ;;  %vm837_vm1 = vcmp.lt.s32.totalorder %v6351_v38, 4  ;;  %v1325_v19 = vand.u32 2139095040, %v6371_v56 }
 0x1c1   : > { %8977 = vst [vmem:[#allocation11_spill] sm:$0xff] %v6387_v11  ;;  %v932_v22 = vshll.u32 %v8893_v20, %v6353_v40  ;;  %v933_v23 = vshrl.u32 %v8881_v25, %v6378_v62  ;;  %v6397_v24 = vand.u32 31, %v1022_v3  ;;  %v1124_v28 = vadd.s32 1, %v4886_v63 }
 0x1c2   : > { %v6358_v44 = vsub.s32 %v758_v15, %v761_v34  ;;  %v833_v29 = vor.u32 %v832_v61, %v831_v59  ;;  %v1228_v34 = vadd.s32 1, %v4890_v4  ;;  %v6400_v35 = vadd.f32 %v6264_v41, %v566_v5 }
 0x1c3   : > { %v6405_v36 = vsel %vm629_vm14, %v6382_v7, 920167782  ;;  %v6409_v37 = vsel %vm629_vm14, %v625_v8, 1326507024  ;;  %vm941_vm2 = vcmp.lt.s32.totalorder %v6384_v9, 4  ;;  %v1429_v42 = vand.u32 2139095040, %v6387_v11  ;;  %v536_v10 = vpop.permute.xlu0 %535 }
 0x1c4   : > { %v764_v55 = vsub.s32 0, %v6358_v44  ;;  %8978 = vst [vmem:[#allocation12_spill] sm:$0xff] %v6400_v35  ;;  %v935_v46 = vshll.u32 %v8881_v25, %v6353_v40  ;;  %v936_v47 = vshrl.u32 %v8879_v30, %v6378_v62  ;;  %v1326_v48 = vshrl.u32 %v1325_v19, 23  ;;  %v531_v19 = vpop.permute.xlu1 %530 }
 0x1c5   : > { %v6417_v50 = vor.u32 %v933_v23, %v932_v22  ;;  %v6420_v53 = vsub.s32 32, %v6397_v24  ;;  %vm1125_vm6 = vcmp.gt.s32.totalorder %v1124_v28, 0  ;;  %vm1229_vm7 = vcmp.gt.s32.totalorder %v1228_v34, 0 }
 0x1c6   : > { %v4871_v2 = vmin.u32 %v764_v55, %v6358_v44  ;;  %v1533_v55 = vand.u32 2139095040, %v6400_v35  ;;  %v567_v59 = vmul.f32 %v6262_v39, %v526_v43  ;;  %v6427_v61 = vsel %vm837_vm1, %v6389_v13, 920167782 }
 0x1c7   : > { %v6431_v63 = vsel %vm837_vm1, %v833_v29, 1326507024  ;;  %v754_v4 = vadd.s32 %v6312_v57, %v6317_v1  ;;  %v1126_v8 = vsel %vm1125_vm6, %v1124_v28, 0  ;;  %v937_v23 = vor.u32 %v936_v47, %v935_v46 }
 0x1c8   : > { %v766_v15 = vclz %v4871_v2  ;;  %v1430_v2 = vshrl.u32 %v1429_v42, 23  ;;  %v1230_v43 = vsel %vm1229_vm7, %v1228_v34, 0  ;;  %v1036_v29 = vshll.u32 %v8893_v20, %v6397_v24  ;;  %v541_v11 = vpop.permute.xlu1 %540 }
 0x1c9   : > { %v1037_v42 = vshrl.u32 %v8881_v25, %v6420_v53  ;;  %v1534_v0 = vshrl.u32 %v1533_v55, 23  ;;  %v6445_v57 = vadd.f32 %v6264_v41, %v567_v59  ;;  %v6447_v1 = vshrl.u32 %v1022_v3, 5 }
 0x1ca   : > { %v4872_v32 = vadd.s32 4294967294, %v766_v15  ;;  %v4894_v15 = vadd.s32 4294967169, %v1326_v48  ;;  %v6449_v28 = vand.u32 31, %v1126_v8  ;;  %v4898_v46 = vadd.s32 4294967169, %v1430_v2 }
 0x1cb   : > { %8979 = vst [vmem:[#allocation13_spill] sm:$0xff] %v6445_v57  ;;  %v568_v47 = vmul.f32 %v6262_v39, %v531_v19  ;;  %v6457_v55 = vsel %vm941_vm2, %v937_v23, 1326507024  ;;  %v1039_v3 = vshll.u32 %v8881_v25, %v6397_v24  ;;  %v1040_v59 = vshrl.u32 %v8879_v30, %v6420_v53 }
 0x1cc   : > { %vm4873_vm5 = vcmp.lt.s32.totalorder %v4872_v32, 0  ;;  %8980 = vst [vmem:[#allocation14_spill] sm:$0xff] %v6449_v28  ;;  %v1332_v12 = vadd.s32 1, %v4894_v15  ;;  %v6463_v2 = vor.u32 %v1037_v42, %v1036_v29  ;;  %v6465_v19 = vshrl.u32 %v1126_v8, 5 }
 0x1cd   : > { %v769_v49 = vsel %vm4873_vm5, 0, %v4872_v32  ;;  %v6438_v32 = vsel %vm941_vm2, %v6417_v50, 920167782  ;;  %vm1045_vm8 = vcmp.lt.s32.totalorder %v6447_v1, 4  ;;  %v6473_v15 = vadd.f32 %v6264_v41, %v568_v47 }
 0x1ce   : > { %v774_v54 = vsub.s32 4294967266, %v769_v49  ;;  %v770_v5 = vsub.s32 32, %v769_v49  ;;  %v771_v48 = vshll.u32 %v6358_v44, %v769_v49  ;;  %8982 = vst [vmem:[#allocation16_spill] sm:$0xff] %v6463_v2  ;;  %8983 = vst [vmem:[#allocation17_spill] sm:$0xff] %v6465_v19  ;;  %v4902_v44 = vadd.s32 4294967169, %v1534_v0 }
 0x1cf   : > { %v1637_v49 = vand.u32 2139095040, %v6445_v57  ;;  %8985 = vst [vmem:[#allocation19_spill] sm:$0xff] %v6473_v15  ;;  %vm1333_vm9 = vcmp.gt.s32.totalorder %v1332_v12, 0  ;;  %v1041_v42 = vor.u32 %v1040_v59, %v1039_v3  ;;  %v1741_v30 = vand.u32 2139095040, %v6473_v15 }
 0x1d0   : > { %v775_v22 = vadd.s32 127, %v774_v54  ;;  %v772_v34 = vshrl.u32 %v754_v4, %v770_v5  ;;  %v6453_v54 = vand.u32 31, %v1230_v43  ;;  %v6470_v4 = vsub.s32 32, %v6449_v28 }
 0x1d1   : > { %v1436_v5 = vadd.s32 1, %v4898_v46  ;;  %v1638_v8 = vshrl.u32 %v1637_v49, 23  ;;  %v1540_v58 = vadd.s32 1, %v4902_v44  ;;  %v1140_v25 = vshll.u32 %v8893_v20, %v6449_v28 }
 0x1d2   : > { %8981 = vst [vmem:[#allocation15_spill] sm:$0xff] %v6453_v54  ;;  %v776_v6 = vshll.u32 %v775_v22, 23  ;;  %8984 = vst [vmem:[#allocation18_spill] sm:$0xff] %v6470_v4  ;;  %v569_v22 = vmul.f32 %v6262_v39, %v536_v10  ;;  %v773_v23 = vor.u32 %v772_v34, %v771_v48  ;;  %v6477_v29 = vsub.s32 32, %v6453_v54 }
 0x1d3   : > { %v8987_v46 = vmov 920167782   ;;  %v4906_v57 = vadd.s32 4294967169, %v1638_v8  ;;  %v8989_v34 = vmov 1326507024   ;;  %v1334_v3 = vsel %vm1333_vm9, %v1332_v12, 0 }
 0x1d4   : > { %8986 = vst [vmem:[#allocation20_spill] sm:$0xff] %v6477_v29  ;;  %v777_v0 = vor.u32 4788187, %v776_v6  ;;  %v1143_v47 = vshll.u32 %v8987_v46, %v6449_v28  ;;  %v6485_v10 = vadd.f32 %v6264_v41, %v569_v22  ;;  %v1141_v48 = vshrl.u32 %v8987_v46, %v6470_v4 }
 0x1d5   : > { %v1144_v6 = vshrl.u32 %v8989_v34, %v6470_v4  ;;  %vm1437_vm10 = vcmp.gt.s32.totalorder %v1436_v5, 0  ;;  %v780_v59 = vcvt.s32.f32 %v773_v23  ;;  %v1244_v44 = vshll.u32 %v8893_v20, %v6453_v54 }
 0x1d6   : > { %8988 = vst [vmem:[#allocation21_spill] sm:$0xff] %v6485_v10  ;;  %v1245_v49 = vshrl.u32 %v8987_v46, %v6477_v29  ;;  %v1742_v15 = vshrl.u32 %v1741_v30, 23  ;;  %v778_v8 = vand.u32 2147483647, %v777_v0  ;;  %vm1541_vm11 = vcmp.gt.s32.totalorder %v1540_v58, 0 }
 0x1d7   : > { %v1644_v22 = vadd.s32 1, %v4906_v57  ;;  %v1845_v35 = vand.u32 2139095040, %v6485_v10  ;;  %vm700_vm12 = vcmp.lt.s32.totalorder %v6269_v45, 0  ;;  %vm1149_vm13 = vcmp.lt.s32.totalorder %v6465_v19, 4 }
 0x1d8   : > { %v6498_v12 = vshrl.u32 %v1230_v43, 5  ;;  %v6500_v23 = vand.u32 31, %v1334_v3  ;;  %v1438_v56 = vsel %vm1437_vm10, %v1436_v5, 0  ;;  %v6502_v20 = vor.u32 %v1141_v48, %v1140_v25 }
 0x1d9   : > { %v1145_v16 = vor.u32 %v1144_v6, %v1143_v47  ;;  %v1247_v30 = vshll.u32 %v8987_v46, %v6453_v54  ;;  %v1248_v57 = vshrl.u32 %v8989_v34, %v6477_v29  ;;  %v6508_v0 = vor.u32 %v1245_v49, %v1244_v44 }
 0x1da   : > { %8990 = vst [vmem:[#allocation22_spill] sm:$0xff] %v6498_v12  ;;  %8991 = vst [vmem:[#allocation23_spill] sm:$0xff] %v6500_v23  ;;  %v1542_v10 = vsel %vm1541_vm11, %v1540_v58, 0  ;;  %v4910_v4 = vadd.s32 4294967169, %v1742_v15  ;;  %v570_v28 = vmul.f32 %v6262_v39, %v541_v11  ;;  %v8994_v43 = vand.u32 2147483647, %v6269_v45 }
 0x1db   : > { %8992 = vst [vmem:[#allocation24_spill] sm:$0xff] %v6502_v20  ;;  %8993 = vst [vmem:[#allocation25_spill] sm:$0xff] %v6508_v0  ;;  %v781_v25 = vmul.f32 %v780_v59, %v778_v8  ;;  %v6517_v5 = vand.u32 31, %v1438_v56  ;;  %vm1645_vm5 = vcmp.gt.s32.totalorder %v1644_v22, 0  ;;  %v1846_v47 = vshrl.u32 %v1845_v35, 23 }
 0x1dc   : > { %vm6513_vm15 = vcmp.le.f32.partialorder %v8994_v43, 0.7853982  ;;  %v6522_v48 = vsel %vm1045_vm8, %v6463_v2, 920167782  ;;  %v6526_v58 = vsel %vm1045_vm8, %v1041_v42, 1326507024  ;;  %v1249_v6 = vor.u32 %v1248_v57, %v1247_v30  ;;  %v546_v2 = vpop.permute.xlu0 %545 }
 0x1dd   : > { %8997 = vst [vmem:[#allocation26_spill] sm:$0xff] %v6517_v5  ;;  %8998 = vst [vmem:[#allocation27_spill] sm:$0xff] %v6522_v48  ;;  %vm1253_vm6 = vcmp.lt.s32.totalorder %v6498_v12, 4  ;;  %v6530_v11 = vsub.s32 32, %v6500_v23  ;;  %v6535_v15 = vsel %vm1149_vm13, %v6502_v20, 920167782  ;;  %v6546_v8 = vadd.f32 %v6264_v41, %v570_v28 }
 0x1de   : > { %8999 = vst [vmem:[#allocation28_spill] sm:$0xff] %v6526_v58  ;;  %9001 = vst [vmem:[#allocation30_spill] sm:$0xff] %v6535_v15  ;;  %v6539_v35 = vsel %vm1149_vm13, %v1145_v16, 1326507024  ;;  %v6541_v59 = vand.u32 31, %v1542_v10  ;;  %v6543_v44 = vshrl.u32 %v1334_v3, 5  ;;  %v1351_v28 = vshll.u32 %v8987_v46, %v6500_v23 }
 0x1df   : > { %9000 = vst [vmem:[#allocation29_spill] sm:$0xff] %v6530_v11  ;;  %9002 = vst [vmem:[#allocation31_spill] sm:$0xff] %v6539_v35  ;;  %v1646_v42 = vsel %vm1645_vm5, %v1644_v22, 0  ;;  %v1748_v49 = vadd.s32 1, %v4910_v4  ;;  %v782_v43 = vxor.u32 2147483648, %v781_v25  ;;  %v6554_v54 = vsub.s32 32, %v6517_v5 }
 0x1e0   : > { %9003 = vst [vmem:[#allocation32_spill] sm:$0xff] %v6541_v59  ;;  %9004 = vst [vmem:[#allocation33_spill] sm:$0xff] %v6543_v44  ;;  %v6551_v29 = vsel %vm1253_vm6, %v6508_v0, 920167782  ;;  %v4914_v16 = vadd.s32 4294967169, %v1846_v47  ;;  %v1349_v3 = vshrl.u32 %v8987_v46, %v6530_v11  ;;  %v1352_v4 = vshrl.u32 %v8989_v34, %v6530_v11 }
 0x1e1   : > { %9005 = vst [vmem:[#allocation34_spill] sm:$0xff] %v6546_v8  ;;  %9006 = vst [vmem:[#allocation35_spill] sm:$0xff] %v6551_v29  ;;  %v9008_v30 = vmov 2102212464   ;;  %v6566_v22 = vsel %vm1253_vm6, %v1249_v6, 1326507024  ;;  %v783_v6 = vsel %vm700_vm12, %v782_v43, %v781_v25 }
 0x1e2   : > { %9007 = vst [vmem:[#allocation36_spill] sm:$0xff] %v6554_v54  ;;  %v1348_v57 = vshll.u32 %v9008_v30, %v6500_v23  ;;  %9009 = vst [vmem:[#allocation37_spill] sm:$0xff] %v6566_v22  ;;  %v6568_v0 = vshrl.u32 %v1438_v56, 5  ;;  %v6571_v47 = vsub.s32 32, %v6541_v59  ;;  %v6573_v29 = vand.u32 31, %v1646_v42 }
 0x1e3   : > { %v1452_v20 = vshll.u32 %v9008_v30, %v6517_v5  ;;  %v1455_v23 = vshll.u32 %v8987_v46, %v6517_v5  ;;  %vm1749_vm7 = vcmp.gt.s32.totalorder %v1748_v49, 0  ;;  %v1949_v11 = vand.u32 2139095040, %v6546_v8 }
 0x1e4   : > { %9010 = vst [vmem:[#allocation38_spill] sm:$0xff] %v6568_v0  ;;  %9011 = vst [vmem:[#allocation39_spill] sm:$0xff] %v6571_v47  ;;  %v1453_v56 = vshrl.u32 %v8987_v46, %v6554_v54  ;;  %v1456_v22 = vshrl.u32 %v8989_v34, %v6554_v54  ;;  %v1852_v12 = vadd.s32 1, %v4914_v16  ;;  %v6586_v35 = vor.u32 %v1349_v3, %v1348_v57 }
 0x1e5   : > { %9012 = vst [vmem:[#allocation40_spill] sm:$0xff] %v6573_v29  ;;  %v1353_v15 = vor.u32 %v1352_v4, %v1351_v28  ;;  %vm1357_vm9 = vcmp.lt.s32.totalorder %v6543_v44, 4  ;;  %v6589_v19 = vshrl.u32 %v1542_v10, 5  ;;  %v1556_v8 = vshll.u32 %v9008_v30, %v6541_v59 }
 0x1e6   : > { %9013 = vst [vmem:[#allocation41_spill] sm:$0xff] %v6586_v35  ;;  %v1557_v25 = vshrl.u32 %v8987_v46, %v6571_v47  ;;  %v6596_v43 = vsub.s32 32, %v6573_v29  ;;  %v1750_v5 = vsel %vm1749_vm7, %v1748_v49, 0  ;;  %v786_v16 = vsel %vm6513_vm15, %v6269_v45, %v783_v6 }
 0x1e7   : > { %9014 = vst [vmem:[#allocation42_spill] sm:$0xff] %v6589_v19  ;;  %v1559_v57 = vshll.u32 %v8987_v46, %v6541_v59  ;;  %v1560_v10 = vshrl.u32 %v8989_v34, %v6571_v47  ;;  %v1950_v3 = vshrl.u32 %v1949_v11, 23  ;;  %v6605_v28 = vor.u32 %v1453_v56, %v1452_v20 }
 0x1e8   : > { %9015 = vst [vmem:[#allocation43_spill] sm:$0xff] %v6596_v43  ;;  %v1457_v4 = vor.u32 %v1456_v22, %v1455_v23  ;;  %vm8951_vm10 = vcmp.lt.s32.totalorder %v6568_v0, 4  ;;  %vm1853_vm11 = vcmp.gt.s32.totalorder %v1852_v12, 0  ;;  %v6611_v49 = vsel %vm1357_vm9, %v6586_v35, 920167782 }
 0x1e9   : > { %9016 = vst [vmem:[#allocation44_spill] sm:$0xff] %v6605_v28  ;;  %9017 = vst [vmem:[#allocation45_spill] sm:$0xff] %v6611_v49  ;;  %v6613_v54 = vshrl.u32 %v1646_v42, 5  ;;  %v6615_v6 = vand.u32 31, %v1750_v5  ;;  %v571_v59 = vmul.f32 %v6262_v39, %v546_v2  ;;  %5981 = vcosq.f32 %v786_v16 }
 0x1ea   : > { %v6618_v47 = vor.u32 %v1557_v25, %v1556_v8  ;;  %v1660_v20 = vshll.u32 %v9008_v30, %v6573_v29  ;;  %v1661_v23 = vshrl.u32 %v8987_v46, %v6596_v43  ;;  %v1561_v11 = vor.u32 %v1560_v10, %v1559_v57 }
 0x1eb   : > { %9018 = vst [vmem:[#allocation46_spill] sm:$0xff] %v6615_v6  ;;  %vm8950_vm5 = vcmp.lt.s32.totalorder %v6589_v19, 4  ;;  %v1854_v22 = vsel %vm1853_vm11, %v1852_v12, 0  ;;  %v4918_v56 = vadd.s32 4294967169, %v1950_v3  ;;  %5983 = vsinq.f32 %v786_v16 }
 0x1ec   : > { %9019 = vst [vmem:[#allocation47_spill] sm:$0xff] %v6618_v47  ;;  %v6627_v42 = vsel %vm1357_vm9, %v1353_v15, 1326507024  ;;  %v6632_v2 = vsel %vm8951_vm10, %v6605_v28, 920167782  ;;  %v1663_v25 = vshll.u32 %v8987_v46, %v6573_v29  ;;  %v1664_v12 = vshrl.u32 %v8989_v34, %v6596_v43 }
 0x1ed   : > { %9020 = vst [vmem:[#allocation48_spill] sm:$0xff] %v6627_v42  ;;  %9021 = vst [vmem:[#allocation49_spill] sm:$0xff] %v6632_v2  ;;  %v6636_v8 = vsel %vm8951_vm10, %v1457_v4, 1326507024  ;;  %vm1669_vm7 = vcmp.lt.s32.totalorder %v6613_v54, 4  ;;  %v6644_v15 = vsub.s32 32, %v6615_v6  ;;  %v6651_v57 = vor.u32 %v1661_v23, %v1660_v20 }
 0x1ee   : > { %9022 = vst [vmem:[#allocation50_spill] sm:$0xff] %v6636_v8  ;;  %v6649_v16 = vsel %vm8950_vm5, %v6618_v47, 920167782  ;;  %v6653_v10 = vshrl.u32 %v1750_v5, 5  ;;  %v6655_v3 = vand.u32 31, %v1854_v22  ;;  %v1956_v43 = vadd.s32 1, %v4918_v56  ;;  %v551_v8 = vpop.permute.xlu1 %550 }
 0x1ef   : > { %9023 = vst [vmem:[#allocation51_spill] sm:$0xff] %v6644_v15  ;;  %9024 = vst [vmem:[#allocation52_spill] sm:$0xff] %v6649_v16  ;;  %v6659_v4 = vsel %vm8950_vm5, %v1561_v11, 1326507024  ;;  %v6662_v29 = vadd.f32 %v6264_v41, %v571_v59  ;;  %v9029_v47 = vmov 683565275   ;;  %v1764_v59 = vshll.u32 %v9008_v30, %v6615_v6 }
 0x1f0   : > { %9025 = vst [vmem:[#allocation53_spill] sm:$0xff] %v6651_v57  ;;  %9026 = vst [vmem:[#allocation54_spill] sm:$0xff] %v6655_v3  ;;  %v611_v16 = vshll.u32 %v9029_v47, %v6331_v18  ;;  %v9030_v20 = vmov 2475754826   ;;  %v9031_v19 = vmov 2131351028   ;;  %v1765_v56 = vshrl.u32 %v8987_v46, %v6644_v15 }
 0x1f1   : > { %9027 = vst [vmem:[#allocation55_spill] sm:$0xff] %v6659_v4  ;;  %9028 = vst [vmem:[#allocation56_spill] sm:$0xff] %v6662_v29  ;;  %v612_v5 = vshrl.u32 %v9030_v20, %v6342_v31  ;;  %v614_v23 = vshll.u32 %v9030_v20, %v6331_v18  ;;  %v615_v11 = vshrl.u32 %v9031_v19, %v6342_v31  ;;  %v6682_v2 = vsel %vm1669_vm7, %v6651_v57, 920167782 }
 0x1f2   : > { %v1665_v4 = vor.u32 %v1664_v12, %v1663_v25  ;;  %v1767_v28 = vshll.u32 %v8987_v46, %v6615_v6  ;;  %9032 = vst [vmem:[#allocation57_spill] sm:$0xff] %v6682_v2  ;;  %v1768_v0 = vshrl.u32 %v8989_v34, %v6644_v15  ;;  %vm8970_vm11 = vcmp.lt.s32.totalorder %v6653_v10, 4 }
 0x1f3   : > { %v6688_v25 = vsub.s32 32, %v6655_v3  ;;  %v617_v12 = vshll.u32 %v9031_v19, %v6331_v18  ;;  %vm1957_vm0 = vcmp.gt.s32.totalorder %v1956_v43, 0  ;;  %v2053_v35 = vand.u32 2139095040, %v6662_v29 }
 0x1f4   : > { %v572_v6 = vmul.f32 %v6262_v39, %v551_v8  ;;  %v618_v57 = vshrl.u32 %v9008_v30, %v6342_v31  ;;  %v6696_v2 = vshrl.u32 %v1854_v22, 5  ;;  %v9035_v15 = vand.u32 2147483647, %v6275_v51 }
 0x1f5   : > { %9033 = vst [vmem:[#allocation58_spill] sm:$0xff] %v6688_v25  ;;  %v613_v49 = vor.u32 %v612_v5, %v611_v16  ;;  %v616_v44 = vor.u32 %v615_v11, %v614_v23  ;;  %v1868_v58 = vshll.u32 %v9008_v30, %v6655_v3  ;;  %vm626_vm3 = vcmp.lt.s32.totalorder %v6336_v26, 1 }
 0x1f6   : > { %9034 = vst [vmem:[#allocation59_spill] sm:$0xff] %v6696_v2  ;;  %v601_v42 = vand.u32 8388607, %v9035_v15  ;;  %v619_v48 = vor.u32 %v618_v57, %v617_v12  ;;  %vm628_vm5 = vcmp.lt.s32.totalorder %v6336_v26, 3  ;;  %v1869_v39 = vshrl.u32 %v8987_v46, %v6688_v25  ;;  %v6710_v15 = vpop.eup %5981 }
 0x1f7   : > { %v1871_v18 = vshll.u32 %v8987_v46, %v6655_v3  ;;  %v1958_v22 = vsel %vm1957_vm0, %v1956_v43, 0  ;;  %v610_v8 = vshrl.u32 %v9029_v47, %v6342_v31  ;;  %v1872_v16 = vshrl.u32 %v8989_v34, %v6688_v25 }
 0x1f8   : > { %v2054_v57 = vshrl.u32 %v2053_v35, 23  ;;  %v6715_v5 = vadd.f32 %v6264_v41, %v572_v6  ;;  %v631_v23 = vsel %vm629_vm14, %v619_v48, 2102212464  ;;  %v602_v11 = vor.u32 8388608, %v601_v42  ;;  %v6725_v12 = vpop.eup %5983 }
 0x1f9   : > { %vm627_vm10 = vcmp.lt.s32.totalorder %v6336_v26, 2  ;;  %v634_v43 = vsel %vm626_vm3, %v613_v49, %v616_v44  ;;  %v636_v31 = vsel %vm628_vm5, %v619_v48, %v6405_v36  ;;  %v6729_v35 = vsel %vm1669_vm7, %v1665_v4, 1326507024 }
 0x1fa   : > { %9036 = vst [vmem:[#allocation60_spill] sm:$0xff] %v6715_v5  ;;  %v6731_v41 = vor.u32 %v1765_v56, %v1764_v59  ;;  %v1769_v6 = vor.u32 %v1768_v0, %v1767_v28  ;;  %v6733_v29 = vand.u32 31, %v1958_v22  ;;  %v6735_v42 = vor.u32 %v1869_v39, %v1868_v58 }
 0x1fb   : > { %vm8968_vm0 = vcmp.lt.s32.totalorder %v6696_v2, 4  ;;  %v630_v25 = vsel %vm626_vm3, %v610_v8, %v613_v49  ;;  %v632_v36 = vsel %vm628_vm5, %v616_v44, %v631_v23  ;;  %v1873_v3 = vor.u32 %v1872_v16, %v1871_v18 }
 0x1fc   : > { %9037 = vst [vmem:[#allocation61_spill] sm:$0xff] %v6733_v29  ;;  %9038 = vst [vmem:[#allocation62_spill] sm:$0xff] %v6735_v42  ;;  %v637_v4 = vsel %vm627_vm10, %v634_v43, %v636_v31  ;;  %v638_v59 = vsel %vm626_vm3, %v616_v44, %v619_v48  ;;  %v640_v0 = vsel %vm628_vm5, %v6382_v7, %v6409_v37  ;;  %v4922_v58 = vadd.s32 4294967169, %v2054_v57 }
 0x1fd   : > { %v2157_v28 = vand.u32 2139095040, %v6715_v5  ;;  %v641_v49 = vsel %vm627_vm10, %v638_v59, %v640_v0  ;;  %v642_v56 = vshll.u32 %v602_v11, 8  ;;  %v6756_v39 = vsel %vm8970_vm11, %v6731_v41, 920167782 }
 0x1fe   : > { %v6760_v48 = vsel %vm8970_vm11, %v1769_v6, 1326507024  ;;  %v6763_v44 = vsub.s32 32, %v6733_v29  ;;  %v633_v7 = vsel %vm627_vm10, %v630_v25, %v632_v36  ;;  %v6777_v57 = vsel %vm8968_vm0, %v6735_v42, 920167782 }
 0x1ff   : > { %v6767_v37 = vmul.u32.u64.low %v642_v56, %v641_v49  ;;  %v6768_v18 = vmul.u32.u64.high %v642_v56, %v641_v49, %v6767_v37  ;;  %v6770_v8 = vmul.u32.u64.low %v642_v56, %v637_v4  ;;  %v6771_v16 = vmul.u32.u64.high %v642_v56, %v637_v4, %v6770_v8  ;;  %9040 = vst [vmem:[#allocation64_spill] sm:$0xff] %v6777_v57 }
 0x200   : > { %9039 = vst [vmem:[#allocation63_spill] sm:$0xff] %v6763_v44  ;;  %v6781_v23 = vsel %vm8968_vm0, %v1873_v3, 1326507024  ;;  %v6783_v11 = vshrl.u32 %v1958_v22, 5  ;;  %v1972_v26 = vshll.u32 %v9008_v30, %v6733_v29  ;;  %v6789_v25 = vshll.u32 %v8987_v46, %v6733_v29 }
 0x201   : > { %9041 = vst [vmem:[#allocation65_spill] sm:$0xff] %v6781_v23  ;;  %v2060_v43 = vadd.s32 1, %v4922_v58  ;;  %v2158_v31 = vshrl.u32 %v2157_v28, 23  ;;  %v8965_v6 = vand.u32 2147483647, %v6278_v52  ;;  %v649_v36 = vmul.u32 %v642_v56, %v633_v7 }
 0x202   : > { %v784_v4 = vsub.s32 4, %v6338_v27  ;;  %v819_v3 = vshll.u32 %v9029_v47, %v6333_v21  ;;  %v820_v22 = vshrl.u32 %v9030_v20, %v6345_v33  ;;  %v1973_v59 = vshrl.u32 %v8987_v46, %v6763_v44 }
 0x203   : > { %vm651_vm3 = vc.u32 %v6768_v18, %v6770_v8  ;;  %v652_v0 = vadd.s32 1, %v6771_v16  ;;  %v822_v58 = vshll.u32 %v9030_v20, %v6333_v21  ;;  %v6806_v28 = vshrl.u32 %v8989_v34, %v6763_v44 }
 0x204   : > { %v809_v49 = vand.u32 8388607, %v8965_v6  ;;  %v818_v56 = vshrl.u32 %v9029_v47, %v6345_v33  ;;  %v823_v7 = vshrl.u32 %v9031_v19, %v6345_v33  ;;  %vm1981_vm14 = vcmp.lt.s32.totalorder %v6783_v11, 4 }
 0x205   : > { %v653_v37 = vsel %vm651_vm3, %v652_v0, %v6771_v16  ;;  %v821_v5 = vor.u32 %v820_v22, %v819_v3  ;;  %v825_v29 = vshll.u32 %v9031_v19, %v6333_v21  ;;  %v826_v44 = vshrl.u32 %v9008_v30, %v6345_v33 }
 0x206   : > { %vm2061_vm10 = vcmp.gt.s32.totalorder %v2060_v43, 0  ;;  %v654_v42 = vadd.s32 %v653_v37, %v649_v36  ;;  %v785_v6 = vsel %vm700_vm12, %v784_v4, %v6338_v27  ;;  %vm834_vm5 = vcmp.lt.s32.totalorder %v6351_v38, 1 }
 0x207   : > { %v6824_v23 = vor.u32 %v1973_v59, %v1972_v26  ;;  %v4926_v57 = vadd.s32 4294967169, %v2158_v31  ;;  %v810_v2 = vor.u32 8388608, %v809_v49  ;;  %v824_v16 = vor.u32 %v823_v7, %v822_v58  ;;  %v4862_v31 = vld [vmem:[#allocation2 + $0x58] ss:$0 sm:$0xff] }
 0x208   : > { %v655_v21 = vadd.s32 536870912, %v654_v42  ;;  %v827_v22 = vor.u32 %v826_v44, %v825_v29  ;;  %vm835_vm3 = vcmp.lt.s32.totalorder %v6351_v38, 2  ;;  %v787_v33 = vsel %vm6513_vm15, 0, %v785_v6 }
 0x209   : > { %vm836_vm0 = vcmp.lt.s32.totalorder %v6351_v38, 3  ;;  %v838_v27 = vsel %vm834_vm5, %v818_v56, %v821_v5  ;;  %v842_v26 = vsel %vm834_vm5, %v821_v5, %v824_v16  ;;  %v850_v0 = vshll.u32 %v810_v2, 8 }
 0x20a   : > { %v6836_v36 = vshrl.u32 %v655_v21, 30  ;;  %v839_v4 = vsel %vm837_vm1, %v827_v22, 2102212464  ;;  %v844_v29 = vsel %vm836_vm0, %v827_v22, %v6427_v61  ;;  %v846_v14 = vsel %vm834_vm5, %v824_v16, %v827_v22 }
 0x20b   : > { %v840_v44 = vsel %vm836_vm0, %v824_v16, %v839_v4  ;;  %v845_v6 = vsel %vm835_vm3, %v842_v26, %v844_v29  ;;  %v848_v59 = vsel %vm836_vm0, %v6389_v13, %v6431_v63  ;;  %v2062_v58 = vsel %vm2061_vm10, %v2060_v43, 0  ;;  %v2259_v29 = vld [vmem:[#allocation2 + $0x90] sm:$0xff] }
 0x20c   : > { %v657_v49 = vshll.u32 %v6836_v36, 30  ;;  %v791_v56 = vadd.s32 3, %v787_v33  ;;  %v849_v61 = vsel %vm835_vm3, %v846_v14, %v848_v59  ;;  %v6851_v37 = vshrl.u32 %v2062_v58, 5 }
 0x20d   : > { %v6853_v16 = vmul.u32.u64.low %v850_v0, %v849_v61  ;;  %v6854_v21 = vmul.u32.u64.high %v850_v0, %v849_v61, %v6853_v16  ;;  %v841_v13 = vsel %vm835_vm3, %v838_v27, %v840_v44  ;;  %v6864_v33 = vand.u32 31, %v2062_v58  ;;  %v2260_v44 = vld [vmem:[#allocation2 + $0x98] sm:$0xff] }
 0x20e   : > { %v6856_v26 = vsub.s32 %v654_v42, %v657_v49  ;;  %v6860_v63 = vmul.u32.u64.low %v850_v0, %v845_v6  ;;  %v6861_v2 = vmul.u32.u64.high %v850_v0, %v845_v6, %v6860_v63  ;;  %v6866_v4 = vadd.s32 1, %v4926_v57 }
 0x20f   : > { %v6872_v42 = vsel %vm1981_vm14, %v6824_v23, 920167782  ;;  %v6875_v27 = vand.u32 3, %v791_v56  ;;  %v795_v14 = vxor.u32 2147483648, %v6725_v12  ;;  %v857_v57 = vmul.u32 %v850_v0, %v841_v13 }
 0x210   : > { %v660_v38 = vsub.s32 0, %v6856_v26  ;;  %vm859_vm1 = vc.u32 %v6854_v21, %v6860_v63  ;;  %v860_v49 = vadd.s32 1, %v6861_v2  ;;  %v924_v56 = vshrl.u32 %v9030_v20, %v6378_v62 }
 0x211   : > { %v650_v0 = vadd.s32 %v6770_v8, %v6768_v18  ;;  %v926_v61 = vshll.u32 %v9030_v20, %v6353_v40  ;;  %v929_v16 = vshll.u32 %v9031_v19, %v6353_v40  ;;  %vm596_vm12 = vcmp.lt.s32.totalorder %v6275_v51, 0  ;;  %v2262_v8 = vld [vmem:[#allocation2 + $0xa8] sm:$0xff] }
 0x212   : > { %v4867_v58 = vmin.u32 %v660_v38, %v6856_v26  ;;  %vm794_vm15 = vcmp.eq.s32.totalorder %v6875_v27, 0  ;;  %vm793_vm0 = vcmp.lt.s32.totalorder %v6875_v27, 2  ;;  %vm938_vm10 = vcmp.lt.s32.totalorder %v6384_v9, 1 }
 0x213   : > { %vm939_vm3 = vcmp.lt.s32.totalorder %v6384_v9, 2 }
 0x214   : > { %v662_v13 = vclz %v4867_v58  ;;  %v922_v58 = vshrl.u32 %v9029_v47, %v6378_v62 }
 0x216   : > { %v4868_v3 = vadd.s32 4294967294, %v662_v13 }
 0x218   : > { %vm4869_vm11 = vcmp.lt.s32.totalorder %v4868_v3, 0 }
 0x275   : > { %v451_v5 = vpop.f32.mrf.mxu0 }
 0x276   : > { %v452_v7 = vadd.f32 %v4862_v31, %v451_v5  ;;  %v8969_v31 = vand.u32 2147483647, %v6285_v60  ;;  %v923_v5 = vshll.u32 %v9029_v47, %v6353_v40  ;;  %v930_v40 = vshrl.u32 %v9008_v30, %v6378_v62 }
 0x277   : > { %v5406_v22 = vpop.f32.mrf.mxu0 }
 0x278   : > { %v455_v43 = vmax.f32 %v452_v7, 0.0  ;;  %v913_v59 = vand.u32 8388607, %v8969_v31  ;;  %v927_v7 = vshrl.u32 %v9031_v19, %v6378_v62  ;;  %v2261_v22 = vld [vmem:[#allocation2 + $0xa0] sm:$0xff]  ;;  %v925_v38 = vor.u32 %v924_v56, %v923_v5  ;;  %v2263_v62 = vld [vmem:[#allocation2 + $0xb0] sm:$0xff] }
 0x279   : > { %v931_v5 = vor.u32 %v930_v40, %v929_v16  ;;  %v665_v16 = vsel %vm4869_vm11, 0, %v4868_v3  ;;  %vm797_vm11 = vcmp.eq.s32.totalorder %v6875_v27, 2  ;;  %v2265_v3 = vld [vmem:[#allocation2 + $0xc0] sm:$0xff]  ;;  %v1027_v27 = vshll.u32 %v9029_v47, %v6397_v24 }
 0x27a   : > { %5407 = vmatprep.subr.mxu1 %v455_v43  ;;  %v914_v18 = vor.u32 8388608, %v913_v59  ;;  %v928_v31 = vor.u32 %v927_v7, %v926_v61  ;;  %v9042_v59 = vand.u32 2147483647, %v6275_v51  ;;  %v2264_v7 = vld [vmem:[#allocation2 + $0xb8] sm:$0xff]  ;;  %v667_v40 = vshll.u32 %v6856_v26, %v665_v16 }
 0x27b   : > { %5408 = vmatpush3.msra.mxu1 %v455_v43  ;;  %v680_v43 = vsub.s32 4, %v6836_v36 }
 0x27c   : > { %5410 = vmatmul.mubr.msk.f32.vlgmr.msra.gmra.mxu1 %vm2274_vm4, %v2259_v29  ;;  %v861_v29 = vsel %vm859_vm1, %v860_v49, %v6861_v2  ;;  %vm6915_vm5 = vcmp.le.f32.partialorder %v9042_v59, 0.7853982  ;;  %vm940_vm1 = vcmp.lt.s32.totalorder %v6384_v9, 3  ;;  %v6928_v61 = vshll.u32 %v914_v18, 8 }
 0x27d   : > { %5412 = vmatprep.mubr.msk.f32.mxu1 %vm2274_vm4, %v2260_v44  ;;  %v862_v44 = vadd.s32 %v861_v29, %v857_v57  ;;  %v946_v57 = vsel %vm938_vm10, %v925_v38, %v928_v31  ;;  %v952_v56 = vsel %vm940_vm1, %v6417_v50, %v6457_v55  ;;  %v948_v13 = vsel %vm940_vm1, %v931_v5, %v6438_v32 }
 0x27e   : > { %v666_v29 = vsub.s32 32, %v665_v16  ;;  %v670_v59 = vsub.s32 4294967266, %v665_v16  ;;  %v942_v50 = vsel %vm938_vm10, %v922_v58, %v925_v38  ;;  %v681_v38 = vsel %vm596_vm12, %v680_v43, %v6836_v36 }
 0x27f   : > { %v863_v49 = vadd.s32 536870912, %v862_v44  ;;  %v9046_v36 = vor.u32 %v6806_v28, %v6789_v25  ;;  %v683_v25 = vsel %vm6915_vm5, 0, %v681_v38  ;;  %v6995_v9 = vshll.u32 %v9008_v30, %v6864_v33 }
 0x280   : > { %5413 = vmatmul.mubr.msk.f32.gmra.mxu1 %vm2274_vm4, %v2261_v22  ;;  %v943_v22 = vsel %vm941_vm2, %v931_v5, 2102212464  ;;  %v668_v26 = vshrl.u32 %v650_v0, %v666_v29  ;;  %v671_v18 = vadd.s32 127, %v670_v59  ;;  %v2268_v29 = vld [vmem:[#allocation2 + $0xd8] sm:$0xff] }
 0x281   : > { %5415 = vmatprep.mubr.msk.f32.mxu1 %vm2274_vm4, %v2262_v8  ;;  %v950_v8 = vsel %vm938_vm10, %v928_v31, %v931_v5  ;;  %v6938_v6 = vshrl.u32 %v863_v49, 30  ;;  %v944_v55 = vsel %vm940_vm1, %v928_v31, %v943_v22  ;;  %v2266_v49 = vld [vmem:[#allocation2 + $0xc8] sm:$0xff]  ;;  %v796_v31 = vsel %vm794_vm15, %v6710_v15, %v795_v14 }
 0x282   : > { %v953_v32 = vsel %vm939_vm3, %v950_v8, %v952_v56  ;;  %v669_v56 = vor.u32 %v668_v26, %v667_v40  ;;  %v6977_v14 = vsel %vm1981_vm14, %v9046_v36, 1326507024  ;;  %v945_v43 = vsel %vm939_vm3, %v942_v50, %v944_v55 }
 0x283   : > { %v865_v5 = vshll.u32 %v6938_v6, 30  ;;  %v6961_v58 = vmul.u32.u64.low %v6928_v61, %v953_v32  ;;  %v6962_v0 = vmul.u32.u64.high %v6928_v61, %v953_v32, %v6961_v58  ;;  %v6991_v40 = vsub.s32 32, %v6864_v33 }
 0x284   : > { %5416 = vmatmul.mubr.msk.f32.gmra.mxu1 %vm2274_vm4, %v2263_v62  ;;  %v949_v62 = vsel %vm939_vm3, %v946_v57, %v948_v13  ;;  %v9045_v57 = vxor.u32 2147483648, %v6710_v15  ;;  %v676_v8 = vcvt.s32.f32 %v669_v56  ;;  %v1010_v50 = vand.u32 2147483647, %v6296_v17  ;;  %v2270_v58 = vld [vmem:[#allocation2 + $0xe8] sm:$0xff] }
 0x285   : > { %5418 = vmatprep.mubr.msk.f32.mxu1 %vm2274_vm4, %v2264_v7  ;;  %v672_v7 = vshll.u32 %v671_v18, 23  ;;  %v6969_v22 = vsub.s32 %v862_v44, %v865_v5  ;;  %v6982_v13 = vmul.u32.u64.low %v6928_v61, %v949_v62  ;;  %v6983_v15 = vmul.u32.u64.high %v6928_v61, %v949_v62, %v6982_v13  ;;  %v2269_v62 = vld [vmem:[#allocation2 + $0xe0] sm:$0xff] }
 0x286   : > { %v799_v16 = vsel %vm797_vm11, %v9045_v57, %v6725_v12  ;;  %v2267_v12 = vld [vmem:[#allocation2 + $0xd0] sm:$0xff]  ;;  %v687_v26 = vadd.s32 3, %v683_v25  ;;  %v1028_v5 = vshrl.u32 %v9030_v20, %v6420_v53  ;;  %v1026_v57 = vshrl.u32 %v9029_v47, %v6420_v53 }
 0x287   : > { %v673_v44 = vor.u32 4788187, %v672_v7  ;;  %v868_v28 = vsub.s32 0, %v6969_v22  ;;  %v6999_v59 = vsel %vm793_vm0, %v796_v31, %v799_v16  ;;  %vm963_vm2 = vc.u32 %v6962_v0, %v6982_v13 }
 0x288   : > { %5419 = vmatmul.mubr.msk.f32.gmra.mxu1 %vm2274_vm4, %v2265_v3  ;;  %v961_v3 = vmul.u32 %v6928_v61, %v945_v43  ;;  %v964_v18 = vadd.s32 1, %v6983_v15  ;;  %v858_v61 = vadd.s32 %v6860_v63, %v6854_v21  ;;  %v888_v31 = vsub.s32 4, %v6938_v6 }
 0x289   : > { %5421 = vmatprep.mubr.msk.f32.mxu1 %vm2274_vm4, %v2266_v49  ;;  %v674_v55 = vand.u32 2147483647, %v673_v44  ;;  %v4875_v32 = vmin.u32 %v868_v28, %v6969_v22  ;;  %v1017_v7 = vand.u32 8388607, %v1010_v50  ;;  %v1030_v16 = vshll.u32 %v9030_v20, %v6397_v24 }
 0x28a   : > { %v965_v56 = vsel %vm963_vm2, %v964_v18, %v6983_v15  ;;  %vm790_vm15 = vweird.f32 %v6269_v45  ;;  %v1031_v63 = vshrl.u32 %v9031_v19, %v6420_v53  ;;  %vm804_vm0 = vcmp.lt.s32.totalorder %v6278_v52, 0 }
 0x28b   : > { %v677_v49 = vmul.f32 %v676_v8, %v674_v55  ;;  %v870_v38 = vclz %v4875_v32  ;;  %v966_v21 = vadd.s32 %v965_v56, %v961_v3  ;;  %v1029_v15 = vor.u32 %v1028_v5, %v1027_v27  ;;  %v2271_v8 = vld [vmem:[#allocation2 + $0xf0] sm:$0xff]  ;;  %v2272_v55 = vld [vmem:[#allocation2 + $0xf8] sm:$0xff] }
 0x28c   : > { %5422 = vmatmul.mubr.msk.f32.gmra.mxu1 %vm2274_vm4, %v2267_v12  ;;  %v1033_v12 = vshll.u32 %v9031_v19, %v6397_v24  ;;  %v1034_v44 = vshrl.u32 %v9008_v30, %v6420_v53  ;;  %vm1042_vm10 = vcmp.lt.s32.totalorder %v6447_v1, 1  ;;  %vm1044_vm1 = vcmp.lt.s32.totalorder %v6447_v1, 3 }
 0x28d   : > { %5424 = vmatprep.mubr.msk.f32.mxu1 %vm2274_vm4, %v2268_v29  ;;  %v678_v36 = vxor.u32 2147483648, %v677_v49  ;;  %v4876_v43 = vadd.s32 4294967294, %v870_v38  ;;  %v967_v28 = vadd.s32 536870912, %v966_v21  ;;  %v1032_v29 = vor.u32 %v1031_v63, %v1030_v16 }
 0x28e   : > { %v1035_v3 = vor.u32 %v1034_v44, %v1033_v12  ;;  %v9047_v53 = vand.u32 2147483647, %v6278_v52  ;;  %v1046_v63 = vsel %vm1042_vm10, %v1026_v57, %v1029_v15 }
 0x28f   : > { %v679_v25 = vsel %vm596_vm12, %v678_v36, %v677_v49  ;;  %vm4877_vm3 = vcmp.lt.s32.totalorder %v4876_v43, 0  ;;  %v968_v2 = vshrl.u32 %v967_v28, 30  ;;  %v1018_v49 = vor.u32 8388608, %v1017_v7  ;;  %v9050_v7 = vld [vmem:[#allocation27_spill] sm:$0xff]  ;;  %v9052_v28 = vld [vmem:[#allocation16_spill] sm:$0xff] }
 0x290   : > { %5425 = vmatmul.mubr.msk.f32.gmra.mxu1 %vm2274_vm4, %v2269_v62  ;;  %v682_v32 = vsel %vm6915_vm5, %v6275_v51, %v679_v25  ;;  %v873_v24 = vsel %vm4877_vm3, 0, %v4876_v43  ;;  %vm7042_vm11 = vcmp.le.f32.partialorder %v9047_v53, 0.7853982  ;;  %v1047_v38 = vsel %vm1045_vm8, %v1035_v3, 2102212464 }
 0x291   : > { %5427 = vmatprep.mubr.msk.f32.mxu1 %vm2274_vm4, %v2270_v58  ;;  %5985 = vcosq.f32 %v682_v32  ;;  %v874_v27 = vsub.s32 32, %v873_v24  ;;  %v875_v5 = vshll.u32 %v6969_v22, %v873_v24  ;;  %v878_v62 = vsub.s32 4294967266, %v873_v24  ;;  %v2273_v58 = vld [vmem:[#allocation2 + $0x100] sm:$0xff] }
 0x292   : > { %5987 = vsinq.f32 %v682_v32  ;;  %vm1043_vm12 = vcmp.lt.s32.totalorder %v6447_v1, 2  ;;  %v1050_v36 = vsel %vm1042_vm10, %v1029_v15, %v1032_v29  ;;  %v7054_v22 = vand.u32 3, %v687_v26  ;;  %v9051_v15 = vld [vmem:[#allocation28_spill] sm:$0xff]  ;;  %v9055_v1 = vld [vmem:[#allocation18_spill] sm:$0xff] }
 0x293   : > { %v876_v56 = vshrl.u32 %v858_v61, %v874_v27  ;;  %v879_v16 = vadd.s32 127, %v878_v62  ;;  %v969_v43 = vshll.u32 %v968_v2, 30  ;;  %v1052_v12 = vsel %vm1044_vm1, %v1035_v3, %v9050_v7 }
 0x294   : > { %5428 = vmatmul.mubr.msk.f32.gmra.mxu1 %vm2274_vm4, %v2271_v8  ;;  %vm908_vm8 = vcmp.lt.s32.totalorder %v6285_v60, 0  ;;  %v1048_v8 = vsel %vm1044_vm1, %v1032_v29, %v1047_v38  ;;  %v1054_v25 = vsel %vm1042_vm10, %v1032_v29, %v1035_v3  ;;  %v1053_v57 = vsel %vm1043_vm12, %v1050_v36, %v1052_v12 }
 0x295   : > { %5430 = vmatprep.mubr.msk.f32.mxu1 %vm2274_vm4, %v2272_v55  ;;  %v877_v44 = vor.u32 %v876_v56, %v875_v5  ;;  %v880_v61 = vshll.u32 %v879_v16, 23  ;;  %v7067_v26 = vsub.s32 %v966_v21, %v969_v43  ;;  %v1056_v55 = vsel %vm1044_vm1, %v9052_v28, %v9051_v15  ;;  %v9053_v56 = vld [vmem:[#allocation8_spill] sm:$0xff]  ;;  %v9054_v43 = vld [vmem:[#allocation14_spill] sm:$0xff] }
 0x296   : > { %v1058_v32 = vshll.u32 %v1018_v49, 8  ;;  %v889_v27 = vsel %vm804_vm0, %v888_v31, %v6938_v6  ;;  %v1057_v29 = vsel %vm1043_vm12, %v1054_v25, %v1056_v55  ;;  %v801_v21 = vsel %vm790_vm15, nan, %v6999_v59 }
 0x297   : > { %v881_v24 = vor.u32 4788187, %v880_v61  ;;  %v884_v53 = vcvt.s32.f32 %v877_v44  ;;  %v972_v3 = vsub.s32 0, %v7067_v26  ;;  %vm686_vm5 = vweird.f32 %v6275_v51 }
 0x298   : > { %5431 = vmatmul.mubr.msk.f32.gmra.mxu1 %vm2274_vm4, %v2273_v58  ;;  %v7084_v5 = vmul.u32.u64.low %v1058_v32, %v1057_v29  ;;  %v7085_v62 = vmul.u32.u64.high %v1058_v32, %v1057_v29, %v7084_v5  ;;  %v1049_v38 = vsel %vm1043_vm12, %v1046_v63, %v1048_v8  ;;  %v891_v31 = vsel %vm7042_vm11, 0, %v889_v27 }
 0x299   : > { %v882_v49 = vand.u32 2147483647, %v881_v24  ;;  %v7090_v58 = vmul.u32.u64.low %v1058_v32, %v1053_v57  ;;  %v7091_v6 = vmul.u32.u64.high %v1058_v32, %v1053_v57, %v7090_v58  ;;  %v4879_v45 = vmin.u32 %v972_v3, %v7067_v26 }
 0x29a   : > { %v992_v59 = vsub.s32 4, %v968_v2  ;;  %v1114_v16 = vand.u32 2147483647, %v9053_v56  ;;  %vm689_vm2 = vcmp.lt.s32.totalorder %v7054_v22, 2  ;;  %v1131_v7 = vshll.u32 %v9029_v47, %v9054_v43 }
 0x29b   : > { %v885_v36 = vmul.f32 %v884_v53, %v882_v49  ;;  %v1132_v63 = vshrl.u32 %v9030_v20, %v9055_v1  ;;  %vm690_vm15 = vcmp.eq.s32.totalorder %v7054_v22, 0  ;;  %vm693_vm10 = vcmp.eq.s32.totalorder %v7054_v22, 2 }
 0x29c   : > { %v974_v12 = vclz %v4879_v45  ;;  %v1065_v44 = vmul.u32 %v1058_v32, %v1049_v38  ;;  %v895_v8 = vadd.s32 3, %v891_v31  ;;  %vm1067_vm3 = vc.u32 %v7085_v62, %v7090_v58 }
 0x29d   : > { %v886_v61 = vxor.u32 2147483648, %v885_v36  ;;  %v1068_v25 = vadd.s32 1, %v7091_v6  ;;  %v9056_v15 = vand.u32 2147483647, %v6285_v60  ;;  %v962_v55 = vadd.s32 %v6982_v13, %v6962_v0 }
 0x29e   : > { %v5986_v57 = vpop.eup %5985  ;;  %v4880_v24 = vadd.s32 4294967294, %v974_v12  ;;  %v993_v32 = vsel %vm908_vm8, %v992_v59, %v968_v2  ;;  %v1121_v53 = vand.u32 8388607, %v1114_v16  ;;  %v1133_v49 = vor.u32 %v1132_v63, %v1131_v7 }
 0x29f   : > { %vm7110_vm1 = vcmp.le.f32.partialorder %v9056_v15, 0.7853982  ;;  %v5988_v27 = vpop.eup %5987  ;;  %v694_v29 = vxor.u32 2147483648, %v5986_v57  ;;  %v887_v3 = vsel %vm804_vm0, %v886_v61, %v885_v36  ;;  %v1069_v5 = vsel %vm1067_vm3, %v1068_v25, %v7091_v6 }
 0x2a0   : > { %v691_v38 = vxor.u32 2147483648, %v5988_v27  ;;  %v890_v0 = vsel %vm7042_vm11, %v6278_v52, %v887_v3  ;;  %vm4881_vm12 = vcmp.lt.s32.totalorder %v4880_v24, 0  ;;  %v1070_v13 = vadd.s32 %v1069_v5, %v1065_v44 }
 0x2a1   : > { %v695_v2 = vsel %vm693_vm10, %v694_v29, %v5988_v27  ;;  %5989 = vcosq.f32 %v890_v0  ;;  %v977_v31 = vsel %vm4881_vm12, 0, %v4880_v24  ;;  %v1134_v45 = vshll.u32 %v9030_v20, %v9054_v43  ;;  %v9059_v24 = vld [vmem:[#allocation17_spill] sm:$0xff] }
 0x2a2   : > { %v692_v59 = vsel %vm690_vm15, %v5986_v57, %v691_v38  ;;  %5991 = vsinq.f32 %v890_v0  ;;  %v978_v6 = vsub.s32 32, %v977_v31  ;;  %v979_v36 = vshll.u32 %v7067_v26, %v977_v31 }
 0x2a3   : > { %v696_v18 = vsel %vm689_vm2, %v692_v59, %v695_v2  ;;  %v982_v7 = vsub.s32 4294967266, %v977_v31  ;;  %v1071_v63 = vadd.s32 536870912, %v1070_v13  ;;  %v1135_v12 = vshrl.u32 %v9031_v19, %v9055_v1 }
 0x2a4   : > { %v697_v44 = vsel %vm686_vm5, nan, %v696_v18  ;;  %v980_v61 = vshrl.u32 %v962_v55, %v978_v6  ;;  %v1137_v25 = vshll.u32 %v9031_v19, %v9054_v43  ;;  %v1138_v57 = vshrl.u32 %v9008_v30, %v9055_v1  ;;  %v9061_v18 = vld [vmem:[#allocation31_spill] sm:$0xff] }
 0x2a5   : > { %5435 = vmatprep.mubr.msk.f32.mxu0 %vm2274_vm4, %v697_v44  ;;  %v983_v26 = vadd.s32 127, %v982_v7  ;;  %v7144_v22 = vshrl.u32 %v1071_v63, 30  ;;  %v1136_v15 = vor.u32 %v1135_v12, %v1134_v45  ;;  %vm1146_vm0 = vcmp.lt.s32.totalorder %v9059_v24, 1  ;;  %v9062_v7 = vld [vmem:[#allocation24_spill] sm:$0xff] }
 0x2a6   : > { %5436 = vmatmul.mubr.msk.f32.vlgmr.msra.gmra.mxu0 %vm2274_vm4, %v801_v21  ;;  %v896_v27 = vand.u32 3, %v895_v8  ;;  %v981_v51 = vor.u32 %v980_v61, %v979_v36  ;;  %v1139_v29 = vor.u32 %v1138_v57, %v1137_v25  ;;  %vm1148_vm11 = vcmp.lt.s32.totalorder %v9059_v24, 3  ;;  %v9060_v8 = vld [vmem:[#allocation30_spill] sm:$0xff] }
 0x2a7   : > { %v984_v55 = vshll.u32 %v983_v26, 23  ;;  %v995_v43 = vsel %vm7110_vm1, 0, %v993_v32  ;;  %v1073_v3 = vshll.u32 %v7144_v22, 30  ;;  %v1130_v5 = vshrl.u32 %v9029_v47, %v9055_v1 }
 0x2a8   : > { %v1122_v38 = vor.u32 8388608, %v1121_v53  ;;  %vm1147_vm5 = vcmp.lt.s32.totalorder %v9059_v24, 2  ;;  %v1154_v21 = vsel %vm1146_vm0, %v1133_v49, %v1136_v15  ;;  %v1156_v0 = vsel %vm1148_vm11, %v1139_v29, %v9060_v8 }
 0x2a9   : > { %v985_v2 = vor.u32 4788187, %v984_v55  ;;  %v988_v31 = vcvt.s32.f32 %v981_v51  ;;  %v7160_v45 = vsub.s32 %v1070_v13, %v1073_v3  ;;  %v1151_v32 = vsel %vm1149_vm13, %v1139_v29, 2102212464 }
 0x2aa   : > { %v7166_v1 = vshll.u32 %v8987_v46, %v6864_v33  ;;  %vm894_vm2 = vweird.f32 %v6278_v52  ;;  %v999_v53 = vadd.s32 3, %v995_v43  ;;  %v1158_v59 = vsel %vm1146_vm0, %v1136_v15, %v1139_v29 }
 0x2ab   : > { %v986_v6 = vand.u32 2147483647, %v985_v2  ;;  %v1076_v36 = vsub.s32 0, %v7160_v45  ;;  %v1157_v13 = vsel %vm1147_vm5, %v1154_v21, %v1156_v0  ;;  %v1160_v63 = vsel %vm1148_vm11, %v9062_v7, %v9061_v18 }
 0x2ac   : > { %v1150_v12 = vsel %vm1146_vm0, %v1130_v5, %v1133_v49  ;;  %v1152_v44 = vsel %vm1148_vm11, %v1136_v15, %v1151_v32  ;;  %v1161_v61 = vsel %vm1147_vm5, %v1158_v59, %v1160_v63  ;;  %v1162_v25 = vshll.u32 %v1122_v38, 8 }
 0x2ad   : > { %vm898_vm13 = vcmp.eq.s32.totalorder %v896_v27, 0  ;;  %vm901_vm15 = vcmp.eq.s32.totalorder %v896_v27, 2  ;;  %v989_v57 = vmul.f32 %v988_v31, %v986_v6  ;;  %v4883_v26 = vmin.u32 %v1076_v36, %v7160_v45  ;;  %v9063_v6 = vld [vmem:[#allocation9_spill] sm:$0xff] }
 0x2ae   : > { %v5990_v51 = vpop.eup %5989  ;;  %v7185_v29 = vmul.u32.u64.low %v1162_v25, %v1161_v61  ;;  %v7186_v55 = vmul.u32.u64.high %v1162_v25, %v1161_v61, %v7185_v29  ;;  %v7188_v43 = vmul.u32.u64.low %v1162_v25, %v1157_v13  ;;  %v7189_v3 = vmul.u32.u64.high %v1162_v25, %v1157_v13, %v7188_v43 }
 0x2af   : > { %v5992_v49 = vpop.eup %5991  ;;  %v902_v5 = vxor.u32 2147483648, %v5990_v51  ;;  %v990_v15 = vxor.u32 2147483648, %v989_v57  ;;  %v1078_v21 = vclz %v4883_v26  ;;  %v1153_v38 = vsel %vm1147_vm5, %v1150_v12, %v1152_v44 }
 0x2b0   : > { %vm897_vm10 = vcmp.lt.s32.totalorder %v896_v27, 2  ;;  %v899_v8 = vxor.u32 2147483648, %v5992_v49  ;;  %v7194_v0 = vand.u32 3, %v999_v53  ;;  %v1066_v2 = vadd.s32 %v7090_v58, %v7085_v62 }
 0x2b1   : > { %v903_v31 = vsel %vm901_vm15, %v902_v5, %v5992_v49  ;;  %v991_v32 = vsel %vm908_vm8, %v990_v15, %v989_v57  ;;  %v4884_v59 = vadd.s32 4294967294, %v1078_v21  ;;  %v1218_v36 = vand.u32 2147483647, %v9063_v6  ;;  %v9066_v57 = vld [vmem:[#allocation15_spill] sm:$0xff] }
 0x2b2   : > { %vm1012_vm3 = vcmp.lt.s32.totalorder %v6296_v17, 0  ;;  %v900_v24 = vsel %vm898_vm13, %v5990_v51, %v899_v8  ;;  %v994_v53 = vsel %vm7110_vm1, %v6285_v60, %v991_v32  ;;  %v1169_v13 = vmul.u32 %v1162_v25, %v1153_v38  ;;  %v9067_v51 = vld [vmem:[#allocation20_spill] sm:$0xff] }
 0x2b3   : > { %vm1171_vm12 = vc.u32 %v7186_v55, %v7188_v43  ;;  %v904_v62 = vsel %vm897_vm10, %v900_v24, %v903_v31  ;;  %5993 = vcosq.f32 %v994_v53  ;;  %vm4885_vm0 = vcmp.lt.s32.totalorder %v4884_v59, 0 }
 0x2b4   : > { %v1172_v58 = vadd.s32 1, %v7189_v3  ;;  %v905_v18 = vsel %vm894_vm2, nan, %v904_v62  ;;  %5995 = vsinq.f32 %v994_v53  ;;  %v1081_v7 = vsel %vm4885_vm0, 0, %v4884_v59  ;;  %v9068_v53 = vld [vmem:[#allocation22_spill] sm:$0xff] }
 0x2b5   : > { %v1096_v27 = vsub.s32 4, %v7144_v22  ;;  %5438 = vmatprep.mubr.msk.f32.mxu0 %vm2274_vm4, %v905_v18  ;;  %vm7216_vm8 = vcmp.le.f32.partialorder %v1010_v50, 0.7853982  ;;  %v1082_v63 = vsub.s32 32, %v1081_v7  ;;  %v1083_v12 = vshll.u32 %v7160_v45, %v1081_v7 }
 0x2b6   : > { %v1086_v44 = vsub.s32 4294967266, %v1081_v7  ;;  %v1173_v61 = vsel %vm1171_vm12, %v1172_v58, %v7189_v3  ;;  %v1225_v25 = vand.u32 8388607, %v1218_v36  ;;  %v1235_v26 = vshll.u32 %v9029_v47, %v9066_v57 }
 0x2b7   : > { %v1174_v52 = vadd.s32 %v1173_v61, %v1169_v13  ;;  %v1236_v29 = vshrl.u32 %v9030_v20, %v9067_v51  ;;  %v1084_v50 = vshrl.u32 %v1066_v2, %v1082_v63  ;;  %v1238_v5 = vshll.u32 %v9030_v20, %v9066_v57  ;;  %v9069_v61 = vld [vmem:[#allocation35_spill] sm:$0xff] }
 0x2b8   : > { %v1087_v49 = vadd.s32 127, %v1086_v44  ;;  %v1239_v45 = vshrl.u32 %v9031_v19, %v9067_v51  ;;  %v1234_v3 = vshrl.u32 %v9029_v47, %v9067_v51  ;;  %v1241_v21 = vshll.u32 %v9031_v19, %v9066_v57 }
 0x2b9   : > { %v1175_v15 = vadd.s32 536870912, %v1174_v52  ;;  %v1242_v38 = vshrl.u32 %v9008_v30, %v9067_v51  ;;  %v1085_v8 = vor.u32 %v1084_v50, %v1083_v12  ;;  %v1237_v2 = vor.u32 %v1236_v29, %v1235_v26  ;;  %v9070_v51 = vld [vmem:[#allocation37_spill] sm:$0xff] }
 0x2ba   : > { %v1088_v31 = vshll.u32 %v1087_v49, 23  ;;  %v1240_v32 = vor.u32 %v1239_v45, %v1238_v5  ;;  %vm1250_vm1 = vcmp.lt.s32.totalorder %v9068_v53, 1  ;;  %vm1252_vm11 = vcmp.lt.s32.totalorder %v9068_v53, 3  ;;  %v9071_v29 = vld [vmem:[#allocation25_spill] sm:$0xff] }
 0x2bb   : > { %v7238_v59 = vshrl.u32 %v1175_v15, 30  ;;  %v1243_v24 = vor.u32 %v1242_v38, %v1241_v21  ;;  %vm998_vm5 = vweird.f32 %v6285_v60  ;;  %v1092_v62 = vcvt.s32.f32 %v1085_v8 }
 0x2bc   : > { %v1089_v13 = vor.u32 4788187, %v1088_v31  ;;  %v1097_v58 = vsel %vm1012_vm3, %v1096_v27, %v7144_v22  ;;  %v1226_v18 = vor.u32 8388608, %v1225_v25  ;;  %vm2165_vm2 = vcmp.gt.s32.totalorder %v6866_v4, 0 }
 0x2bd   : > { %vm1001_vm13 = vcmp.lt.s32.totalorder %v7194_v0, 2  ;;  %v1177_v7 = vshll.u32 %v7238_v59, 30  ;;  %vm1251_vm15 = vcmp.lt.s32.totalorder %v9068_v53, 2  ;;  %v1255_v63 = vsel %vm1253_vm6, %v1243_v24, 2102212464 }
 0x2be   : > { %v1090_v12 = vand.u32 2147483647, %v1089_v13  ;;  %v1258_v44 = vsel %vm1250_vm1, %v1237_v2, %v1240_v32  ;;  %v1260_v22 = vsel %vm1252_vm11, %v1243_v24, %v9069_v61  ;;  %v1262_v27 = vsel %vm1250_vm1, %v1240_v32, %v1243_v24 }
 0x2bf   : > { %v1099_v25 = vsel %vm7216_vm8, 0, %v1097_v58  ;;  %v7261_v57 = vsub.s32 %v1174_v52, %v1177_v7  ;;  %v1254_v26 = vsel %vm1250_vm1, %v1234_v3, %v1237_v2  ;;  %v1264_v50 = vsel %vm1252_vm11, %v9071_v29, %v9070_v51 }
 0x2c0   : > { %v1093_v49 = vmul.f32 %v1092_v62, %v1090_v12  ;;  %v1256_v5 = vsel %vm1252_vm11, %v1240_v32, %v1255_v63  ;;  %v1265_v45 = vsel %vm1251_vm15, %v1262_v27, %v1264_v50  ;;  %v1266_v15 = vshll.u32 %v1226_v18, 8  ;;  %v5994_v21 = vpop.eup %5993  ;;  %v9072_v27 = vld [vmem:[#allocation10_spill] sm:$0xff] }
 0x2c1   : > { %vm1002_vm6 = vcmp.eq.s32.totalorder %v7194_v0, 0  ;;  %vm1005_vm10 = vcmp.eq.s32.totalorder %v7194_v0, 2  ;;  %v1180_v52 = vsub.s32 0, %v7261_v57  ;;  %v1261_v3 = vsel %vm1251_vm15, %v1258_v44, %v1260_v22  ;;  %v5996_v38 = vpop.eup %5995 }
 0x2c2   : > { %v1006_v8 = vxor.u32 2147483648, %v5994_v21  ;;  %v1094_v31 = vxor.u32 2147483648, %v1093_v49  ;;  %v7278_v2 = vmul.u32.u64.low %v1266_v15, %v1265_v45  ;;  %v7279_v24 = vmul.u32.u64.high %v1266_v15, %v1265_v45, %v7278_v2 }
 0x2c3   : > { %v1003_v32 = vxor.u32 2147483648, %v5996_v38  ;;  %v1103_v13 = vadd.s32 3, %v1099_v25  ;;  %v4887_v62 = vmin.u32 %v1180_v52, %v7261_v57  ;;  %v1257_v58 = vsel %vm1251_vm15, %v1254_v26, %v1256_v5 }
 0x2c4   : > { %v1007_v18 = vsel %vm1005_vm10, %v1006_v8, %v5996_v38  ;;  %v1095_v7 = vsel %vm1012_vm3, %v1094_v31, %v1093_v49  ;;  %v7286_v63 = vmul.u32.u64.low %v1266_v15, %v1261_v3  ;;  %v7287_v12 = vmul.u32.u64.high %v1266_v15, %v1261_v3, %v7286_v63  ;;  %v9076_v38 = vld [vmem:[#allocation29_spill] sm:$0xff] }
 0x2c5   : > { %v1004_v44 = vsel %vm1002_vm6, %v5994_v21, %v1003_v32  ;;  %v1098_v61 = vsel %vm7216_vm8, %v6296_v17, %v1095_v7  ;;  %v1182_v22 = vclz %v4887_v62  ;;  %v1322_v25 = vand.u32 2147483647, %v9072_v27  ;;  %v9082_v21 = vld [vmem:[#allocation26_spill] sm:$0xff] }
 0x2c6   : > { %v7298_v53 = vshrl.u32 %v8987_v46, %v6991_v40  ;;  %v7302_v26 = vshrl.u32 %v8989_v34, %v6991_v40  ;;  %v1008_v51 = vsel %vm1001_vm13, %v1004_v44, %v1007_v18  ;;  %5997 = vcosq.f32 %v1098_v61 }
 0x2c7   : > { %vm1116_vm3 = vcmp.lt.s32.totalorder %v9053_v56, 0  ;;  %v1009_v28 = vsel %vm998_vm5, nan, %v1008_v51  ;;  %5999 = vsinq.f32 %v1098_v61  ;;  %v4888_v29 = vadd.s32 4294967294, %v1182_v22  ;;  %v9077_v51 = vld [vmem:[#allocation33_spill] sm:$0xff] }
 0x2c8   : > { %v1273_v50 = vmul.u32 %v1266_v15, %v1257_v58  ;;  %v7312_v49 = vsel %vm2165_vm2, %v6866_v4, 0  ;;  %5439 = vmatmul.mubr.msk.f32.gmra.mxu0 %vm2274_vm4, %v1009_v28  ;;  %v7315_v5 = vand.u32 3, %v1103_v13  ;;  %vm1275_vm12 = vc.u32 %v7279_v24, %v7286_v63  ;;  %v9073_v15 = vld [vmem:[#allocation23_spill] sm:$0xff] }
 0x2c9   : > { %v1276_v0 = vadd.s32 1, %v7287_v12  ;;  %v1170_v60 = vadd.s32 %v7188_v43, %v7186_v55  ;;  %vm4889_vm0 = vcmp.lt.s32.totalorder %v4888_v29, 0  ;;  %v1329_v45 = vand.u32 8388607, %v1322_v25 }
 0x2ca   : > { %v1339_v4 = vshll.u32 %v9029_v47, %v9073_v15  ;;  %vm7328_vm8 = vcmp.le.f32.partialorder %v1114_v16, 0.7853982  ;;  %v1185_v52 = vsel %vm4889_vm0, 0, %v4888_v29  ;;  %v1340_v8 = vshrl.u32 %v9030_v20, %v9076_v38 }
 0x2cb   : > { %v1277_v3 = vsel %vm1275_vm12, %v1276_v0, %v7287_v12  ;;  %v1342_v55 = vshll.u32 %v9030_v20, %v9073_v15  ;;  %v1186_v43 = vsub.s32 32, %v1185_v52  ;;  %v1187_v31 = vshll.u32 %v7261_v57, %v1185_v52 }
 0x2cc   : > { %v1190_v2 = vsub.s32 4294967266, %v1185_v52  ;;  %v1278_v32 = vadd.s32 %v1277_v3, %v1273_v50  ;;  %vm1106_vm1 = vcmp.eq.s32.totalorder %v7315_v5, 0  ;;  %v1200_v16 = vsub.s32 4, %v7238_v59 }
 0x2cd   : > { %v1343_v13 = vshrl.u32 %v9031_v19, %v9076_v38  ;;  %v1345_v62 = vshll.u32 %v9031_v19, %v9073_v15  ;;  %v1346_v58 = vshrl.u32 %v9008_v30, %v9076_v38  ;;  %vm1105_vm11 = vcmp.lt.s32.totalorder %v7315_v5, 2 }
 0x2ce   : > { %v1188_v18 = vshrl.u32 %v1170_v60, %v1186_v43  ;;  %v1191_v7 = vadd.s32 127, %v1190_v2  ;;  %v1279_v57 = vadd.s32 536870912, %v1278_v32  ;;  %v1330_v12 = vor.u32 8388608, %v1329_v45  ;;  %v9080_v43 = vld [vmem:[#allocation41_spill] sm:$0xff] }
 0x2cf   : > { %vm1102_vm5 = vweird.f32 %v6296_v17  ;;  %v1341_v44 = vor.u32 %v1340_v8, %v1339_v4  ;;  %v1344_v61 = vor.u32 %v1343_v13, %v1342_v55  ;;  %v1347_v22 = vor.u32 %v1346_v58, %v1345_v62  ;;  %v9078_v55 = vld [vmem:[#allocation45_spill] sm:$0xff] }
 0x2d0   : > { %vm1354_vm2 = vcmp.lt.s32.totalorder %v9077_v51, 1  ;;  %v1189_v28 = vor.u32 %v1188_v18, %v1187_v31  ;;  %v1192_v29 = vshll.u32 %v1191_v7, 23  ;;  %v7349_v50 = vshrl.u32 %v1279_v57, 30 }
 0x2d1   : > { %vm1356_vm13 = vcmp.lt.s32.totalorder %v9077_v51, 3  ;;  %v1201_v0 = vsel %vm1116_vm3, %v1200_v16, %v7238_v59  ;;  %v1338_v60 = vshrl.u32 %v9029_v47, %v9076_v38  ;;  %vm1355_vm15 = vcmp.lt.s32.totalorder %v9077_v51, 2  ;;  %v9079_v38 = vld [vmem:[#allocation48_spill] sm:$0xff] }
 0x2d2   : > { %v1359_v45 = vsel %vm1357_vm9, %v1347_v22, 2102212464  ;;  %v1193_v15 = vor.u32 4788187, %v1192_v29  ;;  %v1196_v4 = vcvt.s32.f32 %v1189_v28  ;;  %v1281_v52 = vshll.u32 %v7349_v50, 30 }
 0x2d3   : > { %v1366_v3 = vsel %vm1354_vm2, %v1344_v61, %v1347_v22  ;;  %v1362_v8 = vsel %vm1354_vm2, %v1341_v44, %v1344_v61  ;;  %v1364_v59 = vsel %vm1356_vm13, %v1347_v22, %v9078_v55  ;;  %v1368_v31 = vsel %vm1356_vm13, %v9080_v43, %v9079_v38  ;;  %v5998_v16 = vpop.eup %5997 }
 0x2d4   : > { %v1370_v2 = vshll.u32 %v1330_v12, 8  ;;  %vm1109_vm9 = vcmp.eq.s32.totalorder %v7315_v5, 2  ;;  %v1194_v13 = vand.u32 2147483647, %v1193_v15  ;;  %v1203_v62 = vsel %vm7328_vm8, 0, %v1201_v0  ;;  %v6000_v18 = vpop.eup %5999 }
 0x2d5   : > { %v7375_v58 = vsub.s32 %v1278_v32, %v1281_v52  ;;  %v1110_v7 = vxor.u32 2147483648, %v5998_v16  ;;  %v1358_v57 = vsel %vm1354_vm2, %v1338_v60, %v1341_v44  ;;  %v1360_v22 = vsel %vm1356_vm13, %v1344_v61, %v1359_v45 }
 0x2d6   : > { %v1369_v12 = vsel %vm1355_vm15, %v1366_v3, %v1368_v31  ;;  %v1107_v28 = vxor.u32 2147483648, %v6000_v18  ;;  %v1197_v29 = vmul.f32 %v1196_v4, %v1194_v13  ;;  %v1365_v0 = vsel %vm1355_vm15, %v1362_v8, %v1364_v59 }
 0x2d7   : > { %v1284_v15 = vsub.s32 0, %v7375_v58  ;;  %v1111_v32 = vsel %vm1109_vm9, %v1110_v7, %v6000_v18  ;;  %v1207_v52 = vadd.s32 3, %v1203_v62  ;;  %v7390_v44 = vshrl.u32 %v7312_v49, 5 }
 0x2d8   : > { %v7386_v55 = vmul.u32.u64.low %v1370_v2, %v1369_v12  ;;  %v7387_v38 = vmul.u32.u64.high %v1370_v2, %v1369_v12, %v7386_v55  ;;  %v1108_v61 = vsel %vm1106_vm1, %v5998_v16, %v1107_v28  ;;  %v1198_v60 = vxor.u32 2147483648, %v1197_v29  ;;  %v9083_v12 = vld [vmem:[#allocation36_spill] sm:$0xff] }
 0x2d9   : > { %v4891_v45 = vmin.u32 %v1284_v15, %v7375_v58  ;;  %v1112_v4 = vsel %vm1105_vm11, %v1108_v61, %v1111_v32  ;;  %v1361_v3 = vsel %vm1355_vm15, %v1358_v57, %v1360_v22  ;;  %v7404_v43 = vand.u32 31, %v7312_v49  ;;  %v9081_v49 = vld [vmem:[#allocation11_spill] sm:$0xff]  ;;  %v9092_v61 = vld [vmem:[#allocation32_spill] sm:$0xff] }
 0x2da   : > { %v7399_v8 = vmul.u32.u64.low %v1370_v2, %v1365_v0  ;;  %v7400_v59 = vmul.u32.u64.high %v1370_v2, %v1365_v0, %v7399_v8  ;;  %v1113_v31 = vsel %vm1102_vm5, nan, %v1112_v4  ;;  %v1199_v16 = vsel %vm1116_vm3, %v1198_v60, %v1197_v29 }
 0x2db   : > { %v1286_v13 = vclz %v4891_v45  ;;  %v7412_v5 = vor.u32 %v7298_v53, %v6995_v9  ;;  %5441 = vmatprep.mubr.msk.f32.mxu0 %vm2274_vm4, %v1113_v31  ;;  %v1202_v51 = vsel %vm7328_vm8, %v9053_v56, %v1199_v16  ;;  %v7418_v62 = vand.u32 3, %v1207_v52 }
 0x2dc   : > { %v1426_v18 = vand.u32 2147483647, %v9081_v49  ;;  %6001 = vcosq.f32 %v1202_v51  ;;  %v1377_v7 = vmul.u32 %v1370_v2, %v1361_v3  ;;  %vm1379_vm6 = vc.u32 %v7387_v38, %v7399_v8 }
 0x2dd   : > { %v4892_v17 = vadd.s32 4294967294, %v1286_v13  ;;  %6003 = vsinq.f32 %v1202_v51  ;;  %v1274_v9 = vadd.s32 %v7286_v63, %v7279_v24  ;;  %v1304_v53 = vsub.s32 4, %v7349_v50 }
 0x2de   : > { %v1380_v57 = vadd.s32 1, %v7400_v59  ;;  %vm1220_vm10 = vcmp.lt.s32.totalorder %v9063_v6, 0  ;;  %v1443_v22 = vshll.u32 %v9029_v47, %v9082_v21  ;;  %v1444_v2 = vshrl.u32 %v9030_v20, %v9083_v12 }
 0x2df   : > { %vm4893_vm3 = vcmp.lt.s32.totalorder %v4892_v17, 0  ;;  %v1446_v28 = vshll.u32 %v9030_v20, %v9082_v21  ;;  %v1433_v24 = vand.u32 8388607, %v1426_v18  ;;  %v1447_v63 = vshrl.u32 %v9031_v19, %v9083_v12 }
 0x2e0   : > { %v1289_v29 = vsel %vm4893_vm3, 0, %v4892_v17  ;;  %v1381_v15 = vsel %vm1379_vm6, %v1380_v57, %v7400_v59  ;;  %vm7442_vm12 = vcmp.le.f32.partialorder %v1218_v36, 0.7853982  ;;  %v1445_v60 = vor.u32 %v1444_v2, %v1443_v22  ;;  %v9088_v2 = vld [vmem:[#allocation50_spill] sm:$0xff] }
 0x2e1   : > { %v1290_v0 = vsub.s32 32, %v1289_v29  ;;  %v1291_v32 = vshll.u32 %v7375_v58, %v1289_v29  ;;  %v1294_v52 = vsub.s32 4294967266, %v1289_v29  ;;  %v1382_v55 = vadd.s32 %v1381_v15, %v1377_v7  ;;  %v9086_v58 = vld [vmem:[#allocation38_spill] sm:$0xff] }
 0x2e2   : > { %v1448_v45 = vor.u32 %v1447_v63, %v1446_v28  ;;  %v1449_v4 = vshll.u32 %v9031_v19, %v9082_v21  ;;  %v1450_v3 = vshrl.u32 %v9008_v30, %v9083_v12  ;;  %vm1458_vm0 = vcmp.lt.s32.totalorder %v9086_v58, 1  ;;  %v9087_v21 = vld [vmem:[#allocation49_spill] sm:$0xff]  ;;  %v9089_v28 = vld [vmem:[#allocation44_spill] sm:$0xff] }
 0x2e3   : > { %v1292_v59 = vshrl.u32 %v1274_v9, %v1290_v0  ;;  %v1295_v31 = vadd.s32 127, %v1294_v52  ;;  %v1383_v16 = vadd.s32 536870912, %v1382_v55  ;;  %v1434_v13 = vor.u32 8388608, %v1433_v24 }
 0x2e4   : > { %v1442_v36 = vshrl.u32 %v9029_v47, %v9083_v12  ;;  %v1451_v51 = vor.u32 %v1450_v3, %v1449_v4  ;;  %vm1460_vm8 = vcmp.lt.s32.totalorder %v9086_v58, 3  ;;  %vm1206_vm1 = vweird.f32 %v9053_v56 }
 0x2e5   : > { %v1293_v17 = vor.u32 %v1292_v59, %v1291_v32  ;;  %v1296_v7 = vshll.u32 %v1295_v31, 23  ;;  %v7455_v57 = vshrl.u32 %v1383_v16, 30  ;;  %vm1459_vm11 = vcmp.lt.s32.totalorder %v9086_v58, 2 }
 0x2e6   : > { %v1466_v9 = vsel %vm1458_vm0, %v1445_v60, %v1448_v45  ;;  %v1468_v22 = vsel %vm1460_vm8, %v1451_v51, %v9087_v21  ;;  %v1470_v12 = vsel %vm1458_vm0, %v1448_v45, %v1451_v51  ;;  %v1472_v29 = vsel %vm1460_vm8, %v9089_v28, %v9088_v2 }
 0x2e7   : > { %v1297_v15 = vor.u32 4788187, %v1296_v7  ;;  %v1300_v24 = vcvt.s32.f32 %v1293_v17  ;;  %v1385_v63 = vshll.u32 %v7455_v57, 30  ;;  %vm9090_vm5 = vcmp.lt.s32.totalorder %v9086_v58, 4 }
 0x2e8   : > { %v1463_v0 = vsel %vm9090_vm5, %v1451_v51, 2102212464  ;;  %vm1210_vm2 = vcmp.eq.s32.totalorder %v7418_v62, 0  ;;  %v1305_v32 = vsel %vm1220_vm10, %v1304_v53, %v7349_v50  ;;  %v1473_v52 = vsel %vm1459_vm11, %v1470_v12, %v1472_v29 }
 0x2e9   : > { %v1474_v4 = vshll.u32 %v1434_v13, 8  ;;  %vm1213_vm13 = vcmp.eq.s32.totalorder %v7418_v62, 2  ;;  %v1298_v3 = vand.u32 2147483647, %v1297_v15  ;;  %v7479_v59 = vsub.s32 %v1382_v55, %v1385_v63  ;;  %v6002_v16 = vpop.eup %6001 }
 0x2ea   : > { %v1469_v31 = vsel %vm1459_vm11, %v1466_v9, %v1468_v22  ;;  %v1462_v51 = vsel %vm1458_vm0, %v1442_v36, %v1445_v60  ;;  %v1464_v17 = vsel %vm1460_vm8, %v1448_v45, %v1463_v0  ;;  %v6004_v7 = vpop.eup %6003  ;;  %v1214_v13 = vxor.u32 2147483648, %v6002_v16 }
 0x2eb   : > { %v7487_v50 = vmul.u32.u64.low %v1474_v4, %v1473_v52  ;;  %v7488_v53 = vmul.u32.u64.high %v1474_v4, %v1473_v52, %v7487_v50  ;;  %v1301_v21 = vmul.f32 %v1300_v24, %v1298_v3  ;;  %v1307_v55 = vsel %vm7442_vm12, 0, %v1305_v32 }
 0x2ec   : > { %v1388_v12 = vsub.s32 0, %v7479_v59  ;;  %vm1209_vm15 = vcmp.lt.s32.totalorder %v7418_v62, 2  ;;  %v1211_v9 = vxor.u32 2147483648, %v6004_v7  ;;  %v1215_v60 = vsel %vm1213_vm13, %v1214_v13, %v6004_v7  ;;  %v9102_v13 = vld [vmem:[#allocation40_spill] sm:$0xff] }
 0x2ed   : > { %v7494_v22 = vmul.u32.u64.low %v1474_v4, %v1469_v31  ;;  %v7495_v2 = vmul.u32.u64.high %v1474_v4, %v1469_v31, %v7494_v22  ;;  %v1302_v45 = vxor.u32 2147483648, %v1301_v21  ;;  %v1465_v28 = vsel %vm1459_vm11, %v1462_v51, %v1464_v17  ;;  %v9091_v17 = vld [vmem:[#allocation12_spill] sm:$0xff] }
 0x2ee   : > { %v4895_v36 = vmin.u32 %v1388_v12, %v7479_v59  ;;  %v7506_v15 = vsub.s32 32, %v7404_v43  ;;  %v1212_v24 = vsel %vm1210_vm2, %v6002_v16, %v1211_v9  ;;  %v1311_v63 = vadd.s32 3, %v1307_v55  ;;  %v9095_v55 = vld [vmem:[#allocation39_spill] sm:$0xff] }
 0x2ef   : > { %v7512_v0 = vshll.u32 %v9008_v30, %v7404_v43  ;;  %v1216_v32 = vsel %vm1209_vm15, %v1212_v24, %v1215_v60  ;;  %v1303_v52 = vsel %vm1220_vm10, %v1302_v45, %v1301_v21  ;;  %vm1324_vm9 = vcmp.lt.s32.totalorder %v9072_v27, 0 }
 0x2f0   : > { %v1390_v58 = vclz %v4895_v36  ;;  %v1217_v3 = vsel %vm1206_vm1, nan, %v1216_v32  ;;  %v1306_v62 = vsel %vm7442_vm12, %v9063_v6, %v1303_v52  ;;  %v1481_v31 = vmul.u32 %v1474_v4, %v1465_v28 }
 0x2f1   : > { %vm1483_vm6 = vc.u32 %v7488_v53, %v7494_v22  ;;  %5442 = vmatmul.mubr.msk.f32.gmra.mxu0 %vm2274_vm4, %v1217_v3  ;;  %6005 = vcosq.f32 %v1306_v62  ;;  %v1484_v51 = vadd.s32 1, %v7495_v2  ;;  %v1530_v50 = vand.u32 2147483647, %v9091_v17 }
 0x2f2   : > { %v4896_v16 = vadd.s32 4294967294, %v1390_v58  ;;  %6007 = vsinq.f32 %v1306_v62  ;;  %v7527_v7 = vand.u32 3, %v1311_v63  ;;  %v1378_v56 = vadd.s32 %v7399_v8, %v7387_v38 }
 0x2f3   : > { %v1547_v4 = vshll.u32 %v9029_v47, %v9092_v61  ;;  %vm7535_vm10 = vcmp.le.f32.partialorder %v1322_v25, 0.7853982  ;;  %v1485_v21 = vsel %vm1483_vm6, %v1484_v51, %v7495_v2  ;;  %v1548_v12 = vshrl.u32 %v9030_v20, %v9095_v55  ;;  %v9096_v51 = vld [vmem:[#allocation42_spill] sm:$0xff] }
 0x2f4   : > { %vm4897_vm3 = vcmp.lt.s32.totalorder %v4896_v16, 0  ;;  %v1550_v9 = vshll.u32 %v9030_v20, %v9092_v61  ;;  %v1408_v38 = vsub.s32 4, %v7455_v57  ;;  %v1486_v8 = vadd.s32 %v1485_v21, %v1481_v31 }
 0x2f5   : > { %v1393_v60 = vsel %vm4897_vm3, 0, %v4896_v16  ;;  %v1551_v45 = vshrl.u32 %v9031_v19, %v9095_v55  ;;  %v1537_v2 = vand.u32 8388607, %v1530_v50  ;;  %v1546_v63 = vshrl.u32 %v9029_v47, %v9095_v55 }
 0x2f6   : > { %v1394_v25 = vsub.s32 32, %v1393_v60  ;;  %v1395_v36 = vshll.u32 %v7479_v59, %v1393_v60  ;;  %v1398_v28 = vsub.s32 4294967266, %v1393_v60  ;;  %v1487_v24 = vadd.s32 536870912, %v1486_v8  ;;  %v9099_v60 = vld [vmem:[#allocation47_spill] sm:$0xff] }
 0x2f7   : > { %v1553_v32 = vshll.u32 %v9031_v19, %v9092_v61  ;;  %v1554_v52 = vshrl.u32 %v9008_v30, %v9095_v55  ;;  %vm2085_vm12 = vcmp.lt.s32.totalorder %v6851_v37, 4  ;;  %v1549_v62 = vor.u32 %v1548_v12, %v1547_v4 }
 0x2f8   : > { %v1396_v58 = vshrl.u32 %v1378_v56, %v1394_v25  ;;  %v1399_v3 = vadd.s32 127, %v1398_v28  ;;  %v1552_v59 = vor.u32 %v1551_v45, %v1550_v9  ;;  %vm1313_vm0 = vcmp.lt.s32.totalorder %v7527_v7, 2  ;;  %v9098_v9 = vld [vmem:[#allocation55_spill] sm:$0xff] }
 0x2f9   : > { %v7558_v31 = vshrl.u32 %v1487_v24, 30  ;;  %v1555_v16 = vor.u32 %v1554_v52, %v1553_v32  ;;  %vm1562_vm8 = vcmp.lt.s32.totalorder %v9096_v51, 1  ;;  %vm1564_vm1 = vcmp.lt.s32.totalorder %v9096_v51, 3  ;;  %v9100_v24 = vld [vmem:[#allocation52_spill] sm:$0xff] }
 0x2fa   : > { %vm1310_vm11 = vweird.f32 %v9063_v6  ;;  %v1397_v61 = vor.u32 %v1396_v58, %v1395_v36  ;;  %v1400_v21 = vshll.u32 %v1399_v3, 23  ;;  %v1409_v56 = vsel %vm1324_vm9, %v1408_v38, %v7455_v57 }
 0x2fb   : > { %v1538_v55 = vor.u32 8388608, %v1537_v2  ;;  %v1489_v4 = vshll.u32 %v7558_v31, 30  ;;  %vm1563_vm5 = vcmp.lt.s32.totalorder %v9096_v51, 2  ;;  %vm9097_vm2 = vcmp.lt.s32.totalorder %v9096_v51, 4 }
 0x2fc   : > { %v1567_v12 = vsel %vm9097_vm2, %v1555_v16, 2102212464  ;;  %v1576_v45 = vsel %vm1564_vm1, %v9099_v60, %v9098_v9  ;;  %v1401_v25 = vor.u32 4788187, %v1400_v21  ;;  %v1404_v36 = vcvt.s32.f32 %v1397_v61 }
 0x2fd   : > { %v1570_v28 = vsel %vm1562_vm8, %v1549_v62, %v1552_v59  ;;  %v1572_v57 = vsel %vm1564_vm1, %v1555_v16, %v9100_v24  ;;  %v1411_v38 = vsel %vm7535_vm10, 0, %v1409_v56  ;;  %v7581_v2 = vsub.s32 %v1486_v8, %v1489_v4 }
 0x2fe   : > { %v1566_v32 = vsel %vm1562_vm8, %v1546_v63, %v1549_v62  ;;  %v1574_v52 = vsel %vm1562_vm8, %v1552_v59, %v1555_v16  ;;  %v1402_v58 = vand.u32 2147483647, %v1401_v25  ;;  %v1568_v3 = vsel %vm1564_vm1, %v1552_v59, %v1567_v12  ;;  %v6006_v9 = vpop.eup %6005 }
 0x2ff   : > { %v1577_v61 = vsel %vm1563_vm5, %v1574_v52, %v1576_v45  ;;  %v1578_v21 = vshll.u32 %v1538_v55, 8  ;;  %vm1314_vm13 = vcmp.eq.s32.totalorder %v7527_v7, 0  ;;  %vm1317_vm15 = vcmp.eq.s32.totalorder %v7527_v7, 2  ;;  %v6008_v62 = vpop.eup %6007 }
 0x300   : > { %v1492_v8 = vsub.s32 0, %v7581_v2  ;;  %v1573_v63 = vsel %vm1563_vm5, %v1570_v28, %v1572_v57  ;;  %v1318_v16 = vxor.u32 2147483648, %v6006_v9  ;;  %v1405_v56 = vmul.f32 %v1404_v36, %v1402_v58 }
 0x301   : > { %v7596_v4 = vmul.u32.u64.low %v1578_v21, %v1577_v61  ;;  %v7597_v60 = vmul.u32.u64.high %v1578_v21, %v1577_v61, %v7596_v4  ;;  %v1315_v59 = vxor.u32 2147483648, %v6008_v62  ;;  %v1415_v12 = vadd.s32 3, %v1411_v38 }
 0x302   : > { %v4899_v55 = vmin.u32 %v1492_v8, %v7581_v2  ;;  %v1569_v45 = vsel %vm1563_vm5, %v1566_v32, %v1568_v3  ;;  %v1319_v25 = vsel %vm1317_vm15, %v1318_v16, %v6008_v62  ;;  %v1406_v24 = vxor.u32 2147483648, %v1405_v56  ;;  %v9101_v3 = vld [vmem:[#allocation13_spill] sm:$0xff] }
 0x303   : > { %v7602_v52 = vmul.u32.u64.low %v1578_v21, %v1573_v63  ;;  %v7603_v29 = vmul.u32.u64.high %v1578_v21, %v1573_v63, %v7602_v52  ;;  %v7609_v36 = vsel %vm2085_vm12, %v7412_v5, 920167782  ;;  %v7613_v28 = vshll.u32 %v8987_v46, %v7404_v43 }
 0x304   : > { %v1316_v57 = vsel %vm1314_vm13, %v6006_v9, %v1315_v59  ;;  %v1494_v51 = vclz %v4899_v55  ;;  %v1407_v32 = vsel %vm1324_vm9, %v1406_v24, %v1405_v56  ;;  %v1585_v58 = vmul.u32 %v1578_v21, %v1569_v45 }
 0x305   : > { %v1320_v38 = vsel %vm1313_vm0, %v1316_v57, %v1319_v25  ;;  %v1634_v61 = vand.u32 2147483647, %v9101_v3  ;;  %vm1428_vm6 = vcmp.lt.s32.totalorder %v9081_v49, 0  ;;  %v1410_v63 = vsel %vm7535_vm10, %v9072_v27, %v1407_v32 }
 0x306   : > { %v1321_v8 = vsel %vm1310_vm11, nan, %v1320_v38  ;;  %v4900_v9 = vadd.s32 4294967294, %v1494_v51  ;;  %vm1587_vm3 = vc.u32 %v7597_v60, %v7602_v52  ;;  %6009 = vcosq.f32 %v1410_v63 }
 0x307   : > { %5444 = vmatprep.mubr.msk.f32.mxu0 %vm2274_vm4, %v1321_v8  ;;  %v7631_v7 = vand.u32 3, %v1415_v12  ;;  %v1482_v21 = vadd.s32 %v7494_v22, %v7488_v53  ;;  %v1588_v62 = vadd.s32 1, %v7603_v29  ;;  %6011 = vsinq.f32 %v1410_v63  ;;  %v9105_v22 = vld [vmem:[#allocation43_spill] sm:$0xff] }
 0x308   : > { %vm4901_vm9 = vcmp.lt.s32.totalorder %v4900_v9, 0  ;;  %v1512_v6 = vsub.s32 4, %v7558_v31  ;;  %v1651_v16 = vshll.u32 %v9029_v47, %v9102_v13  ;;  %vm7641_vm10 = vcmp.le.f32.partialorder %v1426_v18, 0.7853982 }
 0x309   : > { %v1497_v4 = vsel %vm4901_vm9, 0, %v4900_v9  ;;  %v1589_v59 = vsel %vm1587_vm3, %v1588_v62, %v7603_v29  ;;  %v1641_v53 = vand.u32 8388607, %v1634_v61  ;;  %v1652_v12 = vshrl.u32 %v9030_v20, %v9105_v22 }
 0x30a   : > { %v1498_v55 = vsub.s32 32, %v1497_v4  ;;  %v1499_v45 = vshll.u32 %v7581_v2, %v1497_v4  ;;  %v1502_v25 = vsub.s32 4294967266, %v1497_v4  ;;  %v1590_v24 = vadd.s32 %v1589_v59, %v1585_v58 }
 0x30b   : > { %v1653_v57 = vor.u32 %v1652_v12, %v1651_v16  ;;  %v1654_v18 = vshll.u32 %v9030_v20, %v9102_v13  ;;  %v1655_v51 = vshrl.u32 %v9031_v19, %v9105_v22  ;;  %v1657_v29 = vshll.u32 %v9031_v19, %v9102_v13 }
 0x30c   : > { %v1500_v38 = vshrl.u32 %v1482_v21, %v1498_v55  ;;  %v1503_v32 = vadd.s32 127, %v1502_v25  ;;  %v1591_v8 = vadd.s32 536870912, %v1590_v24  ;;  %v1658_v63 = vshrl.u32 %v9008_v30, %v9105_v22 }
 0x30d   : > { %v1642_v9 = vor.u32 8388608, %v1641_v53  ;;  %v1656_v2 = vor.u32 %v1655_v51, %v1654_v18  ;;  %vm1666_vm0 = vcmp.lt.s32.totalorder %v6613_v54, 1  ;;  %vm1668_vm8 = vcmp.lt.s32.totalorder %v6613_v54, 3 }
 0x30e   : > { %v1501_v58 = vor.u32 %v1500_v38, %v1499_v45  ;;  %v1504_v62 = vshll.u32 %v1503_v32, 23  ;;  %v7661_v16 = vshrl.u32 %v1591_v8, 30  ;;  %v1659_v4 = vor.u32 %v1658_v63, %v1657_v29  ;;  %v9106_v45 = vld [vmem:[#allocation53_spill] sm:$0xff] }
 0x30f   : > { %v1513_v21 = vsel %vm1428_vm6, %v1512_v6, %v7558_v31  ;;  %v1650_v13 = vshrl.u32 %v9029_v47, %v9105_v22  ;;  %vm1667_vm1 = vcmp.lt.s32.totalorder %v6613_v54, 2  ;;  %v1674_v59 = vsel %vm1666_vm0, %v1653_v57, %v1656_v2  ;;  %v9107_v6 = vld [vmem:[#allocation57_spill] sm:$0xff] }
 0x310   : > { %v1505_v53 = vor.u32 4788187, %v1504_v62  ;;  %v1508_v12 = vcvt.s32.f32 %v1501_v58  ;;  %v1593_v55 = vshll.u32 %v7661_v16, 30  ;;  %v1680_v25 = vsel %vm1668_vm8, %v9106_v45, %v6729_v35 }
 0x311   : > { %v1671_v31 = vsel %vm1669_vm7, %v1659_v4, 2102212464  ;;  %v1676_v22 = vsel %vm1668_vm8, %v1659_v4, %v9107_v6  ;;  %v1678_v18 = vsel %vm1666_vm0, %v1656_v2, %v1659_v4  ;;  %v1682_v51 = vshll.u32 %v1642_v9, 8 }
 0x312   : > { %vm1414_vm11 = vweird.f32 %v9072_v27  ;;  %v1506_v29 = vand.u32 2147483647, %v1505_v53  ;;  %v1515_v38 = vsel %vm7641_vm10, 0, %v1513_v21  ;;  %v7686_v32 = vsub.s32 %v1590_v24, %v1593_v55 }
 0x313   : > { %vm1418_vm5 = vcmp.eq.s32.totalorder %v7631_v7, 0  ;;  %vm1421_vm7 = vcmp.eq.s32.totalorder %v7631_v7, 2  ;;  %v1670_v35 = vsel %vm1666_vm0, %v1650_v13, %v1653_v57  ;;  %v1681_v8 = vsel %vm1667_vm1, %v1678_v18, %v1680_v25  ;;  %v6010_v63 = vpop.eup %6009 }
 0x314   : > { %v1509_v9 = vmul.f32 %v1508_v12, %v1506_v29  ;;  %v1596_v58 = vsub.s32 0, %v7686_v32  ;;  %v1672_v62 = vsel %vm1668_vm8, %v1656_v2, %v1671_v31  ;;  %v1677_v24 = vsel %vm1667_vm1, %v1674_v59, %v1676_v22  ;;  %v6012_v4 = vpop.eup %6011  ;;  %v9108_v29 = vld [vmem:[#allocation19_spill] sm:$0xff] }
 0x315   : > { %v1422_v21 = vxor.u32 2147483648, %v6010_v63  ;;  %v1519_v53 = vadd.s32 3, %v1515_v38  ;;  %v7699_v55 = vmul.u32.u64.low %v1682_v51, %v1681_v8  ;;  %v7700_v45 = vmul.u32.u64.high %v1682_v51, %v1681_v8, %v7699_v55 }
 0x316   : > { %vm1417_vm2 = vcmp.lt.s32.totalorder %v7631_v7, 2  ;;  %v1419_v57 = vxor.u32 2147483648, %v6012_v4  ;;  %v1510_v13 = vxor.u32 2147483648, %v1509_v9  ;;  %v4903_v12 = vmin.u32 %v1596_v58, %v7686_v32 }
 0x317   : > { %v1423_v25 = vsel %vm1421_vm7, %v1422_v21, %v6012_v4  ;;  %v1673_v2 = vsel %vm1667_vm1, %v1670_v35, %v1672_v62  ;;  %v7708_v31 = vmul.u32.u64.low %v1682_v51, %v1677_v24  ;;  %v7709_v59 = vmul.u32.u64.high %v1682_v51, %v1677_v24, %v7708_v31 }
 0x318   : > { %v1420_v6 = vsel %vm1418_vm5, %v6010_v63, %v1419_v57  ;;  %v1511_v22 = vsel %vm1428_vm6, %v1510_v13, %v1509_v9  ;;  %v1598_v18 = vclz %v4903_v12  ;;  %v1738_v38 = vand.u32 2147483647, %v9108_v29 }
 0x319   : > { %v1424_v8 = vsel %vm1417_vm2, %v1420_v6, %v1423_v25  ;;  %v1514_v58 = vsel %vm7641_vm10, %v9081_v49, %v1511_v22  ;;  %v7720_v54 = vand.u32 3, %v1519_v53  ;;  %v1586_v35 = vadd.s32 %v7602_v52, %v7597_v60  ;;  %v9109_v60 = vld [vmem:[#allocation46_spill] sm:$0xff] }
 0x31a   : > { %v1425_v7 = vsel %vm1414_vm11, nan, %v1424_v8  ;;  %6013 = vcosq.f32 %v1514_v58  ;;  %v4904_v63 = vadd.s32 4294967294, %v1598_v18  ;;  %v1689_v62 = vmul.u32 %v1682_v51, %v1673_v2  ;;  %v9110_v51 = vld [vmem:[#allocation51_spill] sm:$0xff] }
 0x31b   : > { %5445 = vmatmul.mubr.msk.f32.gmra.mxu0 %vm2274_vm4, %v1425_v7  ;;  %6015 = vsinq.f32 %v1514_v58  ;;  %v1616_v9 = vsub.s32 4, %v7661_v16  ;;  %vm1691_vm13 = vc.u32 %v7700_v45, %v7708_v31  ;;  %v1692_v56 = vadd.s32 1, %v7709_v59 }
 0x31c   : > { %vm1532_vm15 = vcmp.lt.s32.totalorder %v9091_v17, 0  ;;  %vm4905_vm6 = vcmp.lt.s32.totalorder %v4904_v63, 0  ;;  %v1745_v27 = vand.u32 8388607, %v1738_v38  ;;  %v1755_v52 = vshll.u32 %v9029_v47, %v9109_v60 }
 0x31d   : > { %v1756_v24 = vshrl.u32 %v9030_v20, %v9110_v51  ;;  %v1601_v4 = vsel %vm4905_vm6, 0, %v4904_v63  ;;  %v1693_v21 = vsel %vm1691_vm13, %v1692_v56, %v7709_v59  ;;  %v1754_v53 = vshrl.u32 %v9029_v47, %v9110_v51 }
 0x31e   : > { %v1758_v55 = vshll.u32 %v9030_v20, %v9109_v60  ;;  %v1602_v57 = vsub.s32 32, %v1601_v4  ;;  %v1603_v13 = vshll.u32 %v7686_v32, %v1601_v4  ;;  %v1606_v12 = vsub.s32 4294967266, %v1601_v4 }
 0x31f   : > { %v1694_v25 = vadd.s32 %v1693_v21, %v1689_v62  ;;  %vm7746_vm3 = vcmp.le.f32.partialorder %v1530_v50, 0.7853982  ;;  %v1757_v6 = vor.u32 %v1756_v24, %v1755_v52  ;;  %v1759_v59 = vshrl.u32 %v9031_v19, %v9110_v51 }
 0x320   : > { %v1761_v22 = vshll.u32 %v9031_v19, %v9109_v60  ;;  %v1762_v18 = vshrl.u32 %v9008_v30, %v9110_v51  ;;  %v1604_v8 = vshrl.u32 %v1586_v35, %v1602_v57  ;;  %v1607_v32 = vadd.s32 127, %v1606_v12 }
 0x321   : > { %v1695_v58 = vadd.s32 536870912, %v1694_v25  ;;  %vm1770_vm9 = vcmp.lt.s32.totalorder %v6653_v10, 1  ;;  %vm1521_vm10 = vcmp.lt.s32.totalorder %v7720_v54, 2  ;;  %v1746_v50 = vor.u32 8388608, %v1745_v27 }
 0x322   : > { %v1760_v7 = vor.u32 %v1759_v59, %v1758_v55  ;;  %v1763_v63 = vor.u32 %v1762_v18, %v1761_v22  ;;  %vm1772_vm0 = vcmp.lt.s32.totalorder %v6653_v10, 3  ;;  %v1605_v62 = vor.u32 %v1604_v8, %v1603_v13 }
 0x323   : > { %v1608_v56 = vshll.u32 %v1607_v32, 23  ;;  %v7759_v52 = vshrl.u32 %v1695_v58, 30  ;;  %vm1771_vm8 = vcmp.lt.s32.totalorder %v6653_v10, 2  ;;  %vm1522_vm1 = vcmp.eq.s32.totalorder %v7720_v54, 0 }
 0x324   : > { %vm9113_vm11 = vcmp.lt.s32.totalorder %v6653_v10, 4  ;;  %v1778_v60 = vsel %vm1770_vm9, %v1757_v6, %v1760_v7  ;;  %v1780_v27 = vsel %vm1772_vm0, %v1763_v63, %v6756_v39  ;;  %v1612_v24 = vcvt.s32.f32 %v1605_v62 }
 0x325   : > { %v1775_v35 = vsel %vm9113_vm11, %v1763_v63, 2102212464  ;;  %v1609_v51 = vor.u32 4788187, %v1608_v56  ;;  %v1697_v4 = vshll.u32 %v7759_v52, 30  ;;  %v1782_v21 = vsel %vm1770_vm9, %v1760_v7, %v1763_v63 }
 0x326   : > { %v1617_v55 = vsel %vm1532_vm15, %v1616_v9, %v7661_v16  ;;  %v1781_v57 = vsel %vm1771_vm8, %v1778_v60, %v1780_v27  ;;  %v1784_v13 = vsel %vm1772_vm0, %v6731_v41, %v6760_v48  ;;  %v1786_v39 = vshll.u32 %v1746_v50, 8 }
 0x327   : > { %v1610_v12 = vand.u32 2147483647, %v1609_v51  ;;  %v7782_v59 = vsub.s32 %v1694_v25, %v1697_v4  ;;  %v1774_v22 = vsel %vm1770_vm9, %v1754_v53, %v1757_v6  ;;  %v1776_v18 = vsel %vm1772_vm0, %v1760_v7, %v1775_v35  ;;  %v6014_v8 = vpop.eup %6013 }
 0x328   : > { %vm1525_vm5 = vcmp.eq.s32.totalorder %v7720_v54, 2  ;;  %v1785_v16 = vsel %vm1771_vm8, %v1782_v21, %v1784_v13  ;;  %v7791_v9 = vmul.u32.u64.low %v1786_v39, %v1781_v57  ;;  %v7792_v32 = vmul.u32.u64.high %v1786_v39, %v1781_v57, %v7791_v9  ;;  %v6016_v41 = vpop.eup %6015  ;;  %v9115_v13 = vld [vmem:[#allocation21_spill] sm:$0xff] }
 0x329   : > { %v1526_v48 = vxor.u32 2147483648, %v6014_v8  ;;  %v1613_v25 = vmul.f32 %v1612_v24, %v1610_v12  ;;  %v1619_v58 = vsel %vm7746_vm3, 0, %v1617_v55  ;;  %v1700_v53 = vsub.s32 0, %v7782_v59 }
 0x32a   : > { %v1523_v6 = vxor.u32 2147483648, %v6016_v41  ;;  %v1777_v50 = vsel %vm1771_vm8, %v1774_v22, %v1776_v18  ;;  %v7800_v7 = vmul.u32.u64.low %v1786_v39, %v1785_v16  ;;  %v7801_v63 = vmul.u32.u64.high %v1786_v39, %v1785_v16, %v7800_v7 }
 0x32b   : > { %vm1518_vm7 = vweird.f32 %v9081_v49  ;;  %v1527_v62 = vsel %vm1525_vm5, %v1526_v48, %v6016_v41  ;;  %v1614_v56 = vxor.u32 2147483648, %v1613_v25  ;;  %v4907_v35 = vmin.u32 %v1700_v53, %v7782_v59 }
 0x32c   : > { %v9114_v60 = vor.u32 %v7302_v26, %v7166_v1  ;;  %v1524_v10 = vsel %vm1522_vm1, %v6014_v8, %v1523_v6  ;;  %v1623_v51 = vadd.s32 3, %v1619_v58  ;;  %v1796_v24 = vadd.s32 1, %v7792_v32  ;;  %v9116_v8 = vld [vmem:[#allocation54_spill] sm:$0xff] }
 0x32d   : > { %vm1636_vm2 = vcmp.lt.s32.totalorder %v9101_v3, 0  ;;  %v1528_v49 = vsel %vm1521_vm10, %v1524_v10, %v1527_v62  ;;  %v1615_v4 = vsel %vm1532_vm15, %v1614_v56, %v1613_v25  ;;  %v1702_v21 = vclz %v4907_v35  ;;  %v9117_v25 = vld [vmem:[#allocation58_spill] sm:$0xff] }
 0x32e   : > { %v7810_v27 = vsel %vm2085_vm12, %v9114_v60, 1326507024  ;;  %v1793_v1 = vmul.u32 %v1786_v39, %v1777_v50  ;;  %v7822_v26 = vshrl.u32 %v8987_v46, %v7506_v15  ;;  %v1529_v55 = vsel %vm1518_vm7, nan, %v1528_v49 }
 0x32f   : > { %v1618_v57 = vsel %vm7746_vm3, %v9091_v17, %v1615_v4  ;;  %v1842_v12 = vand.u32 2147483647, %v9115_v13  ;;  %v7830_v54 = vshrl.u32 %v8989_v34, %v7506_v15  ;;  %5447 = vmatprep.mubr.msk.f32.mxu0 %vm2274_vm4, %v1529_v55  ;;  %v4908_v22 = vadd.s32 4294967294, %v1702_v21 }
 0x330   : > { %6017 = vcosq.f32 %v1618_v57  ;;  %vm1795_vm13 = vc.u32 %v7801_v63, %v7791_v9  ;;  %v7835_v46 = vand.u32 3, %v1623_v51  ;;  %v1690_v2 = vadd.s32 %v7708_v31, %v7700_v45  ;;  %v9118_v51 = vld [vmem:[#allocation59_spill] sm:$0xff] }
 0x331   : > { %6019 = vsinq.f32 %v1618_v57  ;;  %v1797_v39 = vsel %vm1795_vm13, %v1796_v24, %v7792_v32  ;;  %vm4909_vm15 = vcmp.lt.s32.totalorder %v4908_v22, 0  ;;  %v1720_v18 = vsub.s32 4, %v7759_v52 }
 0x332   : > { %v1798_v34 = vadd.s32 %v1797_v39, %v1793_v1  ;;  %v1859_v16 = vshll.u32 %v9029_v47, %v9116_v8  ;;  %v1705_v41 = vsel %vm4909_vm15, 0, %v4908_v22  ;;  %v1849_v48 = vand.u32 8388607, %v1842_v12 }
 0x333   : > { %v1860_v58 = vshrl.u32 %v9030_v20, %v9117_v25  ;;  %v1862_v53 = vshll.u32 %v9030_v20, %v9116_v8  ;;  %v1706_v45 = vsub.s32 32, %v1705_v41  ;;  %v1707_v31 = vshll.u32 %v7782_v59, %v1705_v41 }
 0x334   : > { %v1710_v32 = vsub.s32 4294967266, %v1705_v41  ;;  %v1799_v6 = vadd.s32 536870912, %v1798_v34  ;;  %v1863_v7 = vshrl.u32 %v9031_v19, %v9117_v25  ;;  %v1865_v62 = vshll.u32 %v9031_v19, %v9116_v8  ;;  %v2468_v41 = vld [vmem:[#allocation2 + $0x70] sm:$0xff] }
 0x335   : > { %v1861_v50 = vor.u32 %v1860_v58, %v1859_v16  ;;  %v1866_v56 = vshrl.u32 %v9008_v30, %v9117_v25  ;;  %v1708_v35 = vshrl.u32 %v1690_v2, %v1706_v45  ;;  %vm1874_vm6 = vcmp.lt.s32.totalorder %v9118_v51, 1  ;;  %v9119_v2 = vld [vmem:[#allocation64_spill] sm:$0xff]  ;;  %v2469_v16 = vld [vmem:[#allocation2 + $0x78] sm:$0xff] }
 0x336   : > { %v1711_v60 = vadd.s32 127, %v1710_v32  ;;  %v7856_v10 = vshrl.u32 %v1799_v6, 30  ;;  %v1721_v59 = vsel %vm1636_vm2, %v1720_v18, %v7759_v52  ;;  %v1864_v24 = vor.u32 %v1863_v7, %v1862_v53  ;;  %5459 = vmatprep.subr.mxu1 %v2469_v16  ;;  %v9123_v6 = vld [vmem:[#allocation65_spill] sm:$0xff]  ;;  %v9124_v7 = vld [vmem:[#allocation62_spill] sm:$0xff] }
 0x337   : > { %v1867_v49 = vor.u32 %v1866_v56, %v1865_v62  ;;  %vm1876_vm3 = vcmp.lt.s32.totalorder %v9118_v51, 3  ;;  %v1709_v4 = vor.u32 %v1708_v35, %v1707_v31  ;;  %v1858_v55 = vshrl.u32 %v9029_v47, %v9117_v25  ;;  %5460 = vmatpush3.msra.mxu1 %v2469_v16 }
 0x338   : > { %v1712_v21 = vshll.u32 %v1711_v60, 23  ;;  %v1801_v1 = vshll.u32 %v7856_v10, 30  ;;  %v1850_v57 = vor.u32 8388608, %v1849_v48  ;;  %vm1875_vm9 = vcmp.lt.s32.totalorder %v9118_v51, 2  ;;  %5461 = vmatprep.subr.mxu1 %v2468_v41 }
 0x339   : > { %v1882_v22 = vsel %vm1874_vm6, %v1861_v50, %v1864_v24  ;;  %v1884_v52 = vsel %vm1876_vm3, %v1867_v49, %v9119_v2  ;;  %vm1622_vm10 = vweird.f32 %v9091_v17  ;;  %v1716_v18 = vcvt.s32.f32 %v1709_v4  ;;  %5462 = vmatpush3.msra.mxu1 %v2468_v41 }
 0x33a   : > { %v1713_v39 = vor.u32 4788187, %v1712_v21  ;;  %v7873_v8 = vsub.s32 %v1798_v34, %v1801_v1  ;;  %vm1626_vm0 = vcmp.eq.s32.totalorder %v7835_v46, 0  ;;  %vm1629_vm8 = vcmp.eq.s32.totalorder %v7835_v46, 2 }
 0x33b   : > { %vm7879_vm1 = vcmp.le.f32.partialorder %v1634_v61, 0.7853982  ;;  %vm9122_vm11 = vcmp.lt.s32.totalorder %v9118_v51, 4  ;;  %v1885_v45 = vsel %vm1875_vm9, %v1882_v22, %v1884_v52  ;;  %v1878_v61 = vsel %vm1874_vm6, %v1858_v55, %v1861_v50 }
 0x33c   : > { %v1879_v25 = vsel %vm9122_vm11, %v1867_v49, 2102212464  ;;  %v1714_v58 = vand.u32 2147483647, %v1713_v39  ;;  %v1723_v34 = vsel %vm7879_vm1, 0, %v1721_v59  ;;  %v1804_v53 = vsub.s32 0, %v7873_v8 }
 0x33d   : > { %v6018_v31 = vpop.eup %6017  ;;  %v1886_v32 = vsel %vm1874_vm6, %v1864_v24, %v1867_v49  ;;  %v1888_v62 = vsel %vm1876_vm3, %v9124_v7, %v9123_v6  ;;  %v1890_v56 = vshll.u32 %v1850_v57, 8  ;;  %v1880_v21 = vsel %vm1876_vm3, %v1864_v24, %v1879_v25  ;;  %v9126_v7 = vld [vmem:[#allocation61_spill] sm:$0xff] }
 0x33e   : > { %v6020_v35 = vpop.eup %6019  ;;  %v1630_v60 = vxor.u32 2147483648, %v6018_v31  ;;  %v1717_v59 = vmul.f32 %v1716_v18, %v1714_v58  ;;  %v4911_v4 = vmin.u32 %v1804_v53, %v7873_v8  ;;  %vm1625_vm5 = vcmp.lt.s32.totalorder %v7835_v46, 2  ;;  %v9125_v58 = vld [vmem:[#allocation34_spill] sm:$0xff] }
 0x33f   : > { %v1627_v50 = vxor.u32 2147483648, %v6020_v35  ;;  %v7902_v49 = vmul.u32.u64.low %v1890_v56, %v1885_v45  ;;  %v7903_v1 = vmul.u32.u64.high %v1890_v56, %v1885_v45, %v7902_v49  ;;  %v1889_v2 = vsel %vm1875_vm9, %v1886_v32, %v1888_v62 }
 0x340   : > { %v1631_v55 = vsel %vm1629_vm8, %v1630_v60, %v6020_v35  ;;  %v1718_v57 = vxor.u32 2147483648, %v1717_v59  ;;  %v1806_v22 = vclz %v4911_v4  ;;  %v7912_v52 = vor.u32 %v7822_v26, %v7512_v0 }
 0x341   : > { %v1628_v24 = vsel %vm1626_vm0, %v6018_v31, %v1627_v50  ;;  %v1727_v39 = vadd.s32 3, %v1723_v34  ;;  %v1881_v18 = vsel %vm1875_vm9, %v1878_v61, %v1880_v21  ;;  %v1946_v53 = vand.u32 2147483647, %v9125_v58 }
 0x342   : > { %v1632_v16 = vsel %vm1625_vm5, %v1628_v24, %v1631_v55  ;;  %v1719_v41 = vsel %vm1636_vm2, %v1718_v57, %v1717_v59  ;;  %v4912_v25 = vadd.s32 4294967294, %v1806_v22  ;;  %vm1740_vm7 = vcmp.lt.s32.totalorder %v9108_v29, 0 }
 0x343   : > { %v1633_v0 = vsel %vm1622_vm10, nan, %v1632_v16  ;;  %v1722_v26 = vsel %vm7879_vm1, %v9101_v3, %v1719_v41  ;;  %v7927_v46 = vmul.u32.u64.low %v1890_v56, %v1889_v2  ;;  %v7928_v34 = vmul.u32.u64.high %v1890_v56, %v1889_v2, %v7927_v46 }
 0x344   : > { %5448 = vmatmul.mubr.msk.f32.gmra.mxu0 %vm2274_vm4, %v1633_v0  ;;  %6021 = vcosq.f32 %v1722_v26  ;;  %v1794_v51 = vadd.s32 %v7791_v9, %v7801_v63  ;;  %vm4913_vm2 = vcmp.lt.s32.totalorder %v4912_v25, 0  ;;  %v1900_v45 = vadd.s32 1, %v7903_v1  ;;  %v9127_v63 = vld [vmem:[#allocation63_spill] sm:$0xff] }
 0x345   : > { %6023 = vsinq.f32 %v1722_v26  ;;  %v1809_v31 = vsel %vm4913_vm2, 0, %v4912_v25  ;;  %v1824_v17 = vsub.s32 4, %v7856_v10  ;;  %v1897_v61 = vmul.u32 %v1890_v56, %v1881_v18 }
 0x346   : > { %v1810_v32 = vsub.s32 32, %v1809_v31  ;;  %v1811_v48 = vshll.u32 %v7873_v8, %v1809_v31  ;;  %v1814_v6 = vsub.s32 4294967266, %v1809_v31  ;;  %v1963_v62 = vshll.u32 %v9029_v47, %v9126_v7 }
 0x347   : > { %vm1899_vm13 = vc.u32 %v7928_v34, %v7902_v49  ;;  %v1953_v9 = vand.u32 8388607, %v1946_v53  ;;  %v1964_v35 = vshrl.u32 %v9030_v20, %v9127_v63  ;;  %v1966_v60 = vshll.u32 %v9030_v20, %v9126_v7 }
 0x348   : > { %v1812_v56 = vshrl.u32 %v1794_v51, %v1810_v32  ;;  %v1815_v59 = vadd.s32 127, %v1814_v6  ;;  %v1901_v8 = vsel %vm1899_vm13, %v1900_v45, %v7903_v1  ;;  %v1967_v4 = vshrl.u32 %v9031_v19, %v9127_v63 }
 0x349   : > { %v1902_v21 = vadd.s32 %v1901_v8, %v1897_v61  ;;  %v1962_v50 = vshrl.u32 %v9029_v47, %v9127_v63  ;;  %v1969_v55 = vshll.u32 %v9031_v19, %v9126_v7  ;;  %v1970_v57 = vshrl.u32 %v9008_v30, %v9127_v63 }
 0x34a   : > { %v1813_v22 = vor.u32 %v1812_v56, %v1811_v48  ;;  %v1816_v2 = vshll.u32 %v1815_v59, 23  ;;  %v1965_v24 = vor.u32 %v1964_v35, %v1963_v62  ;;  %v1968_v18 = vor.u32 %v1967_v4, %v1966_v60 }
 0x34b   : > { %v1903_v16 = vadd.s32 536870912, %v1902_v21  ;;  %v1971_v41 = vor.u32 %v1970_v57, %v1969_v55  ;;  %vm1978_vm15 = vcmp.lt.s32.totalorder %v6783_v11, 1  ;;  %vm1980_vm6 = vcmp.lt.s32.totalorder %v6783_v11, 3 }
 0x34c   : > { %vm1726_vm3 = vweird.f32 %v9101_v3  ;;  %v1817_v1 = vor.u32 4788187, %v1816_v2  ;;  %v1820_v25 = vcvt.s32.f32 %v1813_v22  ;;  %v1825_v0 = vsel %vm1740_vm7, %v1824_v17, %v7856_v10 }
 0x34d   : > { %v1954_v26 = vor.u32 8388608, %v1953_v9  ;;  %v1728_v46 = vand.u32 3, %v1727_v39  ;;  %vm7963_vm9 = vcmp.le.f32.partialorder %v1738_v38, 0.7853982  ;;  %v7967_v45 = vshrl.u32 %v1903_v16, 30  ;;  %v9130_v16 = vld [vmem:[#allocation56_spill] sm:$0xff] }
 0x34e   : > { %v1983_v31 = vsel %vm1981_vm14, %v1971_v41, 2102212464  ;;  %v1818_v61 = vand.u32 2147483647, %v1817_v1  ;;  %vm1979_vm10 = vcmp.lt.s32.totalorder %v6783_v11, 2  ;;  %v1990_v32 = vsel %vm1978_vm15, %v1968_v18, %v1971_v41  ;;  %v8009_v1 = vpop.f32.mrf.mxu1 }
 0x34f   : > { %v1992_v10 = vsel %vm1980_vm6, %v6824_v23, %v6977_v14  ;;  %v1827_v38 = vsel %vm7963_vm9, 0, %v1825_v0  ;;  %v1905_v39 = vshll.u32 %v7967_v45, 30  ;;  %v1982_v17 = vsel %vm1978_vm15, %v1962_v50, %v1965_v24 }
 0x350   : > { %v1986_v48 = vsel %vm1978_vm15, %v1965_v24, %v1968_v18  ;;  %v1821_v6 = vmul.f32 %v1820_v25, %v1818_v61  ;;  %v1984_v7 = vsel %vm1980_vm6, %v1968_v18, %v1983_v31  ;;  %v1988_v62 = vsel %vm1980_vm6, %v1971_v41, %v6872_v42 }
 0x351   : > { %v1994_v23 = vshll.u32 %v1954_v26, 8  ;;  %v6022_v14 = vpop.eup %6021  ;;  %vm1729_vm14 = vcmp.lt.s32.totalorder %v1728_v46, 2  ;;  %vm1733_vm0 = vcmp.eq.s32.totalorder %v1728_v46, 2  ;;  %v7990_v9 = vsub.s32 %v1902_v21, %v1905_v39 }
 0x352   : > { %v1993_v63 = vsel %vm1979_vm10, %v1990_v32, %v1992_v10  ;;  %v6024_v35 = vpop.eup %6023  ;;  %vm1730_vm8 = vcmp.eq.s32.totalorder %v1728_v46, 0  ;;  %v1734_v60 = vxor.u32 2147483648, %v6022_v14  ;;  %v1822_v56 = vxor.u32 2147483648, %v1821_v6 }
 0x353   : > { %v1831_v59 = vadd.s32 3, %v1827_v38  ;;  %v1731_v8 = vxor.u32 2147483648, %v6024_v35  ;;  %v1908_v4 = vsub.s32 0, %v7990_v9  ;;  %v1985_v42 = vsel %vm1979_vm10, %v1982_v17, %v1984_v7  ;;  %v8033_v17 = vpop.f32.mrf.mxu1 }
 0x354   : > { %v1989_v50 = vsel %vm1979_vm10, %v1986_v48, %v1988_v62  ;;  %v1735_v55 = vsel %vm1733_vm0, %v1734_v60, %v6024_v35  ;;  %v1823_v21 = vsel %vm1740_vm7, %v1822_v56, %v1821_v6  ;;  %v2050_v41 = vand.u32 2147483647, %v9130_v16 }
 0x355   : > { %v8001_v57 = vmul.u32.u64.low %v1994_v23, %v1993_v63  ;;  %v8002_v22 = vmul.u32.u64.high %v1994_v23, %v1993_v63, %v8001_v57  ;;  %v1732_v2 = vsel %vm1730_vm8, %v6022_v14, %v1731_v8  ;;  %v1826_v24 = vsel %vm7963_vm9, %v9108_v29, %v1823_v21  ;;  %v8053_v8 = vpop.f32.mrf.mxu1 }
 0x356   : > { %v4915_v18 = vmin.u32 %v1908_v4, %v7990_v9  ;;  %v1736_v11 = vsel %vm1729_vm14, %v1732_v2, %v1735_v55  ;;  %6025 = vcosq.f32 %v1826_v24  ;;  %v2067_v51 = vshll.u32 %v9029_v47, %v6864_v33 }
 0x357   : > { %v8012_v25 = vmul.u32.u64.low %v1994_v23, %v1989_v50  ;;  %v8013_v0 = vmul.u32.u64.high %v1994_v23, %v1989_v50, %v8012_v25  ;;  %v1737_v26 = vsel %vm1726_vm3, nan, %v1736_v11  ;;  %6027 = vsinq.f32 %v1826_v24 }
 0x358   : > { %v1910_v31 = vclz %v4915_v18  ;;  %v2185_v61 = vor.u32 %v7830_v54, %v7613_v28  ;;  %5450 = vmatprep.mubr.msk.f32.mxu0 %vm2274_vm4, %v1737_v26  ;;  %v8023_v46 = vand.u32 3, %v1831_v59  ;;  %v2001_v32 = vmul.u32 %v1994_v23, %v1985_v42 }
 0x359   : > { %vm2003_vm1 = vc.u32 %v8002_v22, %v8012_v25  ;;  %v2057_v3 = vand.u32 8388607, %v2050_v41  ;;  %v2068_v38 = vshrl.u32 %v9030_v20, %v6991_v40  ;;  %v2070_v39 = vshll.u32 %v9030_v20, %v6864_v33 }
 0x35a   : > { %v4916_v10 = vadd.s32 4294967294, %v1910_v31  ;;  %v2004_v48 = vadd.s32 1, %v8013_v0  ;;  %v2071_v6 = vshrl.u32 %v9031_v19, %v6991_v40  ;;  %v2073_v7 = vshll.u32 %v9031_v19, %v6864_v33  ;;  %v8075_v31 = vpop.f32.mrf.mxu1 }
 0x35b   : > { %v2074_v62 = vshrl.u32 %v9008_v30, %v6991_v40  ;;  %v1898_v23 = vadd.s32 %v7902_v49, %v7928_v34  ;;  %v2069_v14 = vor.u32 %v2068_v38, %v2067_v51  ;;  %vm2082_vm5 = vcmp.lt.s32.totalorder %v6851_v37, 1 }
 0x35c   : > { %vm4917_vm11 = vcmp.lt.s32.totalorder %v4916_v10, 0  ;;  %vm1844_vm7 = vcmp.lt.s32.totalorder %v9115_v13, 0  ;;  %vm1834_vm2 = vcmp.eq.s32.totalorder %v8023_v46, 0  ;;  %v2005_v33 = vsel %vm2003_vm1, %v2004_v48, %v8013_v0 }
 0x35d   : > { %v1913_v63 = vsel %vm4917_vm11, 0, %v4916_v10  ;;  %v2072_v35 = vor.u32 %v2071_v6, %v2070_v39  ;;  %v2075_v60 = vor.u32 %v2074_v62, %v2073_v7  ;;  %vm1833_vm13 = vcmp.lt.s32.totalorder %v8023_v46, 2 }
 0x35e   : > { %v1914_v56 = vsub.s32 32, %v1913_v63  ;;  %v1915_v49 = vshll.u32 %v7990_v9, %v1913_v63  ;;  %v1918_v34 = vsub.s32 4294967266, %v1913_v63  ;;  %v2006_v59 = vadd.s32 %v2005_v33, %v2001_v32 }
 0x35f   : > { %vm1830_vm15 = vweird.f32 %v9108_v29  ;;  %v2058_v4 = vor.u32 8388608, %v2057_v3  ;;  %v2066_v42 = vshrl.u32 %v9029_v47, %v6991_v40  ;;  %vm2083_vm6 = vcmp.lt.s32.totalorder %v6851_v37, 2 }
 0x360   : > { %vm2084_vm3 = vcmp.lt.s32.totalorder %v6851_v37, 3  ;;  %vm2189_vm9 = vcmp.lt.s32.totalorder %v7390_v44, 4  ;;  %v1916_v50 = vshrl.u32 %v1898_v23, %v1914_v56  ;;  %v1919_v55 = vadd.s32 127, %v1918_v34 }
 0x361   : > { %v1928_v9 = vsub.s32 4, %v7967_v45  ;;  %v2007_v21 = vadd.s32 536870912, %v2006_v59  ;;  %v2087_v57 = vsel %vm2085_vm12, %v2075_v60, 2102212464  ;;  %v2090_v2 = vsel %vm2082_vm5, %v2069_v14, %v2072_v35 }
 0x362   : > { %v2092_v40 = vsel %vm2084_vm3, %v2075_v60, %v7609_v36  ;;  %v2094_v24 = vsel %vm2082_vm5, %v2072_v35, %v2075_v60  ;;  %v1917_v18 = vor.u32 %v1916_v50, %v1915_v49  ;;  %v1920_v11 = vshll.u32 %v1919_v55, 23  ;;  %v8098_v60 = vpop.f32.mrf.mxu1 }
 0x363   : > { %v8071_v0 = vshrl.u32 %v2007_v21, 30  ;;  %v2093_v26 = vsel %vm2083_vm6, %v2090_v2, %v2092_v40  ;;  %vm1837_vm12 = vcmp.eq.s32.totalorder %v8023_v46, 2  ;;  %v2086_v51 = vsel %vm2082_vm5, %v2066_v42, %v2069_v14  ;;  %v6026_v10 = vpop.eup %6025 }
 0x364   : > { %v2096_v36 = vsel %vm2084_vm3, %v7412_v5, %v7810_v27  ;;  %v2098_v32 = vshll.u32 %v2058_v4, 8  ;;  %v1921_v3 = vor.u32 4788187, %v1920_v11  ;;  %v1924_v38 = vcvt.s32.f32 %v1917_v18  ;;  %v6028_v6 = vpop.eup %6027 }
 0x365   : > { %v2009_v39 = vshll.u32 %v8071_v0, 30  ;;  %v2088_v48 = vsel %vm2084_vm3, %v2072_v35, %v2087_v57  ;;  %v1838_v7 = vxor.u32 2147483648, %v6026_v10  ;;  %v2097_v62 = vsel %vm2083_vm6, %v2094_v24, %v2096_v36  ;;  %v8125_v24 = vpop.f32.mrf.mxu1 }
 0x366   : > { %v8089_v23 = vmul.u32.u64.low %v2098_v32, %v2093_v26  ;;  %v8090_v14 = vmul.u32.u64.high %v2098_v32, %v2093_v26, %v8089_v23  ;;  %v1835_v63 = vxor.u32 2147483648, %v6028_v6  ;;  %v1922_v5 = vand.u32 2147483647, %v1921_v3 }
 0x367   : > { %v1929_v27 = vsel %vm1844_vm7, %v1928_v9, %v7967_v45  ;;  %v8096_v33 = vsub.s32 %v2006_v59, %v2009_v39  ;;  %v1839_v35 = vsel %vm1837_vm12, %v1838_v7, %v6028_v6  ;;  %v2089_v56 = vsel %vm2083_vm6, %v2086_v51, %v2088_v48  ;;  %v9133_v9 = vld [vmem:[#allocation60_spill] sm:$0xff]  ;;  %v8150_v3 = vpop.f32.mrf.mxu1 }
 0x368   : > { %v8104_v49 = vmul.u32.u64.low %v2098_v32, %v2097_v62  ;;  %v8105_v34 = vmul.u32.u64.high %v2098_v32, %v2097_v62, %v8104_v49  ;;  %v1836_v4 = vsel %vm1834_vm2, %v6026_v10, %v1835_v63  ;;  %vm8111_vm10 = vcmp.le.f32.partialorder %v1842_v12, 0.7853982 }
 0x369   : > { %v1925_v59 = vmul.f32 %v1924_v38, %v1922_v5  ;;  %v2012_v42 = vsub.s32 0, %v8096_v33  ;;  %v1840_v50 = vsel %vm1833_vm13, %v1836_v4, %v1839_v35  ;;  %v1931_v37 = vsel %vm8111_vm10, 0, %v1929_v27  ;;  %v8166_v35 = vpop.f32.mrf.mxu1 }
 0x36a   : > { %v2108_v55 = vadd.s32 1, %v8090_v14  ;;  %v2154_v21 = vand.u32 2147483647, %v9133_v9  ;;  %v1841_v57 = vsel %vm1830_vm15, nan, %v1840_v50  ;;  %v2105_v40 = vmul.u32 %v2098_v32, %v2089_v56 }
 0x36b   : > { %v1926_v12 = vxor.u32 2147483648, %v1925_v59  ;;  %v4919_v2 = vmin.u32 %v2012_v42, %v8096_v33  ;;  %v2195_v46 = vsel %vm2189_vm9, %v7912_v52, 920167782  ;;  %5451 = vmatmul.mubr.msk.f32.gmra.mxu0 %vm2274_vm4, %v1841_v57  ;;  %vm2107_vm14 = vc.u32 %v8105_v34, %v8089_v23 }
 0x36c   : > { %v2199_v29 = vsel %vm2189_vm9, %v2185_v61, 1326507024  ;;  %v1935_v11 = vadd.s32 3, %v1931_v37  ;;  %v2002_v36 = vadd.s32 %v8012_v25, %v8002_v22  ;;  %v2109_v32 = vsel %vm2107_vm14, %v2108_v55, %v8090_v14  ;;  %v8183_v55 = vpop.f32.mrf.mxu1 }
 0x36d   : > { %v1927_v18 = vsel %vm1844_vm7, %v1926_v12, %v1925_v59  ;;  %v2014_v26 = vclz %v4919_v2  ;;  %v2161_v28 = vand.u32 8388607, %v2154_v21  ;;  %v2110_v61 = vadd.s32 %v2109_v32, %v2105_v40 }
 0x36e   : > { %v1930_v51 = vsel %vm8111_vm10, %v9115_v13, %v1927_v18  ;;  %v2171_v10 = vshll.u32 %v9029_v47, %v7404_v43  ;;  %v2172_v38 = vshrl.u32 %v9030_v20, %v7506_v15  ;;  %v2174_v22 = vshll.u32 %v9030_v20, %v7404_v43  ;;  %v2429_v32 = vpop.f32.mrf.mxu1 }
 0x36f   : > { %6029 = vcosq.f32 %v1930_v51  ;;  %v4920_v54 = vadd.s32 4294967294, %v2014_v26  ;;  %v2175_v25 = vshrl.u32 %v9031_v19, %v7506_v15  ;;  %v2111_v39 = vadd.s32 536870912, %v2110_v61 }
 0x370   : > { %6031 = vsinq.f32 %v1930_v51  ;;  %v2177_v48 = vshll.u32 %v9031_v19, %v7404_v43  ;;  %v2178_v6 = vshrl.u32 %v9008_v30, %v7506_v15  ;;  %v2173_v62 = vor.u32 %v2172_v38, %v2171_v10 }
 0x371   : > { %vm4921_vm0 = vcmp.lt.s32.totalorder %v4920_v54, 0  ;;  %v2176_v14 = vor.u32 %v2175_v25, %v2174_v22  ;;  %vm2186_vm8 = vcmp.lt.s32.totalorder %v7390_v44, 1  ;;  %v8164_v27 = vshrl.u32 %v2111_v39, 30 }
 0x372   : > { %v2017_v7 = vsel %vm4921_vm0, 0, %v4920_v54  ;;  %v1936_v56 = vand.u32 3, %v1935_v11  ;;  %v2170_v19 = vshrl.u32 %v9029_v47, %v7506_v15  ;;  %v2179_v43 = vor.u32 %v2178_v6, %v2177_v48 }
 0x373   : > { %v2018_v63 = vsub.s32 32, %v2017_v7  ;;  %v2019_v5 = vshll.u32 %v8096_v33, %v2017_v7  ;;  %v2022_v20 = vsub.s32 4294967266, %v2017_v7  ;;  %vm2188_vm1 = vcmp.lt.s32.totalorder %v7390_v44, 3 }
 0x374   : > { %v2113_v4 = vshll.u32 %v8164_v27, 30  ;;  %v2162_v45 = vor.u32 8388608, %v2161_v28  ;;  %vm2187_vm11 = vcmp.lt.s32.totalorder %v7390_v44, 2  ;;  %v2191_v33 = vsel %vm2189_vm9, %v2179_v43, 2102212464 }
 0x375   : > { %v2020_v30 = vshrl.u32 %v2002_v36, %v2018_v63  ;;  %v2023_v49 = vadd.s32 127, %v2022_v20  ;;  %v2194_v59 = vsel %vm2186_vm8, %v2173_v62, %v2176_v14  ;;  %v2196_v42 = vsel %vm2188_vm1, %v2179_v43, %v2195_v46  ;;  %v5426_v63 = vpop.f32.mrf.mxu1 }
 0x376   : > { %v8179_v50 = vsub.s32 %v2110_v61, %v2113_v4  ;;  %v2198_v37 = vsel %vm2186_vm8, %v2176_v14, %v2179_v43  ;;  %vm1948_vm5 = vcmp.lt.s32.totalorder %v9125_v58, 0  ;;  %vm1938_vm7 = vcmp.eq.s32.totalorder %v1936_v56, 0 }
 0x377   : > { %v2021_v47 = vor.u32 %v2020_v30, %v2019_v5  ;;  %v2024_v15 = vshll.u32 %v2023_v49, 23  ;;  %vm1941_vm2 = vcmp.eq.s32.totalorder %v1936_v56, 2  ;;  %v2200_v57 = vsel %vm2188_vm1, %v7912_v52, %v2199_v29  ;;  %v2439_v4 = vpop.f32.mrf.mxu1 }
 0x378   : > { %v2116_v40 = vsub.s32 0, %v8179_v50  ;;  %v2197_v46 = vsel %vm2187_vm11, %v2194_v59, %v2196_v42  ;;  %v2190_v18 = vsel %vm2186_vm8, %v2170_v19, %v2173_v62  ;;  %v2192_v11 = vsel %vm2188_vm1, %v2176_v14, %v2191_v33 }
 0x379   : > { %v2025_v12 = vor.u32 4788187, %v2024_v15  ;;  %v2028_v2 = vcvt.s32.f32 %v2021_v47  ;;  %v2201_v26 = vsel %vm2187_vm11, %v2198_v37, %v2200_v57  ;;  %v2202_v51 = vshll.u32 %v2162_v45, 8  ;;  %v5429_v15 = vpop.f32.mrf.mxu1 }
 0x37a   : > { %v2032_v52 = vsub.s32 4, %v8071_v0  ;;  %v4923_v29 = vmin.u32 %v2116_v40, %v8179_v50  ;;  %vm2664_vm13 = vcmask 130048   ;;  %v2193_v6 = vsel %vm2187_vm11, %v2190_v18, %v2192_v11 }
 0x37b   : > { %v2026_v36 = vand.u32 2147483647, %v2025_v12  ;;  %v8200_v54 = vmul.u32.u64.low %v2202_v51, %v2201_v26  ;;  %v8201_v61 = vmul.u32.u64.high %v2202_v51, %v2201_v26, %v8200_v54  ;;  %5463 = vmatprep.mubr.msk.f32.mxu1 %vm2664_vm13, %v8033_v17  ;;  %vm1934_vm15 = vweird.f32 %v9115_v13  ;;  %v2449_v40 = vpop.f32.mrf.mxu1 }
 0x37c   : > { %v6030_v28 = vpop.eup %6029  ;;  %v8203_v10 = vmul.u32.u64.low %v2202_v51, %v2197_v46  ;;  %v8204_v38 = vmul.u32.u64.high %v2202_v51, %v2197_v46, %v8203_v10  ;;  %v2118_v48 = vclz %v4923_v29  ;;  %5464 = vmatmul.mubr.msk.f32.vlgmr.msra.gmra.mxu1 %vm2664_vm13, %v8009_v1  ;;  %vm1937_vm6 = vcmp.lt.s32.totalorder %v1936_v56, 2 }
 0x37d   : > { %v6032_v22 = vpop.eup %6031  ;;  %v1942_v25 = vxor.u32 2147483648, %v6030_v28  ;;  %v2029_v39 = vmul.f32 %v2028_v2, %v2026_v36  ;;  %vm8216_vm3 = vcmp.le.f32.partialorder %v1946_v53, 0.7853982  ;;  %5466 = vmatprep.mubr.msk.f32.mxu1 %vm2664_vm13, %v8075_v31  ;;  %v2033_v1 = vsel %vm1948_vm5, %v2032_v52, %v8071_v0  ;;  %v5432_v36 = vpop.f32.mrf.mxu1 }
 0x37e   : > { %v1939_v7 = vxor.u32 2147483648, %v6032_v22  ;;  %v4924_v14 = vadd.s32 4294967294, %v2118_v48  ;;  %v2209_v20 = vmul.u32 %v2202_v51, %v2193_v6  ;;  %vm2211_vm9 = vc.u32 %v8201_v61, %v8203_v10 }
 0x37f   : > { %v1943_v17 = vsel %vm1941_vm2, %v1942_v25, %v6032_v22  ;;  %v2030_v44 = vxor.u32 2147483648, %v2029_v39  ;;  %v2212_v53 = vadd.s32 1, %v8204_v38  ;;  %v2106_v43 = vadd.s32 %v8089_v23, %v8105_v34 }
 0x380   : > { %v1940_v5 = vsel %vm1938_vm7, %v6030_v28, %v1939_v7  ;;  %vm4925_vm12 = vcmp.lt.s32.totalorder %v4924_v14, 0  ;;  %5467 = vmatmul.mubr.msk.f32.gmra.mxu1 %vm2664_vm13, %v8053_v8  ;;  %v2035_v45 = vsel %vm8216_vm3, 0, %v2033_v1  ;;  %vm2052_vm10 = vcmp.lt.s32.totalorder %v9130_v16, 0 }
 0x381   : > { %v1944_v19 = vsel %vm1937_vm6, %v1940_v5, %v1943_v17  ;;  %v2031_v31 = vsel %vm1948_vm5, %v2030_v44, %v2029_v39  ;;  %v2121_v30 = vsel %vm4925_vm12, 0, %v4924_v14  ;;  %v2213_v49 = vsel %vm2211_vm9, %v2212_v53, %v8204_v38  ;;  %5469 = vmatprep.mubr.msk.f32.mxu1 %vm2664_vm13, %v8125_v24  ;;  %v2459_v39 = vpop.f32.mrf.mxu1 }
 0x382   : > { %v1945_v0 = vsel %vm1934_vm15, nan, %v1944_v19  ;;  %v2034_v56 = vsel %vm8216_vm3, %v9125_v58, %v2031_v31  ;;  %v2122_v23 = vsub.s32 32, %v2121_v30  ;;  %v2123_v34 = vshll.u32 %v8179_v50, %v2121_v30 }
 0x383   : > { %5453 = vmatprep.mubr.msk.f32.mxu0 %vm2274_vm4, %v1945_v0  ;;  %6033 = vcosq.f32 %v2034_v56  ;;  %v2126_v8 = vsub.s32 4294967266, %v2121_v30  ;;  %v2214_v13 = vadd.s32 %v2213_v49, %v2209_v20  ;;  %v2039_v50 = vadd.s32 3, %v2035_v45 }
 0x384   : > { %6035 = vsinq.f32 %v2034_v56  ;;  %v2124_v33 = vshrl.u32 %v2106_v43, %v2122_v23  ;;  %5470 = vmatmul.mubr.msk.f32.gmra.mxu1 %vm2664_vm13, %v8098_v60  ;;  %v2136_v11 = vsub.s32 4, %v8164_v27  ;;  %vm8265_vm14 = vcmp.le.f32.partialorder %v2050_v41, 0.7853982 }
 0x385   : > { %v2127_v59 = vadd.s32 127, %v2126_v8  ;;  %v2215_v42 = vadd.s32 536870912, %v2214_v13  ;;  %5472 = vmatprep.mubr.msk.f32.mxu1 %vm2664_vm13, %v8166_v35  ;;  %v2040_v46 = vand.u32 3, %v2039_v50  ;;  %vm2038_vm11 = vweird.f32 %v9125_v58 }
 0x386   : > { %v2125_v24 = vor.u32 %v2124_v33, %v2123_v34  ;;  %v2137_v41 = vsel %vm2052_vm10, %v2136_v11, %v8164_v27  ;;  %v2210_v17 = vadd.s32 %v8203_v10, %v8201_v61  ;;  %vm2156_vm6 = vcmp.lt.s32.totalorder %v9133_v9, 0 }
 0x387   : > { %v2128_v47 = vshll.u32 %v2127_v59, 23  ;;  %v8252_v37 = vshrl.u32 %v2215_v42, 30  ;;  %vm2045_vm0 = vcmp.eq.s32.totalorder %v2040_v46, 2  ;;  %vm2041_vm8 = vcmp.lt.s32.totalorder %v2040_v46, 2 }
 0x388   : > { %v2132_v12 = vcvt.s32.f32 %v2125_v24  ;;  %5473 = vmatmul.mubr.msk.f32.gmra.mxu1 %vm2664_vm13, %v8150_v3  ;;  %vm2042_vm1 = vcmp.eq.s32.totalorder %v2040_v46, 0  ;;  %v2139_v27 = vsel %vm8265_vm14, 0, %v2137_v41  ;;  %vm2142_vm3 = vweird.f32 %v9130_v16  ;;  %v2859_v46 = vld [vmem:[#allocation2 + $0x1d0] sm:$0xff] }
 0x389   : > { %v2129_v57 = vor.u32 4788187, %v2128_v47  ;;  %v2217_v2 = vshll.u32 %v8252_v37, 30  ;;  %5475 = vmatprep.mubr.msk.f32.mxu1 %vm2664_vm13, %v2429_v32  ;;  %v2143_v44 = vadd.s32 3, %v2139_v27  ;;  %v2240_v8 = vsub.s32 4, %v8252_v37  ;;  %v3021_v41 = vld [vmem:[#allocation2 + $0x110] sm:$0xff] }
 0x38a   : > { %vm2155_vm9 = vcmp.le.f32.partialorder %v2154_v21, 0.7853982 }
 0x38b   : > { %v2130_v60 = vand.u32 2147483647, %v2129_v57  ;;  %v2218_v18 = vsub.s32 %v2214_v13, %v2217_v2  ;;  %v2144_v53 = vand.u32 3, %v2143_v44  ;;  %v2241_v42 = vsel %vm2156_vm6, %v2240_v8, %v8252_v37 }
 0x38c   : > { %5476 = vmatmul.mubr.msk.f32.gmra.mxu1 %vm2664_vm13, %v8183_v55 }
 0x38d   : > { %v2133_v35 = vmul.f32 %v2132_v12, %v2130_v60  ;;  %v2220_v26 = vsub.s32 0, %v2218_v18  ;;  %5478 = vmatprep.mubr.msk.f32.mxu1 %vm2664_vm13, %v2439_v4  ;;  %vm2149_vm7 = vcmp.eq.s32.totalorder %v2144_v53, 2  ;;  %vm2146_vm2 = vcmp.eq.s32.totalorder %v2144_v53, 0 }
 0x38e   : > { %vm2145_vm15 = vcmp.lt.s32.totalorder %v2144_v53, 2 }
 0x38f   : > { %v2134_v51 = vxor.u32 2147483648, %v2133_v35  ;;  %v4927_v29 = vmin.u32 %v2220_v26, %v2218_v18 }
 0x390   : > { %v6034_v52 = vpop.eup %6033  ;;  %5479 = vmatmul.mubr.msk.f32.gmra.mxu1 %vm2664_vm13, %v5426_v63 }
 0x391   : > { %v6036_v32 = vpop.eup %6035  ;;  %v2046_v55 = vxor.u32 2147483648, %v6034_v52  ;;  %v2135_v28 = vsel %vm2052_vm10, %v2134_v51, %v2133_v35  ;;  %v2222_v22 = vclz %v4927_v29  ;;  %5481 = vmatprep.mubr.msk.f32.mxu1 %vm2664_vm13, %v2449_v40  ;;  %v8301_v35 = vpop.f32.mrf.mxu0 }
 0x392   : > { %v2043_v54 = vxor.u32 2147483648, %v6036_v32  ;;  %v2138_v38 = vsel %vm8265_vm14, %v9130_v16, %v2135_v28  ;;  %v2243_v16 = vsel %vm2155_vm9, 0, %v2241_v42 }
 0x393   : > { %v2047_v25 = vsel %vm2045_vm0, %v2046_v55, %v6036_v32  ;;  %6037 = vcosq.f32 %v2138_v38  ;;  %v4928_v6 = vadd.s32 4294967294, %v2222_v22  ;;  %v2247_v47 = vadd.s32 3, %v2243_v16  ;;  %v8305_v26 = vpop.f32.mrf.mxu0  ;;  %v3239_v16 = vld [vmem:[#allocation2 + $0x130] sm:$0xff] }
 0x394   : > { %v2044_v48 = vsel %vm2042_vm1, %v6034_v52, %v2043_v54  ;;  %6039 = vsinq.f32 %v2138_v38  ;;  %5482 = vmatmul.mubr.msk.f32.gmra.mxu1 %vm2664_vm13, %v5429_v15  ;;  %vm2246_vm0 = vweird.f32 %v9133_v9  ;;  %v3022_v54 = vld [vmem:[#allocation2 + $0x118] sm:$0xff] }
 0x395   : > { %v2048_v7 = vsel %vm2041_vm8, %v2044_v48, %v2047_v25  ;;  %vm4929_vm5 = vcmp.lt.s32.totalorder %v4928_v6, 0  ;;  %5484 = vmatprep.mubr.msk.f32.mxu1 %vm2664_vm13, %v2459_v39  ;;  %v2248_v15 = vand.u32 3, %v2247_v47  ;;  %v8309_v51 = vpop.f32.mrf.mxu0  ;;  %5543 = vmatprep.subr.mxu1 %v3022_v54  ;;  %v3020_v25 = vld [vmem:[#allocation2 + $0x108] sm:$0xff]  ;;  %v2861_v47 = vld [vmem:[#allocation2 + $0x1e0] sm:$0xff]  ;;  %vm9138_vm8 = vcmask 261120  }
 0x396   : > { %v2049_v62 = vsel %vm2038_vm11, nan, %v2048_v7  ;;  %v2225_v58 = vsel %vm4929_vm5, 0, %v4928_v6  ;;  %5544 = vmatpush3.msra.mxu1 %v3022_v54  ;;  %vm9139_vm1 = vmmov %vm9138_vm8 }
 0x397   : > { %5454 = vmatmul.mubr.msk.f32.gmra.mxu0 %vm2274_vm4, %v2049_v62  ;;  %v2226_v1 = vsub.s32 32, %v2225_v58  ;;  %v2227_v14 = vshll.u32 %v2218_v18, %v2225_v58  ;;  %v2230_v63 = vsub.s32 4294967266, %v2225_v58  ;;  %vm2253_vm12 = vcmp.eq.s32.totalorder %v2248_v15, 2  ;;  %5545 = vmatprep.subr.mxu1 %v3021_v41  ;;  %vm9140_vm11 = vmmov %vm9139_vm1 }
 0x398   : > { %5485 = vmatmul.mubr.msk.f32.gmra.mxu1 %vm2664_vm13, %v5432_v36  ;;  %vm2250_vm10 = vcmp.eq.s32.totalorder %v2248_v15, 0  ;;  %vm2249_vm14 = vcmp.lt.s32.totalorder %v2248_v15, 2  ;;  %v8313_v36 = vpop.f32.mrf.mxu0  ;;  %v3238_v15 = vld [vmem:[#allocation2 + $0x128] sm:$0xff]  ;;  %vm9141_vm5 = vmmov %vm9139_vm1 }
 0x399   : > { %v2228_v5 = vshrl.u32 %v2210_v17, %v2226_v1  ;;  %v2231_v20 = vadd.s32 127, %v2230_v63  ;;  %5546 = vmatpush3.msra.mxu1 %v3021_v41 }
 0x39a   : > { %5547 = vmatprep.subr.mxu1 %v3020_v25 }
 0x39b   : > { %v2229_v19 = vor.u32 %v2228_v5, %v2227_v14  ;;  %v2232_v31 = vshll.u32 %v2231_v20, 23  ;;  %5548 = vmatpush3.msra.mxu1 %v3020_v25 }
 0x39d   : > { %v2233_v43 = vor.u32 4788187, %v2232_v31  ;;  %v2236_v0 = vcvt.s32.f32 %v2229_v19 }
 0x39f   : > { %v2234_v10 = vand.u32 2147483647, %v2233_v43 }
 0x3a0   : > { %v6038_v61 = vpop.eup %6037 }
 0x3a1   : > { %v6040_v56 = vpop.eup %6039  ;;  %v2150_v30 = vxor.u32 2147483648, %v6038_v61  ;;  %v2237_v23 = vmul.f32 %v2236_v0, %v2234_v10 }
 0x3a2   : > { %v2147_v49 = vxor.u32 2147483648, %v6040_v56 }
 0x3a3   : > { %v2151_v34 = vsel %vm2149_vm7, %v2150_v30, %v6040_v56  ;;  %v2238_v13 = vxor.u32 2147483648, %v2237_v23  ;;  %vm9142_vm7 = vmmov %vm9139_vm1 }
 0x3a4   : > { %v2148_v4 = vsel %vm2146_vm2, %v6038_v61, %v2147_v49  ;;  %vm9143_vm2 = vmmov %vm9139_vm1 }
 0x3a5   : > { %v2152_v45 = vsel %vm2145_vm15, %v2148_v4, %v2151_v34  ;;  %v2239_v59 = vsel %vm2156_vm6, %v2238_v13, %v2237_v23  ;;  %vm9144_vm15 = vmmov %vm9139_vm1 }
 0x3a6   : > { %v2153_v33 = vsel %vm2142_vm3, nan, %v2152_v45  ;;  %v2242_v24 = vsel %vm2155_vm9, %v9133_v9, %v2239_v59  ;;  %vm9145_vm6 = vmmov %vm9139_vm1 }
 0x3a7   : > { %5456 = vmatprep.mubr.msk.f32.mxu0 %vm2274_vm4, %v2153_v33  ;;  %6041 = vcosq.f32 %v2242_v24  ;;  %vm9146_vm3 = vmmov %vm9139_vm1 }
 0x3a8   : > { %6043 = vsinq.f32 %v2242_v24  ;;  %v2860_v24 = vld [vmem:[#allocation2 + $0x1d8] sm:$0xff]  ;;  %vm9147_vm9 = vmmov %vm9139_vm1 }
 0x3b1   : > { %v5443_v29 = vpop.f32.mrf.mxu0 }
 0x3b3   : > { %v2605_v55 = vpop.f32.mrf.mxu0 }
 0x3b4   : > { %v6042_v50 = vpop.eup %6041 }
 0x3b5   : > { %v6044_v57 = vpop.eup %6043  ;;  %v2254_v21 = vxor.u32 2147483648, %v6042_v50 }
 0x3b6   : > { %v2251_v12 = vxor.u32 2147483648, %v6044_v57 }
 0x3b7   : > { %v2255_v2 = vsel %vm2253_vm12, %v2254_v21, %v6044_v57  ;;  %v3237_v57 = vld [vmem:[#allocation2 + $0x120] sm:$0xff]  ;;  %v2863_v21 = vld [vmem:[#allocation2 + $0x1f0] sm:$0xff]  ;;  %vm9148_vm12 = vmmov %vm9139_vm1 }
 0x3b8   : > { %v2252_v60 = vsel %vm2250_vm10, %v6042_v50, %v2251_v12  ;;  %v2862_v50 = vld [vmem:[#allocation2 + $0x1e8] sm:$0xff]  ;;  %v2864_v12 = vld [vmem:[#allocation2 + $0x1f8] sm:$0xff]  ;;  %vm9149_vm10 = vmmov %vm9139_vm1 }
 0x3b9   : > { %v2256_v40 = vsel %vm2249_vm14, %v2252_v60, %v2255_v2  ;;  %v2865_v2 = vld [vmem:[#allocation2 + $0x200] sm:$0xff]  ;;  %v2866_v60 = vld [vmem:[#allocation2 + $0x208] sm:$0xff]  ;;  %vm9150_vm14 = vmmov %vm9139_vm1 }
 0x3ba   : > { %v2257_v37 = vsel %vm2246_vm0, nan, %v2256_v40  ;;  %v2867_v40 = vld [vmem:[#allocation2 + $0x210] sm:$0xff]  ;;  %vm9151_vm0 = vmmov %vm9139_vm1 }
 0x3bb   : > { %5457 = vmatmul.mubr.msk.f32.gmra.mxu0 %vm2274_vm4, %v2257_v37  ;;  %v2868_v37 = vld [vmem:[#allocation2 + $0x218] sm:$0xff]  ;;  %vm3023_vm4 = vcmask 195584  }
 0x3bc   : > { %5519 = vmatprep.mubr.f32.mxu0 %v2859_v46  ;;  %v2869_v46 = vld [vmem:[#allocation2 + $0x220] sm:$0xff] }
 0x3db   : > { %v5446_v38 = vpop.f32.mrf.mxu0 }
 0x3dd   : > { %v2615_v39 = vpop.f32.mrf.mxu0 }
 0x404   : > { %v5449_v6 = vpop.f32.mrf.mxu0 }
 0x406   : > { %v2625_v27 = vpop.f32.mrf.mxu0 }
 0x42b   : > { %v5452_v17 = vpop.f32.mrf.mxu0 }
 0x42d   : > { %v2635_v44 = vpop.f32.mrf.mxu0 }
 0x43c   : > { %v8299_v18 = vpop.f32.mrf.mxu1 }
 0x43d   : > { %v8375_v59 = vadd.f32 %v8299_v18, %v8301_v35  ;;  %v2870_v18 = vld [vmem:[#allocation2 + $0x228] sm:$0xff]  ;;  %v2871_v35 = vld [vmem:[#allocation2 + $0x230] sm:$0xff] }
 0x43e   : > { %v8303_v11 = vpop.f32.mrf.mxu1 }
 0x43f   : > { %v8381_v42 = vadd.f32 %v8303_v11, %v8305_v26  ;;  %v2872_v11 = vld [vmem:[#allocation2 + $0x238] sm:$0xff]  ;;  %v2873_v26 = vld [vmem:[#allocation2 + $0x240] sm:$0xff] }
 0x440   : > { %v8307_v3 = vpop.f32.mrf.mxu1 }
 0x441   : > { %v8363_v45 = vadd.f32 %v8307_v3, %v8309_v51  ;;  %v2874_v3 = vld [vmem:[#allocation2 + $0x248] sm:$0xff]  ;;  %v3451_v51 = vld [vmem:[#allocation2 + $0x150] sm:$0xff] }
 0x442   : > { %v8311_v9 = vpop.f32.mrf.mxu1  ;;  %5603 = vmatprep.subr.mxu1 %v3451_v51 }
 0x443   : > { %v8369_v33 = vadd.f32 %v8311_v9, %v8313_v36 }
 0x444   : > { %v5471_v52 = vpop.f32.mrf.mxu1 }
 0x445   : > { %v8353_v4 = vadd.f32 %v5471_v52, %v5443_v29  ;;  %v3450_v52 = vld [vmem:[#allocation2 + $0x148] sm:$0xff] }
 0x446   : > { %v2799_v32 = vpop.f32.mrf.mxu1 }
 0x447   : > { %v8357_v13 = vadd.f32 %v2799_v32, %v2605_v55  ;;  %v3449_v32 = vld [vmem:[#allocation2 + $0x140] sm:$0xff] }
 0x448   : > { %v5474_v28 = vpop.f32.mrf.mxu1 }
 0x449   : > { %v8345_v34 = vadd.f32 %v5474_v28, %v5446_v38 }
 0x44a   : > { %v2809_v22 = vpop.f32.mrf.mxu1 }
 0x44b   : > { %v8349_v8 = vadd.f32 %v2809_v22, %v2615_v39 }
 0x44c   : > { %v5477_v48 = vpop.f32.mrf.mxu1 }
 0x44d   : > { %v8337_v49 = vadd.f32 %v5477_v48, %v5449_v6 }
 0x44e   : > { %v2819_v7 = vpop.f32.mrf.mxu1 }
 0x44f   : > { %v8341_v23 = vadd.f32 %v2819_v7, %v2625_v27 }
 0x450   : > { %v5480_v62 = vpop.f32.mrf.mxu1 }
 0x451   : > { %v8329_v56 = vadd.f32 %v5480_v62, %v5452_v17  ;;  %v3651_v17 = vld [vmem:[#allocation2 + $0x250] sm:$0xff] }
 0x452   : > { %v2829_v58 = vpop.f32.mrf.mxu1 }
 0x453   : > { %v8333_v30 = vadd.f32 %v2829_v58, %v2635_v44 }
 0x454   : > { %v5483_v1 = vpop.f32.mrf.mxu1 }
 0x456   : > { %v2839_v63 = vpop.f32.mrf.mxu1 }
 0x457   : > { %v5455_v14 = vpop.f32.mrf.mxu0 }
 0x458   : > { %v5486_v20 = vpop.f32.mrf.mxu1  ;;  %v8321_v61 = vadd.f32 %v5483_v1, %v5455_v14 }
 0x459   : > { %v2645_v5 = vpop.f32.mrf.mxu0 }
 0x45a   : > { %v2849_v19 = vpop.f32.mrf.mxu1  ;;  %v8325_v10 = vadd.f32 %v2839_v63, %v2645_v5 }
 0x47b   : > { %v5458_v53 = vpop.f32.mrf.mxu0 }
 0x47c   : > { %v8315_v31 = vadd.f32 %v5486_v20, %v5458_v53 }
 0x47d   : > { %v2655_v43 = vpop.f32.mrf.mxu0 }
 0x47e   : > { %v8317_v0 = vadd.f32 %v2849_v19, %v2655_v43  ;;  %5487 = vmatprep.subr.mxu0 %v8315_v31 }
 0x47f   : > { %5488 = vmatpush3.msra.mxu0 %v8315_v31 }
 0x480   : > { %5489 = vmatprep.subr.mxu0 %v8317_v0 }
 0x481   : > { %5490 = vmatpush3.msra.mxu0 %v8317_v0 }
 0x482   : > { %5491 = vmatprep.subr.mxu0 %v8321_v61 }
 0x483   : > { %5492 = vmatpush3.msra.mxu0 %v8321_v61 }
 0x484   : > { %5493 = vmatprep.subr.mxu0 %v8325_v10 }
 0x485   : > { %5494 = vmatpush3.msra.mxu0 %v8325_v10 }
 0x486   : > { %5495 = vmatprep.subr.mxu0 %v8329_v56 }
 0x487   : > { %5496 = vmatpush3.msra.mxu0 %v8329_v56 }
 0x488   : > { %5497 = vmatprep.subr.mxu0 %v8333_v30 }
 0x489   : > { %5498 = vmatpush3.msra.mxu0 %v8333_v30 }
 0x48a   : > { %5499 = vmatprep.subr.mxu0 %v8337_v49 }
 0x48b   : > { %5500 = vmatpush3.msra.mxu0 %v8337_v49 }
 0x48c   : > { %5501 = vmatprep.subr.mxu0 %v8341_v23 }
 0x48d   : > { %5502 = vmatpush3.msra.mxu0 %v8341_v23 }
 0x48e   : > { %5503 = vmatprep.subr.mxu0 %v8345_v34 }
 0x48f   : > { %5504 = vmatpush3.msra.mxu0 %v8345_v34 }
 0x490   : > { %5505 = vmatprep.subr.mxu0 %v8349_v8 }
 0x491   : > { %5506 = vmatpush3.msra.mxu0 %v8349_v8 }
 0x492   : > { %5507 = vmatprep.subr.mxu0 %v8353_v4 }
 0x493   : > { %5508 = vmatpush3.msra.mxu0 %v8353_v4 }
 0x494   : > { %5509 = vmatprep.subr.mxu0 %v8357_v13 }
 0x495   : > { %5510 = vmatpush3.msra.mxu0 %v8357_v13 }
 0x496   : > { %5511 = vmatprep.subr.mxu0 %v8363_v45 }
 0x497   : > { %5512 = vmatpush3.msra.mxu0 %v8363_v45 }
 0x498   : > { %5513 = vmatprep.subr.mxu0 %v8369_v33 }
 0x499   : > { %5514 = vmatpush3.msra.mxu0 %v8369_v33 }
 0x49a   : > { %5515 = vmatprep.subr.mxu0 %v8375_v59 }
 0x49b   : > { %5516 = vmatpush3.msra.mxu0 %v8375_v59 }
 0x49c   : > { %5517 = vmatprep.subr.mxu0 %v8381_v42 }
 0x49d   : > { %5518 = vmatpush3.msra.mxu0 %v8381_v42 }
 0x49e   : > { %5520 = vmatmul.mubr.f32.vlgmr.msra.gmra.mxu0 %v2860_v24  ;;  %5573 = vmatprep.subr.mxu0 %v3239_v16  ;;  %v3814_v24 = vld [vmem:[#allocation2 + $0x170] sm:$0xff] }
 0x49f   : > { %5522 = vmatprep.mubr.f32.mxu0 %v2861_v47  ;;  %5574 = vmatpush3.msra.mxu0 %v3239_v16  ;;  %v3813_v47 = vld [vmem:[#allocation2 + $0x168] sm:$0xff] }
 0x4a0   : > { %5575 = vmatprep.subr.mxu0 %v3238_v15 }
 0x4a1   : > { %5576 = vmatpush3.msra.mxu0 %v3238_v15 }
 0x4a2   : > { %5523 = vmatmul.mubr.f32.gmra.mxu0 %v2862_v50  ;;  %5577 = vmatprep.subr.mxu0 %v3237_v57 }
 0x4a3   : > { %5525 = vmatprep.mubr.f32.mxu0 %v2863_v21  ;;  %5578 = vmatpush3.msra.mxu0 %v3237_v57  ;;  %v3812_v57 = vld [vmem:[#allocation2 + $0x160] sm:$0xff] }
 0x4a6   : > { %5526 = vmatmul.mubr.f32.gmra.mxu0 %v2864_v12 }
 0x4a7   : > { %5528 = vmatprep.mubr.f32.mxu0 %v2865_v2 }
 0x4aa   : > { %5529 = vmatmul.mubr.f32.gmra.mxu0 %v2866_v60 }
 0x4ab   : > { %5531 = vmatprep.mubr.f32.mxu0 %v2867_v40 }
 0x4ae   : > { %5532 = vmatmul.mubr.f32.gmra.mxu0 %v2868_v37 }
 0x4af   : > { %5534 = vmatprep.mubr.f32.mxu0 %v2869_v46 }
 0x4b2   : > { %5535 = vmatmul.mubr.f32.gmra.mxu0 %v2870_v18 }
 0x4b3   : > { %5537 = vmatprep.mubr.f32.mxu0 %v2871_v35 }
 0x4b6   : > { %5538 = vmatmul.mubr.f32.gmra.mxu0 %v2872_v11 }
 0x4b7   : > { %5540 = vmatprep.mubr.f32.mxu0 %v2873_v26 }
 0x4ba   : > { %5541 = vmatmul.mubr.f32.gmra.mxu0 %v2874_v3 }
 0x4bb   : > { %5579 = vmatprep.mubr.msk.f32.mxu0 %vm3023_vm4, %v8381_v42 }
 0x4be   : > { %5580 = vmatmul.mubr.msk.f32.vlgmr.msra.gmra.mxu0 %vm3023_vm4, %v8375_v59 }
 0x4bf   : > { %5582 = vmatprep.mubr.msk.f32.mxu0 %vm3023_vm4, %v8369_v33 }
 0x4c2   : > { %5583 = vmatmul.mubr.msk.f32.gmra.mxu0 %vm3023_vm4, %v8363_v45 }
 0x4c3   : > { %5585 = vmatprep.mubr.msk.f32.mxu0 %vm3023_vm4, %v8357_v13 }
 0x4c6   : > { %5586 = vmatmul.mubr.msk.f32.gmra.mxu0 %vm3023_vm4, %v8353_v4 }
 0x4c7   : > { %5588 = vmatprep.mubr.msk.f32.mxu0 %vm3023_vm4, %v8349_v8 }
 0x4ca   : > { %5589 = vmatmul.mubr.msk.f32.gmra.mxu0 %vm3023_vm4, %v8345_v34 }
 0x4cb   : > { %5591 = vmatprep.mubr.msk.f32.mxu0 %vm3023_vm4, %v8341_v23 }
 0x4ce   : > { %5592 = vmatmul.mubr.msk.f32.gmra.mxu0 %vm3023_vm4, %v8337_v49 }
 0x4cf   : > { %5594 = vmatprep.mubr.msk.f32.mxu0 %vm3023_vm4, %v8333_v30 }
 0x4d2   : > { %5595 = vmatmul.mubr.msk.f32.gmra.mxu0 %vm3023_vm4, %v8329_v56 }
 0x4d3   : > { %5597 = vmatprep.mubr.msk.f32.mxu0 %vm3023_vm4, %v8325_v10 }
 0x4d6   : > { %5598 = vmatmul.mubr.msk.f32.gmra.mxu0 %vm3023_vm4, %v8321_v61 }
 0x4d7   : > { %5600 = vmatprep.mubr.msk.f32.mxu0 %vm3023_vm4, %v8317_v0 }
 0x4da   : > { %5601 = vmatmul.mubr.msk.f32.gmra.mxu0 %vm3023_vm4, %v8315_v31 }
 0x4db   : > { %5665 = vmatprep.mubr.f32.mxu0 %v3651_v17 }
 0x55e   : > { %v5521_v9 = vpop.f32.mrf.mxu0 }
 0x560   : > { %v2941_v36 = vpop.f32.mrf.mxu0 }
 0x561   : > { %5549 = vmatprep.mubr.msk.f32.mxu1 %vm3023_vm4, %v2941_v36 }
 0x562   : > { %v5524_v29 = vpop.f32.mrf.mxu0  ;;  %5550 = vmatmul.mubr.msk.f32.vlgmr.msra.gmra.mxu1 %vm3023_vm4, %v5521_v9 }
 0x563   : > { %5604 = vmatpush3.msra.mxu1 %v3451_v51  ;;  %v8521_v51 = vld [vmem:[#allocation2 + $0x138] ss:$0 sm:$0xff] }
 0x564   : > { %v2951_v55 = vpop.f32.mrf.mxu0  ;;  %5605 = vmatprep.subr.mxu1 %v3450_v52 }
 0x565   : > { %5552 = vmatprep.mubr.msk.f32.mxu1 %vm3023_vm4, %v2951_v55  ;;  %5606 = vmatpush3.msra.mxu1 %v3450_v52 }
 0x566   : > { %v5527_v28 = vpop.f32.mrf.mxu0  ;;  %5553 = vmatmul.mubr.msk.f32.gmra.mxu1 %vm3023_vm4, %v5524_v29  ;;  %5607 = vmatprep.subr.mxu1 %v3449_v32 }
 0x567   : > { %5608 = vmatpush3.msra.mxu1 %v3449_v32 }
 0x568   : > { %v2961_v54 = vpop.f32.mrf.mxu0 }
 0x569   : > { %5555 = vmatprep.mubr.msk.f32.mxu1 %vm3023_vm4, %v2961_v54 }
 0x56a   : > { %v5530_v41 = vpop.f32.mrf.mxu0  ;;  %5556 = vmatmul.mubr.msk.f32.gmra.mxu1 %vm3023_vm4, %v5527_v28 }
 0x56c   : > { %v2971_v38 = vpop.f32.mrf.mxu0 }
 0x56d   : > { %5558 = vmatprep.mubr.msk.f32.mxu1 %vm3023_vm4, %v2971_v38 }
 0x56e   : > { %v5533_v22 = vpop.f32.mrf.mxu0  ;;  %5559 = vmatmul.mubr.msk.f32.gmra.mxu1 %vm3023_vm4, %v5530_v41 }
 0x570   : > { %v2981_v25 = vpop.f32.mrf.mxu0 }
 0x571   : > { %5561 = vmatprep.mubr.msk.f32.mxu1 %vm3023_vm4, %v2981_v25 }
 0x572   : > { %v5536_v39 = vpop.f32.mrf.mxu0  ;;  %5562 = vmatmul.mubr.msk.f32.gmra.mxu1 %vm3023_vm4, %v5533_v22 }
 0x574   : > { %v2991_v48 = vpop.f32.mrf.mxu0 }
 0x575   : > { %5564 = vmatprep.mubr.msk.f32.mxu1 %vm3023_vm4, %v2991_v48 }
 0x576   : > { %v5539_v6 = vpop.f32.mrf.mxu0  ;;  %5565 = vmatmul.mubr.msk.f32.gmra.mxu1 %vm3023_vm4, %v5536_v39 }
 0x578   : > { %v3001_v7 = vpop.f32.mrf.mxu0 }
 0x579   : > { %5567 = vmatprep.mubr.msk.f32.mxu1 %vm3023_vm4, %v3001_v7 }
 0x57a   : > { %v5542_v27 = vpop.f32.mrf.mxu0  ;;  %5568 = vmatmul.mubr.msk.f32.gmra.mxu1 %vm3023_vm4, %v5539_v6 }
 0x57c   : > { %v3011_v62 = vpop.f32.mrf.mxu0 }
 0x57d   : > { %5570 = vmatprep.mubr.msk.f32.mxu1 %vm3023_vm4, %v3011_v62 }
 0x57e   : > { %5571 = vmatmul.mubr.msk.f32.gmra.mxu1 %vm3023_vm4, %v5542_v27  ;;  %v8467_v58 = vpop.f32.mrf.mxu0  ;;  %v8529_v27 = vld [vmem:[#allocation2 + $0x158] ss:$0 sm:$0xff] }
 0x57f   : > { %5609 = vmatprep.mubr.msk.f32.mxu1 %vm3023_vm4, %v8381_v42  ;;  %v3815_v42 = vld [vmem:[#allocation2 + $0x178] sm:$0xff] }
 0x580   : > { %v8471_v1 = vpop.f32.mrf.mxu0  ;;  %5689 = vmatprep.subr.mxu1 %v3815_v42 }
 0x582   : > { %5610 = vmatmul.mubr.msk.f32.vlgmr.msra.gmra.mxu1 %vm3023_vm4, %v8375_v59  ;;  %v8477_v5 = vpop.f32.mrf.mxu0 }
 0x583   : > { %5612 = vmatprep.mubr.msk.f32.mxu1 %vm3023_vm4, %v8369_v33  ;;  %5690 = vmatpush3.msra.mxu1 %v3815_v42 }
 0x584   : > { %v8483_v19 = vpop.f32.mrf.mxu0  ;;  %5691 = vmatprep.subr.mxu1 %v3814_v24 }
 0x585   : > { %5692 = vmatpush3.msra.mxu1 %v3814_v24 }
 0x586   : > { %5613 = vmatmul.mubr.msk.f32.gmra.mxu1 %vm3023_vm4, %v8363_v45  ;;  %5693 = vmatprep.subr.mxu1 %v3813_v47 }
 0x587   : > { %5615 = vmatprep.mubr.msk.f32.mxu1 %vm3023_vm4, %v8357_v13  ;;  %5694 = vmatpush3.msra.mxu1 %v3813_v47 }
 0x588   : > { %5695 = vmatprep.subr.mxu1 %v3812_v57 }
 0x589   : > { %5696 = vmatpush3.msra.mxu1 %v3812_v57 }
 0x58a   : > { %5616 = vmatmul.mubr.msk.f32.gmra.mxu1 %vm3023_vm4, %v8353_v4 }
 0x58b   : > { %5618 = vmatprep.mubr.msk.f32.mxu1 %vm3023_vm4, %v8349_v8 }
 0x58e   : > { %5619 = vmatmul.mubr.msk.f32.gmra.mxu1 %vm3023_vm4, %v8345_v34 }
 0x58f   : > { %5621 = vmatprep.mubr.msk.f32.mxu1 %vm3023_vm4, %v8341_v23 }
 0x592   : > { %5622 = vmatmul.mubr.msk.f32.gmra.mxu1 %vm3023_vm4, %v8337_v49 }
 0x593   : > { %5624 = vmatprep.mubr.msk.f32.mxu1 %vm3023_vm4, %v8333_v30 }
 0x596   : > { %5625 = vmatmul.mubr.msk.f32.gmra.mxu1 %vm3023_vm4, %v8329_v56 }
 0x597   : > { %5627 = vmatprep.mubr.msk.f32.mxu1 %vm3023_vm4, %v8325_v10 }
 0x59a   : > { %5628 = vmatmul.mubr.msk.f32.gmra.mxu1 %vm3023_vm4, %v8321_v61 }
 0x59b   : > { %5630 = vmatprep.mubr.msk.f32.mxu1 %vm3023_vm4, %v8317_v0  ;;  %v8489_v0 = vpop.f32.mrf.mxu0 }
 0x59d   : > { %v8493_v56 = vpop.f32.mrf.mxu0 }
 0x59e   : > { %5631 = vmatmul.mubr.msk.f32.gmra.mxu1 %vm3023_vm4, %v8315_v31  ;;  %vm9152_vm4 = vmmov %vm9151_vm0 }
 0x59f   : > { %v8497_v23 = vpop.f32.mrf.mxu0 }
 0x5a1   : > { %v8499_v4 = vpop.f32.mrf.mxu0 }
 0x5a3   : > { %v8501_v33 = vpop.f32.mrf.mxu0 }
 0x5a5   : > { %v8505_v15 = vpop.f32.mrf.mxu0 }
 0x5a7   : > { %v5596_v12 = vpop.f32.mrf.mxu0 }
 0x5a9   : > { %v3404_v40 = vpop.f32.mrf.mxu0 }
 0x5ab   : > { %v5599_v18 = vpop.f32.mrf.mxu0 }
 0x5ad   : > { %v3414_v26 = vpop.f32.mrf.mxu0 }
 0x5af   : > { %v5602_v52 = vpop.f32.mrf.mxu0 }
 0x5b1   : > { %v3424_v38 = vpop.f32.mrf.mxu0 }
 0x622   : > { %v8469_v44 = vpop.f32.mrf.mxu1 }
 0x624   : > { %v8473_v14 = vpop.f32.mrf.mxu1 }
 0x626   : > { %v8475_v63 = vpop.f32.mrf.mxu1 }
 0x628   : > { %v8479_v20 = vpop.f32.mrf.mxu1 }
 0x62a   : > { %v8481_v53 = vpop.f32.mrf.mxu1 }
 0x62c   : > { %v8485_v31 = vpop.f32.mrf.mxu1 }
 0x62e   : > { %v8487_v43 = vpop.f32.mrf.mxu1 }
 0x630   : > { %v8491_v61 = vpop.f32.mrf.mxu1 }
 0x632   : > { %v5563_v10 = vpop.f32.mrf.mxu1 }
 0x634   : > { %v8495_v30 = vpop.f32.mrf.mxu1 }
 0x636   : > { %v5566_v49 = vpop.f32.mrf.mxu1 }
 0x637   : > { %v3232_v22 = vadd.f32 %v5566_v49, %v8521_v51 }
 0x638   : > { %v3188_v34 = vpop.f32.mrf.mxu1 }
 0x639   : > { %v3231_v6 = vadd.f32 %v8521_v51, %v3188_v34 }
 0x63a   : > { %v5569_v8 = vpop.f32.mrf.mxu1 }
 0x63b   : > { %v3234_v29 = vadd.f32 %v5569_v8, %v8521_v51 }
 0x63c   : > { %v3198_v13 = vpop.f32.mrf.mxu1 }
 0x63d   : > { %v3233_v28 = vadd.f32 %v8521_v51, %v3198_v13  ;;  %v3446_v25 = vadd.f32 %v5599_v18, %v3234_v29  ;;  %v3230_v13 = vadd.f32 %v5563_v10, %v8521_v51  ;;  %v3229_v18 = vadd.f32 %v8521_v51, %v8495_v30 }
 0x63e   : > { %v5572_v45 = vpop.f32.mrf.mxu1  ;;  %v3227_v30 = vadd.f32 %v8521_v51, %v8491_v61 }
 0x63f   : > { %v3236_v36 = vadd.f32 %v5572_v45, %v8521_v51  ;;  %v3445_v7 = vadd.f32 %v3414_v26, %v3233_v28  ;;  %v3615_v42 = vmax.f32 %v3446_v25, 0.0  ;;  %v3443_v26 = vadd.f32 %v3404_v40, %v3231_v6 }
 0x640   : > { %v3208_v59 = vpop.f32.mrf.mxu1  ;;  %v3442_v28 = vadd.f32 %v8501_v33, %v3230_v13  ;;  %v3441_v40 = vadd.f32 %v8505_v15, %v3229_v18 }
 0x641   : > { %v3235_v55 = vadd.f32 %v8521_v51, %v3208_v59  ;;  %v3448_v41 = vadd.f32 %v5602_v52, %v3236_v36  ;;  %v3444_v59 = vadd.f32 %v5596_v12, %v3232_v22  ;;  %v3614_v36 = vmax.f32 %v3445_v7, 0.0 }
 0x642   : > { %v8503_v16 = vpop.f32.mrf.mxu1  ;;  %v3228_v12 = vadd.f32 %v8487_v43, %v8521_v51  ;;  %v3611_v61 = vmax.f32 %v3442_v28, 0.0  ;;  %v3439_v7 = vadd.f32 %v8499_v4, %v3227_v30 }
 0x643   : > { %v3447_v48 = vadd.f32 %v3424_v38, %v3235_v55  ;;  %v3617_v17 = vmax.f32 %v3448_v41, 0.0 }
 0x644   : > { %v8507_v50 = vpop.f32.mrf.mxu1 }
 0x645   : > { %v3616_v49 = vmax.f32 %v3447_v48, 0.0 }
 0x646   : > { %v8509_v21 = vpop.f32.mrf.mxu1 }
 0x648   : > { %v8511_v2 = vpop.f32.mrf.mxu1 }
 0x64a   : > { %v8513_v60 = vpop.f32.mrf.mxu1 }
 0x64c   : > { %v8515_v37 = vpop.f32.mrf.mxu1 }
 0x64e   : > { %v8517_v46 = vpop.f32.mrf.mxu1 }
 0x650   : > { %v8519_v35 = vpop.f32.mrf.mxu1 }
 0x651   : > { %v3554_v4 = vadd.f32 %v8529_v27, %v8519_v35  ;;  %v3222_v35 = vadd.f32 %v8469_v44, %v8521_v51 }
 0x652   : > { %v5623_v11 = vpop.f32.mrf.mxu1 }
 0x653   : > { %v3569_v43 = vadd.f32 %v5623_v11, %v8529_v27  ;;  %v3225_v11 = vadd.f32 %v8521_v51, %v8485_v31 }
 0x654   : > { %v3563_v3 = vpop.f32.mrf.mxu1 }
 0x655   : > { %v3564_v15 = vadd.f32 %v8529_v27, %v3563_v3  ;;  %v3224_v3 = vadd.f32 %v8475_v63, %v8521_v51  ;;  %v3608_v63 = vmax.f32 %v3439_v7, 0.0  ;;  %v3658_v7 = vld [vmem:[#allocation2 + $0x288] sm:$0xff] }
 0x656   : > { %v5626_v9 = vpop.f32.mrf.mxu1 }
 0x657   : > { %v3579_v52 = vadd.f32 %v5626_v9, %v8529_v27  ;;  %v3612_v9 = vmax.f32 %v3443_v26, 0.0 }
 0x658   : > { %v3573_v32 = vpop.f32.mrf.mxu1 }
 0x659   : > { %v3574_v41 = vadd.f32 %v8529_v27, %v3573_v32  ;;  %v3226_v32 = vadd.f32 %v8481_v53, %v8521_v51  ;;  %v3610_v53 = vmax.f32 %v3441_v40, 0.0  ;;  %v3652_v40 = vld [vmem:[#allocation2 + $0x258] sm:$0xff] }
 0x65a   : > { %v5629_v54 = vpop.f32.mrf.mxu1 }
 0x65b   : > { %v3589_v8 = vadd.f32 %v5629_v54, %v8529_v27  ;;  %v3613_v54 = vmax.f32 %v3444_v59, 0.0  ;;  %v3628_v48 = vadd.f32 %v3612_v9, %v3574_v41  ;;  %v3437_v59 = vadd.f32 %v8493_v56, %v3225_v11  ;;  %v4032_v9 = vld [vmem:[#allocation2 + $0x198] sm:$0xff]  ;;  %v3657_v11 = vld [vmem:[#allocation2 + $0x280] sm:$0xff] }
 0x65c   : > { %v3583_v39 = vpop.f32.mrf.mxu1  ;;  %v3544_v56 = vadd.f32 %v8529_v27, %v8515_v37  ;;  %v3434_v37 = vadd.f32 %v8467_v58, %v3222_v35  ;;  %v4243_v35 = vld [vmem:[#allocation2 + $0x1b0] sm:$0xff] }
 0x65d   : > { %v3584_v47 = vadd.f32 %v8529_v27, %v3583_v39  ;;  %v3631_v29 = vadd.f32 %v3615_v42, %v3589_v8  ;;  %v3629_v25 = vadd.f32 %v3613_v54, %v3579_v52  ;;  %v3440_v39 = vadd.f32 %v8497_v23, %v3228_v12 }
 0x65e   : > { %v5632_v62 = vpop.f32.mrf.mxu1  ;;  %v3559_v23 = vadd.f32 %v8517_v46, %v8529_v27  ;;  %v3438_v8 = vadd.f32 %v8489_v0, %v3226_v32  ;;  %v8579_v13 = vmax.f32 %v3628_v48, 0.0  ;;  %v3223_v46 = vadd.f32 %v8521_v51, %v8479_v20  ;;  %v3654_v32 = vld [vmem:[#allocation2 + $0x268] sm:$0xff]  ;;  %v3656_v48 = vld [vmem:[#allocation2 + $0x278] sm:$0xff] }
 0x65f   : > { %v3599_v45 = vadd.f32 %v5632_v62, %v8529_v27  ;;  %v3630_v38 = vadd.f32 %v3614_v36, %v3584_v47  ;;  %v8553_v33 = vmax.f32 %v3631_v29, 0.0  ;;  %v3627_v62 = vadd.f32 %v3611_v61, %v3569_v43  ;;  %v3653_v43 = vld [vmem:[#allocation2 + $0x260] sm:$0xff]  ;;  %v3655_v61 = vld [vmem:[#allocation2 + $0x270] sm:$0xff] }
 0x660   : > { %v3593_v24 = vpop.f32.mrf.mxu1  ;;  %v3609_v31 = vmax.f32 %v3440_v39, 0.0  ;;  %v3549_v0 = vadd.f32 %v8513_v60, %v8529_v27  ;;  %v3607_v20 = vmax.f32 %v3438_v8, 0.0  ;;  %v3624_v47 = vadd.f32 %v3608_v63, %v3554_v4  ;;  %v4030_v39 = vld [vmem:[#allocation2 + $0x188] sm:$0xff]  ;;  %v3663_v8 = vld [vmem:[#allocation2 + $0x2b0] sm:$0xff]  ;;  %v3665_v4 = vld [vmem:[#allocation2 + $0x2c0] sm:$0xff] }
 0x661   : > { %v3633_v57 = vadd.f32 %v3617_v17, %v3599_v45  ;;  %v3594_v34 = vadd.f32 %v8529_v27, %v3593_v24  ;;  %v8561_v6 = vmax.f32 %v3630_v38, 0.0  ;;  %v8570_v17 = vmax.f32 %v3629_v25, 0.0  ;;  %v4031_v25 = vld [vmem:[#allocation2 + $0x190] sm:$0xff] }
 0x662   : > { %v3626_v45 = vadd.f32 %v3610_v53, %v3564_v15  ;;  %v3625_v42 = vadd.f32 %v3609_v31, %v3559_v23  ;;  %v8588_v24 = vmax.f32 %v3627_v62, 0.0  ;;  %v3221_v60 = vadd.f32 %v8521_v51, %v8473_v14  ;;  %v4029_v15 = vld [vmem:[#allocation2 + $0x180] sm:$0xff]  ;;  %v3659_v53 = vld [vmem:[#allocation2 + $0x290] sm:$0xff]  ;;  %v3660_v23 = vld [vmem:[#allocation2 + $0x298] sm:$0xff] }
 0x663   : > { %v8539_v55 = vmax.f32 %v3633_v57, 0.0  ;;  %v3632_v10 = vadd.f32 %v3616_v49, %v3594_v34  ;;  %v3436_v49 = vadd.f32 %v8477_v5, %v3224_v3  ;;  %v3435_v34 = vadd.f32 %v8483_v19, %v3223_v46  ;;  %v3661_v62 = vld [vmem:[#allocation2 + $0x2a0] sm:$0xff]  ;;  %v3662_v3 = vld [vmem:[#allocation2 + $0x2a8] sm:$0xff]  ;;  %v3664_v31 = vld [vmem:[#allocation2 + $0x2b8] sm:$0xff] }
 0x664   : > { %v8597_v57 = vmax.f32 %v3626_v45, 0.0  ;;  %v3606_v44 = vmax.f32 %v3437_v59, 0.0  ;;  %v3539_v5 = vadd.f32 %v8509_v21, %v8529_v27  ;;  %v3623_v18 = vadd.f32 %v3607_v20, %v3549_v0  ;;  %v3666_v45 = vld [vmem:[#allocation2 + $0x2c8] sm:$0xff]  ;;  %v4245_v46 = vld [vmem:[#allocation2 + $0x1c0] sm:$0xff]  ;;  %v4244_v0 = vld [vmem:[#allocation2 + $0x1b8] sm:$0xff] }
 0x665   : > { %v8545_v22 = vmax.f32 %v3632_v10, 0.0  ;;  %5633 = vmatprep.subr.mxu0 %v8539_v55  ;;  %v8606_v26 = vmax.f32 %v3625_v42, 0.0  ;;  %v3605_v36 = vmax.f32 %v3436_v49, 0.0  ;;  %v3534_v14 = vadd.f32 %v8529_v27, %v8511_v2  ;;  %5753 = vmatprep.subr.mxu1 %v4245_v46  ;;  %v4242_v20 = vld [vmem:[#allocation2 + $0x1a8] sm:$0xff] }
 0x666   : > { %5634 = vmatpush3.msra.mxu0 %v8539_v55  ;;  %v3622_v19 = vadd.f32 %v3606_v44, %v3544_v56  ;;  %v8613_v51 = vmax.f32 %v3624_v47, 0.0  ;;  %v3433_v21 = vadd.f32 %v8471_v1, %v3221_v60  ;;  %v3604_v52 = vmax.f32 %v3435_v34, 0.0 }
 0x667   : > { %5635 = vmatprep.subr.mxu0 %v8545_v22  ;;  %v3529_v29 = vadd.f32 %v8503_v16, %v8529_v27  ;;  %v3621_v58 = vadd.f32 %v3605_v36, %v3539_v5  ;;  %v8620_v10 = vmax.f32 %v3623_v18, 0.0  ;;  %v3603_v2 = vmax.f32 %v3434_v37, 0.0 }
 0x668   : > { %5636 = vmatpush3.msra.mxu0 %v8545_v22  ;;  %v3524_v12 = vadd.f32 %v8529_v27, %v8507_v50  ;;  %v3620_v28 = vadd.f32 %v3604_v52, %v3534_v14  ;;  %v8626_v54 = vmax.f32 %v3622_v19, 0.0  ;;  %v3602_v1 = vmax.f32 %v3433_v21, 0.0 }
 0x669   : > { %5637 = vmatprep.subr.mxu0 %v8553_v33  ;;  %v3619_v16 = vadd.f32 %v3603_v2, %v3529_v29  ;;  %v8630_v41 = vmax.f32 %v3621_v58, 0.0  ;;  %v9160_v34 = vmov 0.0  }
 0x66a   : > { %5638 = vmatpush3.msra.mxu0 %v8553_v33  ;;  %v3618_v38 = vadd.f32 %v3602_v1, %v3524_v12  ;;  %v8634_v30 = vmax.f32 %v3620_v28, 0.0 }
 0x66b   : > { %5639 = vmatprep.subr.mxu0 %v8561_v6  ;;  %v8638_v50 = vmax.f32 %v3619_v16, 0.0 }
 0x66c   : > { %5640 = vmatpush3.msra.mxu0 %v8561_v6  ;;  %v8642_v27 = vmax.f32 %v3618_v38, 0.0 }
 0x66d   : > { %5641 = vmatprep.subr.mxu0 %v8570_v17 }
 0x66e   : > { %5642 = vmatpush3.msra.mxu0 %v8570_v17 }
 0x66f   : > { %5643 = vmatprep.subr.mxu0 %v8579_v13 }
 0x670   : > { %5644 = vmatpush3.msra.mxu0 %v8579_v13 }
 0x671   : > { %5645 = vmatprep.subr.mxu0 %v8588_v24 }
 0x672   : > { %5646 = vmatpush3.msra.mxu0 %v8588_v24 }
 0x673   : > { %5647 = vmatprep.subr.mxu0 %v8597_v57 }
 0x674   : > { %5648 = vmatpush3.msra.mxu0 %v8597_v57 }
 0x675   : > { %5649 = vmatprep.subr.mxu0 %v8606_v26 }
 0x676   : > { %5650 = vmatpush3.msra.mxu0 %v8606_v26 }
 0x677   : > { %5651 = vmatprep.subr.mxu0 %v8613_v51 }
 0x678   : > { %5652 = vmatpush3.msra.mxu0 %v8613_v51 }
 0x679   : > { %5653 = vmatprep.subr.mxu0 %v8620_v10 }
 0x67a   : > { %5654 = vmatpush3.msra.mxu0 %v8620_v10 }
 0x67b   : > { %5655 = vmatprep.subr.mxu0 %v8626_v54 }
 0x67c   : > { %5656 = vmatpush3.msra.mxu0 %v8626_v54 }
 0x67d   : > { %5657 = vmatprep.subr.mxu0 %v8630_v41 }
 0x67e   : > { %5658 = vmatpush3.msra.mxu0 %v8630_v41 }
 0x67f   : > { %5659 = vmatprep.subr.mxu0 %v8634_v30 }
 0x680   : > { %5660 = vmatpush3.msra.mxu0 %v8634_v30 }
 0x681   : > { %5661 = vmatprep.subr.mxu0 %v8638_v50 }
 0x682   : > { %5662 = vmatpush3.msra.mxu0 %v8638_v50 }
 0x683   : > { %5663 = vmatprep.subr.mxu0 %v8642_v27 }
 0x684   : > { %5664 = vmatpush3.msra.mxu0 %v8642_v27 }
 0x685   : > { %5666 = vmatmul.mubr.f32.vlgmr.msra.gmra.mxu0 %v3652_v40  ;;  %5721 = vmatprep.subr.mxu0 %v4032_v9 }
 0x686   : > { %5668 = vmatprep.mubr.f32.mxu0 %v3653_v43  ;;  %5722 = vmatpush3.msra.mxu0 %v4032_v9 }
 0x687   : > { %5723 = vmatprep.subr.mxu0 %v4031_v25 }
 0x688   : > { %5724 = vmatpush3.msra.mxu0 %v4031_v25 }
 0x689   : > { %5669 = vmatmul.mubr.f32.gmra.mxu0 %v3654_v32  ;;  %5725 = vmatprep.subr.mxu0 %v4030_v39 }
 0x68a   : > { %5671 = vmatprep.mubr.f32.mxu0 %v3655_v61  ;;  %5726 = vmatpush3.msra.mxu0 %v4030_v39 }
 0x68b   : > { %5727 = vmatprep.subr.mxu0 %v4029_v15 }
 0x68c   : > { %5728 = vmatpush3.msra.mxu0 %v4029_v15 }
 0x68d   : > { %5672 = vmatmul.mubr.f32.gmra.mxu0 %v3656_v48 }
 0x68e   : > { %5674 = vmatprep.mubr.f32.mxu0 %v3657_v11 }
 0x691   : > { %5675 = vmatmul.mubr.f32.gmra.mxu0 %v3658_v7  ;;  %v8748_v7 = vld [vmem:[#allocation2 + $0x1c8] ss:$0 sm:$0xff] }
 0x692   : > { %5677 = vmatprep.mubr.f32.mxu0 %v3659_v53 }
 0x695   : > { %5678 = vmatmul.mubr.f32.gmra.mxu0 %v3660_v23 }
 0x696   : > { %5680 = vmatprep.mubr.f32.mxu0 %v3661_v62 }
 0x699   : > { %5681 = vmatmul.mubr.f32.gmra.mxu0 %v3662_v3 }
 0x69a   : > { %5683 = vmatprep.mubr.f32.mxu0 %v3663_v8 }
 0x69d   : > { %5684 = vmatmul.mubr.f32.gmra.mxu0 %v3664_v31 }
 0x69e   : > { %5686 = vmatprep.mubr.f32.mxu0 %v3665_v4 }
 0x6a1   : > { %5687 = vmatmul.mubr.f32.gmra.mxu0 %v3666_v45 }
 0x6a2   : > { %5729 = vmatprep.mubr.msk.f32.mxu0 %vm9138_vm8, %v8642_v27  ;;  %vm9153_vm8 = vmmov %vm9151_vm0 }
 0x6a5   : > { %5730 = vmatmul.mubr.msk.f32.vlgmr.msra.gmra.mxu0 %vm9139_vm1, %v8638_v50  ;;  %vm9154_vm1 = vmmov %vm9151_vm0 }
 0x6a6   : > { %5732 = vmatprep.mubr.msk.f32.mxu0 %vm9140_vm11, %v8634_v30  ;;  %vm9155_vm11 = vmmov %vm9151_vm0 }
 0x6a9   : > { %5733 = vmatmul.mubr.msk.f32.gmra.mxu0 %vm9141_vm5, %v8630_v41  ;;  %vm9156_vm5 = vmmov %vm9151_vm0 }
 0x6aa   : > { %5735 = vmatprep.mubr.msk.f32.mxu0 %vm9142_vm7, %v8626_v54  ;;  %vm9157_vm7 = vmmov %vm9151_vm0 }
 0x6ad   : > { %5736 = vmatmul.mubr.msk.f32.gmra.mxu0 %vm9143_vm2, %v8620_v10  ;;  %vm9158_vm2 = vmmov %vm9151_vm0 }
 0x6ae   : > { %5738 = vmatprep.mubr.msk.f32.mxu0 %vm9144_vm15, %v8613_v51  ;;  %vm9159_vm15 = vmmov %vm9151_vm0 }
 0x6b1   : > { %5739 = vmatmul.mubr.msk.f32.gmra.mxu0 %vm9145_vm6, %v8606_v26  ;;  %vm9161_vm6 = vmmov %vm9151_vm0 }
 0x6b2   : > { %5741 = vmatprep.mubr.msk.f32.mxu0 %vm9146_vm3, %v8597_v57  ;;  %vm9162_vm3 = vmmov %vm9151_vm0 }
 0x6b5   : > { %5742 = vmatmul.mubr.msk.f32.gmra.mxu0 %vm9147_vm9, %v8588_v24  ;;  %vm9163_vm9 = vmmov %vm9151_vm0 }
 0x6b6   : > { %5744 = vmatprep.mubr.msk.f32.mxu0 %vm9148_vm12, %v8579_v13  ;;  %vm9164_vm12 = vmmov %vm9151_vm0 }
 0x6b9   : > { %5745 = vmatmul.mubr.msk.f32.gmra.mxu0 %vm9149_vm10, %v8570_v17  ;;  %vm9165_vm10 = vmmov %vm9151_vm0 }
 0x6ba   : > { %5747 = vmatprep.mubr.msk.f32.mxu0 %vm9150_vm14, %v8561_v6  ;;  %vm9166_vm14 = vmmov %vm9151_vm0 }
 0x6bd   : > { %5748 = vmatmul.mubr.msk.f32.gmra.mxu0 %vm9151_vm0, %v8553_v33 }
 0x6be   : > { %5750 = vmatprep.mubr.msk.f32.mxu0 %vm9152_vm4, %v8545_v22  ;;  %vm9167_vm4 = vmmov %vm9151_vm0 }
 0x6c1   : > { %5751 = vmatmul.mubr.msk.f32.gmra.mxu0 %vm9153_vm8, %v8539_v55  ;;  %vm9168_vm8 = vmmov %vm9151_vm0 }
 0x745   : > { %v5667_v59 = vpop.f32.mrf.mxu0 }
 0x747   : > { %v3733_v63 = vpop.f32.mrf.mxu0 }
 0x748   : > { %5697 = vmatprep.mubr.msk.f32.mxu1 %vm9154_vm1, %v3733_v63  ;;  %vm9169_vm1 = vmmov %vm9151_vm0 }
 0x749   : > { %v5670_v42 = vpop.f32.mrf.mxu0  ;;  %5698 = vmatmul.mubr.msk.f32.vlgmr.msra.gmra.mxu1 %vm9155_vm11, %v5667_v59  ;;  %vm9170_vm11 = vmmov %vm9151_vm0 }
 0x74a   : > { %5754 = vmatpush3.msra.mxu1 %v4245_v46 }
 0x74b   : > { %v3743_v49 = vpop.f32.mrf.mxu0  ;;  %5755 = vmatprep.subr.mxu1 %v4244_v0 }
 0x74c   : > { %5700 = vmatprep.mubr.msk.f32.mxu1 %vm9156_vm5, %v3743_v49  ;;  %5756 = vmatpush3.msra.mxu1 %v4244_v0  ;;  %vm9171_vm5 = vmmov %vm9151_vm0 }
 0x74d   : > { %v5673_v56 = vpop.f32.mrf.mxu0  ;;  %5701 = vmatmul.mubr.msk.f32.gmra.mxu1 %vm9157_vm7, %v5670_v42  ;;  %5757 = vmatprep.subr.mxu1 %v4243_v35  ;;  %vm9172_vm7 = vmmov %vm9151_vm0 }
 0x74e   : > { %5758 = vmatpush3.msra.mxu1 %v4243_v35 }
 0x74f   : > { %v3753_v47 = vpop.f32.mrf.mxu0  ;;  %5759 = vmatprep.subr.mxu1 %v4242_v20 }
 0x750   : > { %5703 = vmatprep.mubr.msk.f32.mxu1 %vm9158_vm2, %v3753_v47  ;;  %5760 = vmatpush3.msra.mxu1 %v4242_v20  ;;  %vm9173_vm2 = vmmov %vm9151_vm0 }
 0x751   : > { %v5676_v60 = vpop.f32.mrf.mxu0  ;;  %5704 = vmatmul.mubr.msk.f32.gmra.mxu1 %vm9159_vm15, %v5673_v56  ;;  %5817 = vmatprep.subr.mxu1 %v9160_v34  ;;  %vm9174_vm15 = vmmov %vm9151_vm0 }
 0x753   : > { %v3763_v44 = vpop.f32.mrf.mxu0 }
 0x754   : > { %5706 = vmatprep.mubr.msk.f32.mxu1 %vm9161_vm6, %v3763_v44  ;;  %vm9175_vm6 = vmmov %vm9151_vm0 }
 0x755   : > { %v5679_v5 = vpop.f32.mrf.mxu0  ;;  %5707 = vmatmul.mubr.msk.f32.gmra.mxu1 %vm9162_vm3, %v5676_v60  ;;  %vm9176_vm3 = vmmov %vm9151_vm0 }
 0x757   : > { %v3773_v18 = vpop.f32.mrf.mxu0 }
 0x758   : > { %5709 = vmatprep.mubr.msk.f32.mxu1 %vm9163_vm9, %v3773_v18  ;;  %vm9177_vm9 = vmmov %vm9151_vm0 }
 0x759   : > { %v5682_v37 = vpop.f32.mrf.mxu0  ;;  %5710 = vmatmul.mubr.msk.f32.gmra.mxu1 %vm9164_vm12, %v5679_v5  ;;  %vm9178_vm12 = vmmov %vm9151_vm0 }
 0x75b   : > { %v3783_v36 = vpop.f32.mrf.mxu0 }
 0x75c   : > { %5712 = vmatprep.mubr.msk.f32.mxu1 %vm9165_vm10, %v3783_v36  ;;  %vm9179_vm10 = vmmov %vm9151_vm0 }
 0x75d   : > { %v5685_v14 = vpop.f32.mrf.mxu0  ;;  %5713 = vmatmul.mubr.msk.f32.gmra.mxu1 %vm9166_vm14, %v5682_v37  ;;  %vm9180_vm14 = vmmov %vm9151_vm0 }
 0x75f   : > { %v3793_v19 = vpop.f32.mrf.mxu0 }
 0x760   : > { %5715 = vmatprep.mubr.msk.f32.mxu1 %vm9151_vm0, %v3793_v19 }
 0x761   : > { %v5688_v21 = vpop.f32.mrf.mxu0  ;;  %5716 = vmatmul.mubr.msk.f32.gmra.mxu1 %vm9167_vm4, %v5685_v14  ;;  %vm9181_vm4 = vmmov %vm9151_vm0 }
 0x763   : > { %v3803_v52 = vpop.f32.mrf.mxu0 }
 0x764   : > { %5718 = vmatprep.mubr.msk.f32.mxu1 %vm9168_vm8, %v3803_v52  ;;  %vm9182_vm8 = vmmov %vm9151_vm0 }
 0x765   : > { %5719 = vmatmul.mubr.msk.f32.gmra.mxu1 %vm9169_vm1, %v5688_v21  ;;  %vm9183_vm1 = vmmov %vm9151_vm0 }
 0x766   : > { %5761 = vmatprep.mubr.msk.f32.mxu1 %vm9170_vm11, %v8642_v27  ;;  %vm9184_vm11 = vmmov %vm9151_vm0  ;;  %v8735_v27 = vld [vmem:[#allocation2 + $0x1a0] ss:$0 sm:$0xff] }
 0x769   : > { %5762 = vmatmul.mubr.msk.f32.vlgmr.msra.gmra.mxu1 %vm9171_vm5, %v8638_v50  ;;  %vm9185_vm5 = vmmov 0  }
 0x76a   : > { %5764 = vmatprep.mubr.msk.f32.mxu1 %vm9172_vm7, %v8634_v30  ;;  %vm9186_vm7 = vmmov %vm9151_vm0 }
 0x76d   : > { %5765 = vmatmul.mubr.msk.f32.gmra.mxu1 %vm9173_vm2, %v8630_v41  ;;  %vm9187_vm2 = vmmov %vm9151_vm0 }
 0x76e   : > { %5767 = vmatprep.mubr.msk.f32.mxu1 %vm9174_vm15, %v8626_v54  ;;  %vm9188_vm15 = vmmov %vm9151_vm0 }
 0x771   : > { %5768 = vmatmul.mubr.msk.f32.gmra.mxu1 %vm9175_vm6, %v8620_v10  ;;  %vm9189_vm6 = vmmov %vm9151_vm0 }
 0x772   : > { %5770 = vmatprep.mubr.msk.f32.mxu1 %vm9176_vm3, %v8613_v51  ;;  %vm9190_vm3 = vmmov %vm9151_vm0 }
 0x775   : > { %5771 = vmatmul.mubr.msk.f32.gmra.mxu1 %vm9177_vm9, %v8606_v26  ;;  %vm9191_vm9 = vmmov %vm9151_vm0 }
 0x776   : > { %5773 = vmatprep.mubr.msk.f32.mxu1 %vm9178_vm12, %v8597_v57  ;;  %vm9192_vm12 = vmmov %vm9151_vm0 }
 0x779   : > { %5774 = vmatmul.mubr.msk.f32.gmra.mxu1 %vm9179_vm10, %v8588_v24  ;;  %v4447_v24 = vld [vmem:[#allocation2 + $0x2e8] sm:$0xff]  ;;  %vm9193_vm10 = vmmov %vm9151_vm0 }
 0x77a   : > { %5776 = vmatprep.mubr.msk.f32.mxu1 %vm9180_vm14, %v8579_v13  ;;  %5785 = vmatprep.subr.mxu0 %v4447_v24  ;;  %v4446_v13 = vld [vmem:[#allocation2 + $0x2e0] sm:$0xff]  ;;  %vm9194_vm14 = vmmov %vm9151_vm0 }
 0x77b   : > { %5786 = vmatpush3.msra.mxu0 %v4447_v24 }
 0x77c   : > { %5787 = vmatprep.subr.mxu0 %v4446_v13 }
 0x77d   : > { %5777 = vmatmul.mubr.msk.f32.gmra.mxu1 %vm9151_vm0, %v8570_v17  ;;  %5788 = vmatpush3.msra.mxu0 %v4446_v13  ;;  %v4445_v17 = vld [vmem:[#allocation2 + $0x2d8] sm:$0xff] }
 0x77e   : > { %5779 = vmatprep.mubr.msk.f32.mxu1 %vm9181_vm4, %v8561_v6  ;;  %5789 = vmatprep.subr.mxu0 %v4445_v17  ;;  %v4444_v6 = vld [vmem:[#allocation2 + $0x2d0] sm:$0xff]  ;;  %vm9195_vm4 = vmmov %vm9151_vm0 }
 0x77f   : > { %5790 = vmatpush3.msra.mxu0 %v4445_v17 }
 0x780   : > { %5791 = vmatprep.subr.mxu0 %v4444_v6 }
 0x781   : > { %5780 = vmatmul.mubr.msk.f32.gmra.mxu1 %vm9182_vm8, %v8553_v33  ;;  %5792 = vmatpush3.msra.mxu0 %v4444_v6  ;;  %v5731_v33 = vpop.f32.mrf.mxu0  ;;  %vm9196_vm8 = vmmov %vm9151_vm0 }
 0x782   : > { %5782 = vmatprep.mubr.msk.f32.mxu1 %vm9183_vm1, %v8545_v22  ;;  %vm9197_vm1 = vmmov %vm9151_vm0 }
 0x783   : > { %v4147_v57 = vpop.f32.mrf.mxu0 }
 0x785   : > { %5783 = vmatmul.mubr.msk.f32.gmra.mxu1 %vm9184_vm11, %v8539_v55  ;;  %v5734_v51 = vpop.f32.mrf.mxu0  ;;  %vm9198_vm11 = vmmov %vm9151_vm0 }
 0x786   : > { %5849 = vmatprep.mubr.msk.f32.mxu1 %vm9185_vm5, %v9160_v34  ;;  %vm9199_vm5 = vmmov %vm9151_vm0 }
 0x787   : > { %v4157_v10 = vpop.f32.mrf.mxu0 }
 0x789   : > { %v5737_v28 = vpop.f32.mrf.mxu0 }
 0x78b   : > { %v4167_v16 = vpop.f32.mrf.mxu0 }
 0x78d   : > { %v5740_v30 = vpop.f32.mrf.mxu0 }
 0x78f   : > { %v4177_v9 = vpop.f32.mrf.mxu0 }
 0x791   : > { %v5743_v61 = vpop.f32.mrf.mxu0 }
 0x793   : > { %v4187_v8 = vpop.f32.mrf.mxu0 }
 0x795   : > { %v5746_v47 = vpop.f32.mrf.mxu0 }
 0x809   : > { %v5699_v22 = vpop.f32.mrf.mxu1 }
 0x80a   : > { %v4014_v43 = vadd.f32 %v5699_v22, %v8735_v27 }
 0x80b   : > { %v3930_v26 = vpop.f32.mrf.mxu1 }
 0x80c   : > { %v4013_v32 = vadd.f32 %v8735_v27, %v3930_v26  ;;  %v4227_v15 = vadd.f32 %v5731_v33, %v4014_v43  ;;  %v4197_v33 = vpop.f32.mrf.mxu0 }
 0x80d   : > { %v5702_v55 = vpop.f32.mrf.mxu1 }
 0x80e   : > { %v4016_v48 = vadd.f32 %v5702_v55, %v8735_v27  ;;  %v4226_v53 = vadd.f32 %v4147_v57, %v4013_v32  ;;  %v4397_v31 = vmax.f32 %v4227_v15, 0.0 }
 0x80f   : > { %v3940_v29 = vpop.f32.mrf.mxu1 }
 0x810   : > { %v4015_v23 = vadd.f32 %v8735_v27, %v3940_v29  ;;  %v4229_v4 = vadd.f32 %v5734_v51, %v4016_v48  ;;  %v4396_v63 = vmax.f32 %v4226_v53, 0.0 }
 0x811   : > { %v5705_v58 = vpop.f32.mrf.mxu1 }
 0x812   : > { %v4018_v45 = vadd.f32 %v5705_v58, %v8735_v27  ;;  %v4228_v0 = vadd.f32 %v4157_v10, %v4015_v23  ;;  %v4399_v60 = vmax.f32 %v4229_v4, 0.0 }
 0x813   : > { %v3950_v2 = vpop.f32.mrf.mxu1 }
 0x814   : > { %v4017_v46 = vadd.f32 %v8735_v27, %v3950_v2  ;;  %v4231_v44 = vadd.f32 %v5737_v28, %v4018_v45  ;;  %v4398_v36 = vmax.f32 %v4228_v0, 0.0 }
 0x815   : > { %v5708_v12 = vpop.f32.mrf.mxu1 }
 0x816   : > { %v4230_v5 = vadd.f32 %v4167_v16, %v4017_v46  ;;  %v4020_v18 = vadd.f32 %v5708_v12, %v8735_v27  ;;  %v4401_v22 = vmax.f32 %v4231_v44, 0.0 }
 0x817   : > { %v3960_v54 = vpop.f32.mrf.mxu1 }
 0x818   : > { %v4019_v14 = vadd.f32 %v8735_v27, %v3960_v54  ;;  %v4400_v57 = vmax.f32 %v4230_v5, 0.0  ;;  %v4233_v26 = vadd.f32 %v5740_v30, %v4020_v18  ;;  %v5749_v30 = vpop.f32.mrf.mxu0 }
 0x819   : > { %v5711_v1 = vpop.f32.mrf.mxu1 }
 0x81a   : > { %v4022_v55 = vadd.f32 %v5711_v1, %v8735_v27  ;;  %v4232_v29 = vadd.f32 %v4177_v9, %v4019_v14  ;;  %v4403_v32 = vmax.f32 %v4233_v26, 0.0 }
 0x81b   : > { %v3970_v41 = vpop.f32.mrf.mxu1 }
 0x81c   : > { %v4021_v58 = vadd.f32 %v8735_v27, %v3970_v41  ;;  %v4235_v1 = vadd.f32 %v5743_v61, %v4022_v55  ;;  %v4402_v48 = vmax.f32 %v4232_v29, 0.0 }
 0x81d   : > { %v8731_v38 = vpop.f32.mrf.mxu1 }
 0x81e   : > { %v4024_v15 = vadd.f32 %v8731_v38, %v8735_v27  ;;  %v4234_v53 = vadd.f32 %v4187_v8, %v4021_v58  ;;  %v4207_v38 = vpop.f32.mrf.mxu0  ;;  %v4405_v46 = vmax.f32 %v4235_v1, 0.0 }
 0x81f   : > { %v8733_v50 = vpop.f32.mrf.mxu1 }
 0x820   : > { %v4023_v41 = vadd.f32 %v8735_v27, %v8733_v50  ;;  %v4404_v8 = vmax.f32 %v4234_v53, 0.0  ;;  %v5752_v5 = vpop.f32.mrf.mxu0 }
 0x821   : > { %v8737_v40 = vpop.f32.mrf.mxu1 }
 0x822   : > { %v4236_v50 = vadd.f32 %v4197_v33, %v4023_v41 }
 0x823   : > { %v8740_v25 = vpop.f32.mrf.mxu1 }
 0x824   : > { %v4406_v18 = vmax.f32 %v4236_v50, 0.0 }
 0x825   : > { %v8743_v39 = vpop.f32.mrf.mxu1 }
 0x827   : > { %v8746_v11 = vpop.f32.mrf.mxu1 }
 0x829   : > { %v5763_v62 = vpop.f32.mrf.mxu1 }
 0x82a   : > { %v4323_v3 = vadd.f32 %v5763_v62, %v8748_v7 }
 0x82b   : > { %v4317_v59 = vpop.f32.mrf.mxu1 }
 0x82c   : > { %v4318_v42 = vadd.f32 %v8748_v7, %v4317_v59  ;;  %v4413_v35 = vadd.f32 %v4397_v31, %v4323_v3  ;;  %v4237_v59 = vadd.f32 %v5746_v47, %v4024_v15 }
 0x82d   : > { %v5766_v49 = vpop.f32.mrf.mxu1 }
 0x82e   : > { %v4412_v20 = vadd.f32 %v4396_v63, %v4318_v42  ;;  %v4333_v56 = vadd.f32 %v5766_v49, %v8748_v7  ;;  %v4429_v52 = vmax.f32 %v4413_v35, 0.0  ;;  %v4026_v63 = vadd.f32 %v8737_v40, %v8735_v27 }
 0x82f   : > { %v4327_v37 = vpop.f32.mrf.mxu1  ;;  %v4025_v42 = vadd.f32 %v8735_v27, %v8740_v25  ;;  %v4407_v40 = vmax.f32 %v4237_v59, 0.0 }
 0x830   : > { %v4428_v19 = vmax.f32 %v4412_v20, 0.0  ;;  %v4328_v21 = vadd.f32 %v8748_v7, %v4327_v37  ;;  %v4415_v24 = vadd.f32 %v4399_v60, %v4333_v56  ;;  %v4239_v37 = vadd.f32 %v5749_v30, %v4026_v63 }
 0x831   : > { %v5769_v13 = vpop.f32.mrf.mxu1  ;;  %v4238_v25 = vadd.f32 %v4207_v38, %v4025_v42  ;;  %v4656_v42 = vld [vmem:[#allocation2 + $0x360] sm:$0xff] }
 0x832   : > { %v4414_v17 = vadd.f32 %v4398_v36, %v4328_v21  ;;  %v4343_v6 = vadd.f32 %v5769_v13, %v8748_v7  ;;  %5793 = vmatprep.mubr.msk.f32.mxu0 %vm9186_vm7, %v4428_v19  ;;  %v4431_v12 = vmax.f32 %v4415_v24, 0.0  ;;  %v4028_v36 = vadd.f32 %v8743_v39, %v8735_v27  ;;  %vm9200_vm7 = vmmov %vm9151_vm0 }
 0x833   : > { %v4337_v51 = vpop.f32.mrf.mxu1  ;;  %5794 = vmatmul.mubr.msk.f32.vlgmr.msra.gmra.mxu0 %vm9187_vm2, %v4429_v52  ;;  %v4027_v19 = vadd.f32 %v8735_v27, %v8746_v11  ;;  %v4409_v39 = vmax.f32 %v4239_v37, 0.0  ;;  %v4408_v55 = vmax.f32 %v4238_v25, 0.0  ;;  %v4651_v37 = vld [vmem:[#allocation2 + $0x338] sm:$0xff] }
 0x834   : > { %v4430_v10 = vmax.f32 %v4414_v17, 0.0  ;;  %v4338_v2 = vadd.f32 %v8748_v7, %v4337_v51  ;;  %v4417_v28 = vadd.f32 %v4401_v22, %v4343_v6  ;;  %v4217_v22 = vpop.f32.mrf.mxu0 }
 0x835   : > { %v5772_v54 = vpop.f32.mrf.mxu1  ;;  %v4240_v51 = vadd.f32 %v4217_v22, %v4027_v19  ;;  %v4649_v19 = vld [vmem:[#allocation2 + $0x328] sm:$0xff] }
 0x836   : > { %v4416_v16 = vadd.f32 %v4400_v57, %v4338_v2  ;;  %v4353_v43 = vadd.f32 %v5772_v54, %v8748_v7  ;;  %5796 = vmatprep.mubr.msk.f32.mxu0 %vm9188_vm15, %v4430_v10  ;;  %v4433_v3 = vmax.f32 %v4417_v28, 0.0  ;;  %v4241_v57 = vadd.f32 %v5752_v5, %v4028_v36  ;;  %v4645_v22 = vld [vmem:[#allocation2 + $0x308] sm:$0xff] }
 0x837   : > { %v4347_v9 = vpop.f32.mrf.mxu1  ;;  %5797 = vmatmul.mubr.msk.f32.gmra.mxu0 %vm9189_vm6, %v4431_v12 }
 0x838   : > { %v4432_v23 = vmax.f32 %v4416_v16, 0.0  ;;  %v4348_v62 = vadd.f32 %v8748_v7, %v4347_v9  ;;  %v4419_v31 = vadd.f32 %v4403_v32, %v4353_v43  ;;  %v4411_v28 = vmax.f32 %v4241_v57, 0.0  ;;  %v4644_v57 = vld [vmem:[#allocation2 + $0x300] sm:$0xff] }
 0x839   : > { %v5775_v4 = vpop.f32.mrf.mxu1  ;;  %v4410_v16 = vmax.f32 %v4240_v51, 0.0 }
 0x83a   : > { %v4418_v45 = vadd.f32 %v4402_v48, %v4348_v62  ;;  %v4363_v61 = vadd.f32 %v5775_v4, %v8748_v7  ;;  %5799 = vmatprep.mubr.msk.f32.mxu0 %vm9190_vm3, %v4432_v23  ;;  %v4435_v20 = vmax.f32 %v4419_v31, 0.0  ;;  %v4674_v48 = vld [vmem:[#allocation2 + $0x378] sm:$0x1] }
 0x83b   : > { %v4357_v0 = vpop.f32.mrf.mxu1  ;;  %5800 = vmatmul.mubr.msk.f32.gmra.mxu0 %vm9191_vm9, %v4433_v3  ;;  %5916 = vpush %v4674_v48 }
 0x83c   : > { %v4434_v35 = vmax.f32 %v4418_v45, 0.0  ;;  %v4358_v49 = vadd.f32 %v8748_v7, %v4357_v0  ;;  %v4421_v56 = vadd.f32 %v4405_v46, %v4363_v61  ;;  %v4657_v0 = vld [vmem:[#allocation2 + $0x368] sm:$0xff] }
 0x83d   : > { %v5778_v60 = vpop.f32.mrf.mxu1 }
 0x83e   : > { %v4420_v44 = vadd.f32 %v4404_v8, %v4358_v49  ;;  %v4373_v47 = vadd.f32 %v5778_v60, %v8748_v7  ;;  %5802 = vmatprep.mubr.msk.f32.mxu0 %vm9192_vm12, %v4434_v35  ;;  %v4437_v24 = vmax.f32 %v4421_v56, 0.0  ;;  %v4655_v49 = vld [vmem:[#allocation2 + $0x358] sm:$0xff]  ;;  %v4654_v60 = vld [vmem:[#allocation2 + $0x350] sm:$0xff] }
 0x83f   : > { %v4367_v14 = vpop.f32.mrf.mxu1  ;;  %5803 = vmatmul.mubr.msk.f32.gmra.mxu0 %vm9193_vm10, %v4435_v20 }
 0x840   : > { %v4436_v21 = vmax.f32 %v4420_v44, 0.0  ;;  %v4368_v52 = vadd.f32 %v8748_v7, %v4367_v14  ;;  %v4423_v13 = vadd.f32 %v4407_v40, %v4373_v47  ;;  %v4653_v47 = vld [vmem:[#allocation2 + $0x348] sm:$0xff]  ;;  %v4652_v40 = vld [vmem:[#allocation2 + $0x340] sm:$0xff]  ;;  %v4650_v14 = vld [vmem:[#allocation2 + $0x330] sm:$0xff] }
 0x841   : > { %v5781_v17 = vpop.f32.mrf.mxu1 }
 0x842   : > { %v4422_v6 = vadd.f32 %v4406_v18, %v4368_v52  ;;  %v4383_v33 = vadd.f32 %v5781_v17, %v8748_v7  ;;  %5805 = vmatprep.mubr.msk.f32.mxu0 %vm9194_vm14, %v4436_v21  ;;  %v4439_v29 = vmax.f32 %v4423_v13, 0.0  ;;  %v4648_v52 = vld [vmem:[#allocation2 + $0x320] sm:$0xff]  ;;  %v4647_v13 = vld [vmem:[#allocation2 + $0x318] sm:$0xff] }
 0x843   : > { %v4377_v26 = vpop.f32.mrf.mxu1  ;;  %5806 = vmatmul.mubr.msk.f32.gmra.mxu0 %vm9151_vm0, %v4437_v24 }
 0x844   : > { %v4438_v27 = vmax.f32 %v4422_v6, 0.0  ;;  %v4378_v11 = vadd.f32 %v8748_v7, %v4377_v26  ;;  %v4425_v58 = vadd.f32 %v4409_v39, %v4383_v33  ;;  %v4646_v6 = vld [vmem:[#allocation2 + $0x310] sm:$0xff] }
 0x845   : > { %v5784_v10 = vpop.f32.mrf.mxu1 }
 0x846   : > { %v4424_v2 = vadd.f32 %v4408_v55, %v4378_v11  ;;  %v4393_v12 = vadd.f32 %v5784_v10, %v8748_v7  ;;  %5808 = vmatprep.mubr.msk.f32.mxu0 %vm9195_vm4, %v4438_v27  ;;  %v4441_v32 = vmax.f32 %v4425_v58, 0.0  ;;  %v4643_v55 = vld [vmem:[#allocation2 + $0x2f8] sm:$0xff]  ;;  %v4642_v27 = vld [vmem:[#allocation2 + $0x2f0] sm:$0xff] }
 0x847   : > { %v4387_v54 = vpop.f32.mrf.mxu1  ;;  %5809 = vmatmul.mubr.msk.f32.gmra.mxu0 %vm9196_vm8, %v4439_v29  ;;  %v4641_v58 = vld [vmem:[#allocation2 + $0x370] sm:$0xff] }
 0x848   : > { %v4440_v43 = vmax.f32 %v4424_v2, 0.0  ;;  %v4388_v30 = vadd.f32 %v8748_v7, %v4387_v54  ;;  %v4427_v1 = vadd.f32 %v4411_v28, %v4393_v12 }
 0x84a   : > { %v4426_v15 = vadd.f32 %v4410_v16, %v4388_v30  ;;  %5811 = vmatprep.mubr.msk.f32.mxu0 %vm9197_vm1, %v4440_v43  ;;  %v4443_v9 = vmax.f32 %v4427_v1, 0.0 }
 0x84b   : > { %5812 = vmatmul.mubr.msk.f32.gmra.mxu0 %vm9198_vm11, %v4441_v32 }
 0x84c   : > { %v4442_v41 = vmax.f32 %v4426_v15, 0.0 }
 0x84e   : > { %5814 = vmatprep.mubr.msk.f32.mxu0 %vm9199_vm5, %v4442_v41 }
 0x84f   : > { %5815 = vmatmul.mubr.msk.f32.gmra.mxu0 %vm9200_vm7, %v4443_v9 }
 0x86c   : > { %s5917_s26 = spop %5916 }
 0x86d   : > { %v4677_v10 = vstv %s5917_s26 }
 0x8f3   : > { %v8801_v53 = vpop.f32.mrf.mxu0 }
 0x8f4   : > { %v4659_v11 = vmul.f32 %v8801_v53, %v4643_v55 }
 0x8f5   : > { %v8803_v23 = vpop.f32.mrf.mxu0 }
 0x8f6   : > { %v4658_v29 = vmul.f32 %v4642_v27, %v8803_v23 }
 0x8f7   : > { %v5798_v7 = vpop.f32.mrf.mxu0 }
 0x8f8   : > { %v4661_v26 = vmul.f32 %v5798_v7, %v4645_v22 }
 0x8f9   : > { %v8805_v62 = vpop.f32.mrf.mxu0 }
 0x8fa   : > { %v4660_v51 = vmul.f32 %v4644_v57, %v8805_v62 }
 0x8fb   : > { %v5801_v3 = vpop.f32.mrf.mxu0 }
 0x8fc   : > { %v4663_v33 = vmul.f32 %v5801_v3, %v4647_v13 }
 0x8fd   : > { %v4582_v31 = vpop.f32.mrf.mxu0 }
 0x8fe   : > { %v4662_v39 = vmul.f32 %v4646_v6, %v4582_v31 }
 0x8ff   : > { %v5804_v4 = vpop.f32.mrf.mxu0 }
 0x900   : > { %v4665_v24 = vmul.f32 %v5804_v4, %v4649_v19 }
 0x901   : > { %v4592_v45 = vpop.f32.mrf.mxu0 }
 0x902   : > { %v4664_v17 = vmul.f32 %v4648_v52, %v4592_v45 }
 0x903   : > { %v5807_v61 = vpop.f32.mrf.mxu0 }
 0x904   : > { %v4667_v25 = vmul.f32 %v5807_v61, %v4651_v37 }
 0x905   : > { %v4602_v38 = vpop.f32.mrf.mxu0 }
 0x906   : > { %v4666_v21 = vmul.f32 %v4650_v14, %v4602_v38 }
 0x907   : > { %v5810_v46 = vpop.f32.mrf.mxu0 }
 0x908   : > { %v4669_v18 = vmul.f32 %v5810_v46, %v4653_v47 }
 0x909   : > { %v4612_v59 = vpop.f32.mrf.mxu0 }
 0x90a   : > { %v4668_v36 = vmul.f32 %v4652_v40, %v4612_v59 }
 0x90b   : > { %v5813_v50 = vpop.f32.mrf.mxu0 }
 0x90c   : > { %v4671_v44 = vmul.f32 %v5813_v50, %v4655_v49 }
 0x90d   : > { %v4622_v63 = vpop.f32.mrf.mxu0 }
 0x90e   : > { %v4670_v5 = vmul.f32 %v4654_v60, %v4622_v63 }
 0x90f   : > { %v5816_v8 = vpop.f32.mrf.mxu0 }
 0x910   : > { %v4673_v35 = vmul.f32 %v5816_v8, %v4657_v0 }
 0x911   : > { %v4632_v20 = vpop.f32.mrf.mxu0 }
 0x912   : > { %v4672_v56 = vmul.f32 %v4656_v42, %v4632_v20  ;;  %5818 = vmatpush3.msra.mxu1 %v4673_v35 }
 0x913   : > { %5819 = vmatprep.subr.mxu1 %v9160_v34 }
 0x914   : > { %5820 = vmatpush3.msra.mxu1 %v4672_v56 }
 0x915   : > { %5821 = vmatprep.subr.mxu1 %v9160_v34 }
 0x916   : > { %5822 = vmatpush3.msra.mxu1 %v4671_v44 }
 0x917   : > { %5823 = vmatprep.subr.mxu1 %v9160_v34 }
 0x918   : > { %5824 = vmatpush3.msra.mxu1 %v4670_v5 }
 0x919   : > { %5825 = vmatprep.subr.mxu1 %v9160_v34 }
 0x91a   : > { %5826 = vmatpush3.msra.mxu1 %v4669_v18 }
 0x91b   : > { %5827 = vmatprep.subr.mxu1 %v9160_v34 }
 0x91c   : > { %5828 = vmatpush3.msra.mxu1 %v4668_v36 }
 0x91d   : > { %5829 = vmatprep.subr.mxu1 %v9160_v34 }
 0x91e   : > { %5830 = vmatpush3.msra.mxu1 %v4667_v25 }
 0x91f   : > { %5831 = vmatprep.subr.mxu1 %v9160_v34 }
 0x920   : > { %5832 = vmatpush3.msra.mxu1 %v4666_v21 }
 0x921   : > { %5833 = vmatprep.subr.mxu1 %v9160_v34 }
 0x922   : > { %5834 = vmatpush3.msra.mxu1 %v4665_v24 }
 0x923   : > { %5835 = vmatprep.subr.mxu1 %v9160_v34 }
 0x924   : > { %5836 = vmatpush3.msra.mxu1 %v4664_v17 }
 0x925   : > { %5837 = vmatprep.subr.mxu1 %v9160_v34 }
 0x926   : > { %5838 = vmatpush3.msra.mxu1 %v4663_v33 }
 0x927   : > { %5839 = vmatprep.subr.mxu1 %v9160_v34 }
 0x928   : > { %5840 = vmatpush3.msra.mxu1 %v4662_v39 }
 0x929   : > { %5841 = vmatprep.subr.mxu1 %v9160_v34 }
 0x92a   : > { %5842 = vmatpush3.msra.mxu1 %v4661_v26 }
 0x92b   : > { %5843 = vmatprep.subr.mxu1 %v9160_v34 }
 0x92c   : > { %5844 = vmatpush3.msra.mxu1 %v4660_v51 }
 0x92d   : > { %5845 = vmatprep.subr.mxu1 %v9160_v34 }
 0x92e   : > { %5846 = vmatpush3.msra.mxu1 %v4659_v11 }
 0x92f   : > { %5847 = vmatprep.subr.mxu1 %v9160_v34 }
 0x930   : > { %5848 = vmatpush3.msra.mxu1 %v4658_v29 }
 0x931   : > { %5850 = vmatmul.mubr.f32.vlgmr.msra.gmra.mxu1 %v4641_v58 }
 0x9f1   : > { %v4745_v2 = vpop.f32.mrf.mxu1 }
 0x9f2   : > { %v4746_v12 = vadd.f32 %v4745_v2, %v4677_v10 }
 0x9f3   : > { %v5851_v28 = vpop.f32.mrf.mxu1 }
 0x9f4   : > { %4749 = vst.msk [vmem:[%s192_s28] sm:$0xff] %vm2664_vm13, %v4746_v12 }
 0x9f5   : > { %6084 = shalt.err (!%p6081_p1)
}
 0x9f6   : > { %s6085_s10 = scalar_lea.hbm %s8830_s5, 128  ;;  %s6089_s19 = scalar_lea.hbm %s8869_s3, 256 }
 0x9f7   : > { %p6086_p2 = scmp.ne.s32.totalorder %s8830_s5, %s6085_s10  ;;  %p6090_p7 = scmp.lt.s32.totalorder %s8830_s5, %s8869_s3 }
 0x9f8   : > { %p6091_p8 = scmp.lt.s32.totalorder %s6089_s19, %s6085_s10 }
 0x9f9   : > { %p6087_p3 = pnand %p6086_p2, %p6208_p5 }
 0x9fa   : > { %p6092_p6 = por %p6091_p8, %p6090_p7 }
 0x9fb   : > { %p6088_p4 = pneg %p6087_p3 }
 0x9fd   : > { %p6093_p9 = pnand %p6092_p6, %p6088_p4 }
 0x9ff   : > { %6096 = shalt.err (!%p6093_p9)
}
 0xa00   : > { %5922 = dma.vmem_to_hbm [thread:$0]  (%p6208_p5), %s4765_s29, 128, %s8830_s5, %s4751_s6  }
 0xa01 PF: > { %p5934_p10 = scmp.ge.s32.totalorder %s6135_s15, 2  ;;  %s4776_s25 = sand.u32 1, %s6123_s12  }
 0xa02   : > { %p9201_p11 = scmp.ne.s32.totalorder %s8972_s23, 0  ;;  %s4777_s26 = scalar_lea.sflag [#allocation4], %s4776_s25 }
 0xa04   : > { %p5929_p12 = pnand %p5934_p10, %p9201_p11 }
 0xa06   : > { %p5930_p13 = pneg %p5929_p12 }
 0xa08   : > { %6118 = dma.done.wait (%p5930_p13), %s4777_s26, 128  }
 0xa09   : > { %6120 = vsyncadd (%p5930_p13), %s4777_s26, 4294967168  ;;  %p14_p0 = scmp.ge.s32.totalorder %s6195_s18, 4   ;;  %s9202_s12 = smov %s6127_s13 }
 0xa0a   : > { %s9203_s13 = smov %s6131_s14  ;;  %s9204_s14 = smov %s6206_s21 }
 0xa0b   : > { %s9205_s15 = smov %s6195_s18  ;;  %16 = sbr.rel (!%p14_p0) target bundleno = 4 (0x4), region = 75 }
 0xa10   :  { %4782 = vsyncpa [#allocation3], 1 }
 0xa11   :  { %4784 = vsyncpa [#allocation3 + $0x1], 1 }
 0xa12   :  { %4785 = vsyncpa [#allocation4], 1 }
 0xa13   :  { %4787 = vsyncpa [#allocation4 + $0x1], 1 }

</bundles_post_ra>
